<compile_context>
chip_gen: v7x
topology: tpu7x:2x2x1
jax: 0.10.0
libtpu: 0.0.40
codegen_flags: <defaults>
</compile_context>

<pallas_src>
import jax
import jax.numpy as jnp
from jax.experimental import pallas as pl
from jax.experimental.pallas import tpu as pltpu


# ------------------------- in-kernel math helpers -------------------------
# Exact (erf-based) GELU, matching torch.nn.GELU().  Abramowitz & Stegun
# 7.1.26 polynomial (~1.5e-7 accurate); exp and the approximate reciprocal
# both run on the EUP slot, which is otherwise idle in this kernel.
_ERF_P = 0.3275911
_ERF_A = (0.254829592, -0.284496736, 1.421413741, -1.453152027, 1.061405429)


def _erf(x):
    ax = jnp.abs(x)
    t = pl.reciprocal(1.0 + _ERF_P * ax, approx=True)        # EUP rcp (was f32 divide)
    poly = t * (_ERF_A[0] + t * (_ERF_A[1] + t * (_ERF_A[2] + t * (_ERF_A[3] + t * _ERF_A[4]))))
    y = 1.0 - poly * jnp.exp(-ax * ax)                        # EUP exp
    return jnp.where(x >= 0.0, y, -y)


def _gelu(x):
    return 0.5 * x * (1.0 + _erf(x * 0.7071067811865476))


# ------------------------------- fused kernel ------------------------------
def _mlp_ffn_kernel(x_ref, w1_ref, b1_ref, w2_ref, b2_ref, o_ref):
    # Weights arrive as bf16 (cast in the wrapper); x is cast to bf16 here so
    # both matmuls run bf16 on the MXU while accumulating in f32.  If the
    # surrounding model runs bf16 end-to-end, x/out already are bf16 and the
    # cast is a no-op.
    x = x_ref[...].astype(jnp.bfloat16)                                   # [tm, c1]
    h = jnp.dot(x, w1_ref[...], preferred_element_type=jnp.float32)       # MXU, f32 acc
    h = h + b1_ref[...].astype(jnp.float32)
    h = _gelu(h)                                                          # stays in VMEM/vregs
    y = jnp.dot(h.astype(jnp.bfloat16), w2_ref[...],
                preferred_element_type=jnp.float32)                       # MXU, f32 acc
    y = y + b2_ref[...].astype(jnp.float32)
    o_ref[...] = y.astype(o_ref.dtype)


# --------------------------------- wrapper ---------------------------------
def _round_up(v, m):
    return ((v + m - 1) // m) * m


def _pick_row_tile(M, c2, max_rows_per_tile):
    """Row tile: the largest 8-aligned tile that fits the cap.

    A >=2-step grid (to shard across v7x's two TensorCores) is only forced
    when activation traffic dominates the (per-core re-DMA'd) weight traffic,
    i.e. M >= 2*c2.  On 1-TC chips (v5e/v6e) extra grid steps only add
    per-step overhead, so we never split there.
    """
    tm = min(max_rows_per_tile, max(8, _round_up(M, 8)))
    if _round_up(M, tm) // tm < 2 and M >= 2 * c2:
        tm = max(8, _round_up(pl.cdiv(M, 2), 8))
    return tm


def mlp_ffn(x, params, *, max_rows_per_tile=1024):
    """Fused fc1 -> GELU -> fc2.  x: [..., c1] -> [..., c1]."""
    w1, b1, w2, b2 = params["fc1_w"], params["fc1_b"], params["fc2_w"], params["fc2_b"]
    *lead, c1 = x.shape
    c2 = w1.shape[1]

    xf = x.reshape(-1, c1)
    M = xf.shape[0]

    tm = _pick_row_tile(M, c2, max_rows_per_tile)
    Mp = _round_up(M, tm)
    if Mp != M:
        xf = jnp.pad(xf, ((0, Mp - M), (0, 0)))  # padded rows are finite, sliced off below

    # bf16 weights: half the DMA and half the VMEM residency; f32 accumulation
    # happens inside the kernel.  Biases stay f32 (added to the f32 acc).
    w1b = w1.astype(jnp.bfloat16)
    w2b = w2.astype(jnp.bfloat16)
    b1r = b1.reshape(1, c2).astype(jnp.float32)
    b2r = b2.reshape(1, c1).astype(jnp.float32)

    itemsize = jnp.dtype(x.dtype).itemsize
    cost = pl.CostEstimate(
        flops=4 * Mp * c1 * c2,                       # two [Mp,c1]x[c1,c2]-class matmuls
        transcendentals=2 * Mp * c2,                  # exp + approx-rcp per hidden element
        bytes_accessed=(Mp * c1 * itemsize            # x in
                        + Mp * c1 * itemsize          # out
                        + 2 * c1 * c2 * 2             # bf16 weights
                        + (c1 + c2) * 4),             # f32 biases
    )

    out = pl.pallas_call(
        _mlp_ffn_kernel,
        out_shape=jax.ShapeDtypeStruct((Mp, c1), x.dtype),
        grid=(Mp // tm,),
        in_specs=[
            pl.BlockSpec((tm, c1), lambda i: (i, 0)),
            # Constant-resident blocks: index_map always (0,0) -> single buffer.
            pl.BlockSpec((c1, c2), lambda i: (0, 0), pipeline_mode=pl.Buffered(1)),
            pl.BlockSpec((1, c2), lambda i: (0, 0), pipeline_mode=pl.Buffered(1)),
            pl.BlockSpec((c2, c1), lambda i: (0, 0), pipeline_mode=pl.Buffered(1)),
            pl.BlockSpec((1, c1), lambda i: (0, 0), pipeline_mode=pl.Buffered(1)),
        ],
        out_specs=pl.BlockSpec((tm, c1), lambda i: (i, 0)),
        compiler_params=pltpu.CompilerParams(dimension_semantics=("parallel",)),
        cost_estimate=cost,
    )(xf, w1b, b1r, w2b, b2r)

    if Mp != M:
        out = out[:M]
    return out.reshape(*lead, c1)


# ----------------------- reference & deterministic init ---------------------
def mlp_ffn_ref(x, params):  # pure-JAX f32 reference (exact erf GELU)
    h = x @ params["fc1_w"] + params["fc1_b"]
    h = jax.nn.gelu(h, approximate=False)
    return h @ params["fc2_w"] + params["fc2_b"]


def make_params(key, c1, c2):
    k1, k2, k3, k4 = jax.random.split(key, 4)
    s1 = 1.0 / jnp.sqrt(jnp.float32(c1))
    s2 = 1.0 / jnp.sqrt(jnp.float32(c2))
    return dict(
        fc1_w=jax.random.uniform(k1, (c1, c2), jnp.float32, -s1, s1),
        fc1_b=jax.random.uniform(k2, (c2,), jnp.float32, -s1, s1),
        fc2_w=jax.random.uniform(k3, (c2, c1), jnp.float32, -s2, s2),
        fc2_b=jax.random.uniform(k4, (c1,), jnp.float32, -s2, s2),
    )


# ----------------------------------- main -----------------------------------
if __name__ == "__main__":
    # Token tensor [B, N, c1] with a 4x hidden expansion (typical FFN usage);
    # channel dims chosen lane-dense (128 / 512).
    B, N, c1, c2 = 2, 64, 128, 512

    root = jax.random.PRNGKey(0)
    kx, kp = jax.random.split(root)
    x = jax.random.normal(kx, (B, N, c1), jnp.float32)
    params = make_params(kp, c1, c2)

    fwd = jax.jit(mlp_ffn)
    out = jax.block_until_ready(fwd(x, params))

    assert out.shape == (B, N, c1), out.shape
    assert bool(jnp.all(jnp.isfinite(out)))
    ref = mlp_ffn_ref(x, params)
    max_err = float(jnp.max(jnp.abs(out - ref)))
    # bf16 MXU operands + approx EUP reciprocal -> looser tolerance than the
    # previous all-f32 version (compare against the f32/exact-erf reference).
    assert bool(jnp.allclose(out, ref, atol=3e-2, rtol=3e-2)), max_err
    print("KERNEL_OK")
</pallas_src>

<mosaic_0001>
module attributes {stable_mosaic.version = 11 : i64} {
  func.func @_mlp_ffn_kernel(%arg0: i32, %arg1: memref<128x128xf32, #tpu.memory_space<vmem>>, %arg2: memref<128x512xbf16, #tpu.memory_space<vmem>>, %arg3: memref<1x512xf32, #tpu.memory_space<vmem>>, %arg4: memref<512x128xbf16, #tpu.memory_space<vmem>>, %arg5: memref<1x128xf32, #tpu.memory_space<vmem>>, %arg6: memref<128x128xf32, #tpu.memory_space<vmem>>) attributes {dimension_semantics = [#tpu.dimension_semantics<parallel>], iteration_bounds = array<i64: 1>, scalar_prefetch = 0 : i64, scratch_operands = 0 : i64, tpu.core_type = #tpu.core_type<tc>, window_params = [{transform_indices = @transform_0, window_bounds = array<i64: 128, 128>}, {pipeline_mode = #tpu.pipeline_mode<synchronous>, transform_indices = @transform_1, window_bounds = array<i64: 128, 512>}, {pipeline_mode = #tpu.pipeline_mode<synchronous>, transform_indices = @transform_2, window_bounds = array<i64: 1, 512>}, {pipeline_mode = #tpu.pipeline_mode<synchronous>, transform_indices = @transform_3, window_bounds = array<i64: 512, 128>}, {pipeline_mode = #tpu.pipeline_mode<synchronous>, transform_indices = @transform_4, window_bounds = array<i64: 1, 128>}, {transform_indices = @transform_5, window_bounds = array<i64: 128, 128>}]} {
    %c0 = arith.constant 0 : index
    %c0_0 = arith.constant 0 : index
    %0 = vector.load %arg1[%c0, %c0_0] : memref<128x128xf32, #tpu.memory_space<vmem>>, vector<128x128xf32>
    %1 = arith.truncf %0 : vector<128x128xf32> to vector<128x128xbf16>
    %c0_1 = arith.constant 0 : index
    %c0_2 = arith.constant 0 : index
    %2 = vector.load %arg2[%c0_1, %c0_2] : memref<128x512xbf16, #tpu.memory_space<vmem>>, vector<128x512xbf16>
    %cst = arith.constant dense<0.000000e+00> : vector<128x512xf32>
    %3 = tpu.matmul %1, %2, %cst {dimension_numbers = #tpu.dot_dimension_numbers<[1], [0], [0], [1], [0, 0, 1, 1], [], []>} : vector<128x128xbf16>, vector<128x512xbf16>, vector<128x512xf32> -> vector<128x512xf32>
    %c0_3 = arith.constant 0 : index
    %c0_4 = arith.constant 0 : index
    %4 = vector.load %arg3[%c0_3, %c0_4] : memref<1x512xf32, #tpu.memory_space<vmem>>, vector<1x512xf32>
    %5 = vector.broadcast %4 : vector<1x512xf32> to vector<128x512xf32>
    %6 = arith.addf %3, %5 : vector<128x512xf32>
    %cst_5 = arith.constant 5.000000e-01 : f32
    %7 = vector.broadcast %cst_5 : f32 to vector<128x512xf32>
    %8 = arith.mulf %7, %6 : vector<128x512xf32>
    %cst_6 = arith.constant 0.707106769 : f32
    %9 = vector.broadcast %cst_6 : f32 to vector<128x512xf32>
    %10 = arith.mulf %6, %9 : vector<128x512xf32>
    %11 = math.absf %10 : vector<128x512xf32>
    %cst_7 = arith.constant 0.327591091 : f32
    %12 = vector.broadcast %cst_7 : f32 to vector<128x512xf32>
    %13 = arith.mulf %12, %11 : vector<128x512xf32>
    %cst_8 = arith.constant 1.000000e+00 : f32
    %14 = vector.broadcast %cst_8 : f32 to vector<128x512xf32>
    %15 = arith.addf %14, %13 : vector<128x512xf32>
    %16 = tpu.reciprocal %15 {approx = true} : vector<128x512xf32> -> vector<128x512xf32>
    %cst_9 = arith.constant 1.06140542 : f32
    %17 = vector.broadcast %cst_9 : f32 to vector<128x512xf32>
    %18 = arith.mulf %16, %17 : vector<128x512xf32>
    %cst_10 = arith.constant -1.45315206 : f32
    %19 = vector.broadcast %cst_10 : f32 to vector<128x512xf32>
    %20 = arith.addf %19, %18 : vector<128x512xf32>
    %21 = arith.mulf %16, %20 : vector<128x512xf32>
    %cst_11 = arith.constant 1.42141378 : f32
    %22 = vector.broadcast %cst_11 : f32 to vector<128x512xf32>
    %23 = arith.addf %22, %21 : vector<128x512xf32>
    %24 = arith.mulf %16, %23 : vector<128x512xf32>
    %cst_12 = arith.constant -0.284496725 : f32
    %25 = vector.broadcast %cst_12 : f32 to vector<128x512xf32>
    %26 = arith.addf %25, %24 : vector<128x512xf32>
    %27 = arith.mulf %16, %26 : vector<128x512xf32>
    %cst_13 = arith.constant 0.254829586 : f32
    %28 = vector.broadcast %cst_13 : f32 to vector<128x512xf32>
    %29 = arith.addf %28, %27 : vector<128x512xf32>
    %30 = arith.mulf %16, %29 : vector<128x512xf32>
    %cst_14 = arith.constant 0.000000e+00 : f32
    %31 = vector.broadcast %cst_14 : f32 to vector<128x512xf32>
    %32 = arith.subf %31, %11 : vector<128x512xf32>
    %33 = arith.mulf %32, %11 : vector<128x512xf32>
    %34 = math.exp %33 : vector<128x512xf32>
    %35 = arith.mulf %30, %34 : vector<128x512xf32>
    %cst_15 = arith.constant 1.000000e+00 : f32
    %36 = vector.broadcast %cst_15 : f32 to vector<128x512xf32>
    %37 = arith.subf %36, %35 : vector<128x512xf32>
    %cst_16 = arith.constant 0.000000e+00 : f32
    %38 = vector.broadcast %cst_16 : f32 to vector<128x512xf32>
    %39 = arith.cmpf oge, %10, %38 : vector<128x512xf32>
    %cst_17 = arith.constant 0.000000e+00 : f32
    %40 = vector.broadcast %cst_17 : f32 to vector<128x512xf32>
    %41 = arith.subf %40, %37 : vector<128x512xf32>
    %42 = arith.select %39, %37, %41 : vector<128x512xi1>, vector<128x512xf32>
    %cst_18 = arith.constant 1.000000e+00 : f32
    %43 = vector.broadcast %cst_18 : f32 to vector<128x512xf32>
    %44 = arith.addf %43, %42 : vector<128x512xf32>
    %45 = arith.mulf %8, %44 : vector<128x512xf32>
    %46 = arith.truncf %45 : vector<128x512xf32> to vector<128x512xbf16>
    %c0_19 = arith.constant 0 : index
    %c0_20 = arith.constant 0 : index
    %47 = vector.load %arg4[%c0_19, %c0_20] : memref<512x128xbf16, #tpu.memory_space<vmem>>, vector<512x128xbf16>
    %cst_21 = arith.constant dense<0.000000e+00> : vector<128x128xf32>
    %48 = tpu.matmul %46, %47, %cst_21 {dimension_numbers = #tpu.dot_dimension_numbers<[1], [0], [0], [1], [0, 0, 1, 1], [], []>} : vector<128x512xbf16>, vector<512x128xbf16>, vector<128x128xf32> -> vector<128x128xf32>
    %c0_22 = arith.constant 0 : index
    %c0_23 = arith.constant 0 : index
    %49 = vector.load %arg5[%c0_22, %c0_23] : memref<1x128xf32, #tpu.memory_space<vmem>>, vector<1x128xf32>
    %50 = vector.broadcast %49 : vector<1x128xf32> to vector<128x128xf32>
    %51 = arith.addf %48, %50 : vector<128x128xf32>
    %c0_24 = arith.constant 0 : index
    %c0_25 = arith.constant 0 : index
    %52 = vector.load %arg6[%c0_24, %c0_25] : memref<128x128xf32, #tpu.memory_space<vmem>>, vector<128x128xf32>
    tpu.vector_store %arg6[%c0_24, %c0_25], %51 {strides = array<i32>} : memref<128x128xf32, #tpu.memory_space<vmem>>, vector<128x128xf32>,
    return
  }
  func.func @transform_0(%arg0: i32) -> (i32, i32) {
    %c0_i32 = arith.constant 0 : i32
    %c0_i32_0 = arith.constant 0 : i32
    return %arg0, %c0_i32 : i32, i32
  }
  func.func @transform_1(%arg0: i32) -> (i32, i32) {
    %c0_i32 = arith.constant 0 : i32
    %c0_i32_0 = arith.constant 0 : i32
    %c0_i32_1 = arith.constant 0 : i32
    return %c0_i32, %c0_i32_0 : i32, i32
  }
  func.func @transform_2(%arg0: i32) -> (i32, i32) {
    %c0_i32 = arith.constant 0 : i32
    %c0_i32_0 = arith.constant 0 : i32
    %c0_i32_1 = arith.constant 0 : i32
    return %c0_i32, %c0_i32_0 : i32, i32
  }
  func.func @transform_3(%arg0: i32) -> (i32, i32) {
    %c0_i32 = arith.constant 0 : i32
    %c0_i32_0 = arith.constant 0 : i32
    %c0_i32_1 = arith.constant 0 : i32
    return %c0_i32, %c0_i32_0 : i32, i32
  }
  func.func @transform_4(%arg0: i32) -> (i32, i32) {
    %c0_i32 = arith.constant 0 : i32
    %c0_i32_0 = arith.constant 0 : i32
    %c0_i32_1 = arith.constant 0 : i32
    return %c0_i32, %c0_i32_0 : i32, i32
  }
  func.func @transform_5(%arg0: i32) -> (i32, i32) {
    %c0_i32 = arith.constant 0 : i32
    %c0_i32_0 = arith.constant 0 : i32
    return %arg0, %c0_i32 : i32, i32
  }
}

</mosaic_0001>

<bundles_post_ra>
// kernel: mlp_ffn.1
= control target key start
LH: loop header
LB: loop body
LE: loop exit
PB: predicated region body
PF: predicated region fallthrough
CT: control target
= control target key end

     0   :  { %v3228_v2 = vmov 0   ;;  %s5564_s0 = inlined_call_operand.vmem [shape: f32[128,128], index: 0, kind: input, shape index: {}]   ;;  %s5565_s1 = inlined_call_operand.vmem [shape: bf16[128,512], index: 1, kind: input, shape index: {}]   ;;  %s5566_s2 = inlined_call_operand.vmem [shape: f32[1,512], index: 2, kind: input, shape index: {}]   ;;  %s5567_s3 = inlined_call_operand.vmem [shape: bf16[512,128], index: 3, kind: input, shape index: {}]   ;;  %s5568_s4 = inlined_call_operand.vmem [shape: f32[1,128], index: 4, kind: input, shape index: {}]   ;;  %s5569_s5 = inlined_call_operand.hbm [shape: f32[128,128], index: 5, kind: output, shape index: {}]  }
   0x1   :  { %v2868_v0 = vld [vmem:[%s5565_s1 + $0x4] ss:$16 sps:$4 sm:$0xff]   ;;  %v2870_v1 = vld [vmem:[%s5565_s1 + $0xc] ss:$16 sps:$4 sm:$0xff]   ;;  %292 = vmatprep.mubr.bf16.mxu0 %v3228_v2  ;;  %405 = vmatprep.mubr.bf16.mxu1 %v3228_v2  ;;  %v2872_v3 = vld [vmem:[%s5565_s1] ss:$16 sps:$4 sm:$0xff]  }
   0x2   :  { %260 = vmatprep.subr.bf16.mxu0 %v2868_v0  ;;  %v2873_v4 = vld [vmem:[%s5565_s1 + $0x8] ss:$16 sps:$4 sm:$0xff]   ;;  %373 = vmatprep.subr.bf16.mxu1 %v2870_v1  ;;  %v2874_v5 = vld [vmem:[%s5565_s1 + $0x24] ss:$16 sps:$4 sm:$0xff]   ;;  %v2876_v6 = vld [vmem:[%s5565_s1 + $0x2c] ss:$16 sps:$4 sm:$0xff]  }
   0x3   :  { %261 = vmatpush1.bf16.msra.mxu0 %v2872_v3  ;;  %374 = vmatpush1.bf16.msra.mxu1 %v2873_v4  ;;  %v2878_v7 = vld [vmem:[%s5565_s1 + $0x20] ss:$16 sps:$4 sm:$0xff]   ;;  %v2879_v8 = vld [vmem:[%s5565_s1 + $0x28] ss:$16 sps:$4 sm:$0xff]   ;;  %v2880_v9 = vld [vmem:[%s5565_s1 + $0x44] ss:$16 sps:$4 sm:$0xff]  }
   0x4   :  { %262 = vmatprep.subr.bf16.mxu0 %v2874_v5  ;;  %375 = vmatprep.subr.bf16.mxu1 %v2876_v6  ;;  %v2882_v10 = vld [vmem:[%s5565_s1 + $0x4c] ss:$16 sps:$4 sm:$0xff]   ;;  %v2884_v11 = vld [vmem:[%s5565_s1 + $0x40] ss:$16 sps:$4 sm:$0xff]   ;;  %v2885_v12 = vld [vmem:[%s5565_s1 + $0x48] ss:$16 sps:$4 sm:$0xff]  }
   0x5   :  { %v2886_v13 = vld [vmem:[%s5565_s1 + $0x64] ss:$16 sps:$4 sm:$0xff]   ;;  %v2888_v14 = vld [vmem:[%s5565_s1 + $0x6c] ss:$16 sps:$4 sm:$0xff]   ;;  %v2890_v15 = vld [vmem:[%s5565_s1 + $0x60] ss:$16 sps:$4 sm:$0xff]  }
   0x6   :  { %v2891_v16 = vld [vmem:[%s5565_s1 + $0x68] ss:$16 sps:$4 sm:$0xff]   ;;  %v2892_v17 = vld [vmem:[%s5565_s1 + $0x84] ss:$16 sps:$4 sm:$0xff]   ;;  %v2894_v18 = vld [vmem:[%s5565_s1 + $0x8c] ss:$16 sps:$4 sm:$0xff]  }
   0x7   :  { %263 = vmatpush1.bf16.msra.mxu0 %v2878_v7  ;;  %376 = vmatpush1.bf16.msra.mxu1 %v2879_v8  ;;  %v2896_v19 = vld [vmem:[%s5565_s1 + $0x80] ss:$16 sps:$4 sm:$0xff]   ;;  %v2897_v20 = vld [vmem:[%s5565_s1 + $0x88] ss:$16 sps:$4 sm:$0xff]   ;;  %v2898_v21 = vld [vmem:[%s5565_s1 + $0xa4] ss:$16 sps:$4 sm:$0xff]  }
   0x8   :  { %264 = vmatprep.subr.bf16.mxu0 %v2880_v9  ;;  %377 = vmatprep.subr.bf16.mxu1 %v2882_v10  ;;  %v2900_v22 = vld [vmem:[%s5565_s1 + $0xac] ss:$16 sps:$4 sm:$0xff]   ;;  %v2902_v23 = vld [vmem:[%s5565_s1 + $0xa0] ss:$16 sps:$4 sm:$0xff]   ;;  %v2903_v24 = vld [vmem:[%s5565_s1 + $0xa8] ss:$16 sps:$4 sm:$0xff]  }
   0x9   :  { %v2904_v25 = vld [vmem:[%s5565_s1 + $0xc4] ss:$16 sps:$4 sm:$0xff]   ;;  %v2906_v26 = vld [vmem:[%s5565_s1 + $0xcc] ss:$16 sps:$4 sm:$0xff]   ;;  %v2908_v27 = vld [vmem:[%s5565_s1 + $0xc0] ss:$16 sps:$4 sm:$0xff]  }
   0xa   :  { %v2909_v28 = vld [vmem:[%s5565_s1 + $0xc8] ss:$16 sps:$4 sm:$0xff]   ;;  %v2910_v29 = vld [vmem:[%s5565_s1 + $0xe4] ss:$16 sps:$4 sm:$0xff]   ;;  %v2912_v30 = vld [vmem:[%s5565_s1 + $0xec] ss:$16 sps:$4 sm:$0xff]  }
   0xb   :  { %265 = vmatpush1.bf16.msra.mxu0 %v2884_v11  ;;  %378 = vmatpush1.bf16.msra.mxu1 %v2885_v12  ;;  %v2914_v31 = vld [vmem:[%s5565_s1 + $0xe0] ss:$16 sps:$4 sm:$0xff]   ;;  %v2915_v32 = vld [vmem:[%s5565_s1 + $0xe8] ss:$16 sps:$4 sm:$0xff]  }
   0xc   :  { %266 = vmatprep.subr.bf16.mxu0 %v2886_v13  ;;  %379 = vmatprep.subr.bf16.mxu1 %v2888_v14  ;;  %v22_v33 = vld [vmem:[%s5564_s0] sm:$0xff]  ;;  %v23_v34 = vld [vmem:[%s5564_s0 + $0x8] sm:$0xff]  ;;  %v24_v40 = vld [vmem:[%s5564_s0 + $0x10] sm:$0xff] }
   0xd   :  { %v2916_v35 = vld [vmem:[%s5567_s3 + $0x40] sm:$0xff]   ;;  %v38_v37 = vpack.c.bf16 %v23_v34, %v22_v33  ;;  %v25_v41 = vld [vmem:[%s5564_s0 + $0x18] sm:$0xff]  ;;  %v27_v44 = vld [vmem:[%s5564_s0 + $0x28] sm:$0xff] }
   0xe   :  { %v2918_v36 = vld [vmem:[%s5567_s3 + $0xc0] sm:$0xff]   ;;  %v39_v42 = vpack.c.bf16 %v25_v41, %v24_v40 }
   0xf   :  { %267 = vmatpush1.bf16.msra.mxu0 %v2890_v15  ;;  %380 = vmatpush1.bf16.msra.mxu1 %v2891_v16  ;;  %v2917_v38 = vld [vmem:[%s5567_s3] sm:$0xff]  }
  0x10   :  { %268 = vmatprep.subr.bf16.mxu0 %v2892_v17  ;;  %381 = vmatprep.subr.bf16.mxu1 %v2894_v18  ;;  %v2919_v39 = vld [vmem:[%s5567_s3 + $0x80] sm:$0xff]  }
  0x11   :  { %v26_v43 = vld [vmem:[%s5564_s0 + $0x20] sm:$0xff] }
  0x12   :  { %v40_v45 = vpack.c.bf16 %v27_v44, %v26_v43 }
  0x13   :  { %269 = vmatpush1.bf16.msra.mxu0 %v2896_v19  ;;  %382 = vmatpush1.bf16.msra.mxu1 %v2897_v20 }
  0x14   :  { %270 = vmatprep.subr.bf16.mxu0 %v2898_v21  ;;  %383 = vmatprep.subr.bf16.mxu1 %v2900_v22 }
  0x17   :  { %271 = vmatpush1.bf16.msra.mxu0 %v2902_v23  ;;  %384 = vmatpush1.bf16.msra.mxu1 %v2903_v24 }
  0x18   :  { %272 = vmatprep.subr.bf16.mxu0 %v2904_v25  ;;  %385 = vmatprep.subr.bf16.mxu1 %v2906_v26 }
  0x1b   :  { %273 = vmatpush1.bf16.msra.mxu0 %v2908_v27  ;;  %386 = vmatpush1.bf16.msra.mxu1 %v2909_v28 }
  0x1c   :  { %274 = vmatprep.subr.bf16.mxu0 %v2910_v29  ;;  %387 = vmatprep.subr.bf16.mxu1 %v2912_v30 }
  0x1f   :  { %275 = vmatpush1.bf16.msra.mxu0 %v2914_v31  ;;  %388 = vmatpush1.bf16.msra.mxu1 %v2915_v32 }
  0x20   :  { %2736 = vmatprep.subr.bf16.mxu0 %v2916_v35  ;;  %2800 = vmatprep.subr.bf16.mxu1 %v2918_v36 }
  0x22   :  { %293 = vmatmul.mubr.bf16.vlgmr.msra.gmra.mrb[0].mxu0 %v38_v37  ;;  %406 = vmatmul.mubr.bf16.vlgmr.msra.gmra.mrb[0].mxu1 %v38_v37 }
  0x23   :  { %302 = vmatprep.mubr.bf16.mxu0 %v3228_v2  ;;  %415 = vmatprep.mubr.bf16.mxu1 %v3228_v2 }
  0x24   :  { %2737 = vmatpush3.bf16.msra.mxu0 %v2917_v38  ;;  %2801 = vmatpush3.bf16.msra.mxu1 %v2919_v39 }
  0x2a   :  { %303 = vmatmul.mubr.bf16.gmra.mrb[4].mxu0 %v39_v42  ;;  %416 = vmatmul.mubr.bf16.gmra.mrb[4].mxu1 %v39_v42 }
  0x2b   :  { %312 = vmatprep.mubr.bf16.mxu0 %v3228_v2  ;;  %425 = vmatprep.mubr.bf16.mxu1 %v3228_v2 }
  0x2c   :  { %10 = vsyncpa [#allocation3], 0  ;;  %v28_v46 = vld [vmem:[%s5564_s0 + $0x30] sm:$0xff]  ;;  %v29_v47 = vld [vmem:[%s5564_s0 + $0x38] sm:$0xff]  ;;  %v80_v5 = vlaneseq }
  0x2d   :  { %v41_v48 = vpack.c.bf16 %v29_v47, %v28_v46  ;;  %v30_v49 = vld [vmem:[%s5564_s0 + $0x40] sm:$0xff]  ;;  %v31_v50 = vld [vmem:[%s5564_s0 + $0x48] sm:$0xff]  ;;  %v32_v52 = vld [vmem:[%s5564_s0 + $0x50] sm:$0xff] }
  0x2e   :  { %v42_v51 = vpack.c.bf16 %v31_v50, %v30_v49  ;;  %v33_v53 = vld [vmem:[%s5564_s0 + $0x58] sm:$0xff]  ;;  %v34_v55 = vld [vmem:[%s5564_s0 + $0x60] sm:$0xff]  ;;  %v35_v56 = vld [vmem:[%s5564_s0 + $0x68] sm:$0xff]  ;;  %v81_v6 = vshrl.u32 %v80_v5, 7 }
  0x2f   :  { %v43_v54 = vpack.c.bf16 %v33_v53, %v32_v52  ;;  %v44_v57 = vpack.c.bf16 %v35_v56, %v34_v55  ;;  %v36_v58 = vld [vmem:[%s5564_s0 + $0x70] sm:$0xff]  ;;  %v37_v59 = vld [vmem:[%s5564_s0 + $0x78] sm:$0xff]  ;;  %v2920_v61 = vld [vmem:[%s5567_s3 + $0x48] sm:$0xff]  }
  0x30   :  { %v45_v60 = vpack.c.bf16 %v37_v59, %v36_v58  ;;  %2738 = vmatprep.subr.bf16.mxu0 %v2920_v61  ;;  %v2921_v62 = vld [vmem:[%s5567_s3 + $0x8] sm:$0xff]   ;;  %v2924_v1 = vld [vmem:[%s5567_s3 + $0x50] sm:$0xff]   ;;  %v2928_v7 = vld [vmem:[%s5567_s3 + $0x58] sm:$0xff]   ;;  %v82_v8 = vsub.s32 0, %v81_v6  ;;  %v90_v9 = vsub.s32 2, %v81_v6  ;;  %v86_v13 = vsub.s32 1, %v81_v6 }
  0x31   :  { %2739 = vmatpush3.bf16.msra.mxu0 %v2921_v62  ;;  %v2922_v63 = vld [vmem:[%s5567_s3 + $0xc8] sm:$0xff]   ;;  %v2926_v3 = vld [vmem:[%s5567_s3 + $0xd0] sm:$0xff]   ;;  %v78_v10 = vld [vmem:[%s5566_s2] sm:$0xf]  ;;  %v94_v14 = vsub.s32 3, %v81_v6 }
  0x32   :  { %313 = vmatmul.mubr.bf16.gmra.mrb[8].mxu0 %v40_v45  ;;  %426 = vmatmul.mubr.bf16.gmra.mrb[8].mxu1 %v40_v45  ;;  %v2923_v0 = vld [vmem:[%s5567_s3 + $0x88] sm:$0xff]   ;;  %v2927_v4 = vld [vmem:[%s5567_s3 + $0x90] sm:$0xff]   ;;  %v3464_v11 = vrot.slane %v78_v10, %v82_v8  ;;  %v3466_v12 = vrot.slane %v78_v10, %v90_v9  ;;  %v3474_v19 = vrot.slane %v78_v10, %v86_v13  ;;  %v2929_v40 = vld [vmem:[%s5567_s3 + $0x18] sm:$0xff]  }
  0x33   :  { %322 = vmatprep.mubr.bf16.mxu0 %v3228_v2  ;;  %435 = vmatprep.mubr.bf16.mxu1 %v3228_v2  ;;  %v3482_v26 = vrot.slane %v78_v10, %v94_v14  ;;  %v2930_v13 = vld [vmem:[%s5567_s3 + $0xd8] sm:$0xff]  }
  0x34   :  { %2802 = vmatprep.subr.bf16.mxu1 %v2922_v63  ;;  %2740 = vmatprep.subr.bf16.mxu0 %v2924_v1 }
  0x35   :  { %2803 = vmatpush3.bf16.msra.mxu1 %v2923_v0 }
  0x36   :  { %2804 = vmatprep.subr.bf16.mxu1 %v2926_v3 }
  0x39   :  { %2805 = vmatpush3.bf16.msra.mxu1 %v2927_v4 }
  0x3a   :  { %323 = vmatmul.mubr.bf16.gmra.mrb[12].mxu0 %v41_v48  ;;  %436 = vmatmul.mubr.bf16.gmra.mrb[12].mxu1 %v41_v48 }
  0x3b   :  { %332 = vmatprep.mubr.bf16.mxu0 %v3228_v2  ;;  %445 = vmatprep.mubr.bf16.mxu1 %v3228_v2 }
  0x3c   :  { %2806 = vmatprep.subr.bf16.mxu1 %v2930_v13 }
  0x42   :  { %333 = vmatmul.mubr.bf16.gmra.mrb[16].mxu0 %v42_v51  ;;  %446 = vmatmul.mubr.bf16.gmra.mrb[16].mxu1 %v42_v51 }
  0x43   :  { %342 = vmatprep.mubr.bf16.mxu0 %v3228_v2  ;;  %455 = vmatprep.mubr.bf16.mxu1 %v3228_v2 }
  0x4a   :  { %343 = vmatmul.mubr.bf16.gmra.mrb[20].mxu0 %v43_v54  ;;  %456 = vmatmul.mubr.bf16.gmra.mrb[20].mxu1 %v43_v54 }
  0x4b   :  { %352 = vmatprep.mubr.bf16.mxu0 %v3228_v2  ;;  %465 = vmatprep.mubr.bf16.mxu1 %v3228_v2 }
  0x52   :  { %353 = vmatmul.mubr.bf16.gmra.mrb[24].mxu0 %v44_v57  ;;  %466 = vmatmul.mubr.bf16.gmra.mrb[24].mxu1 %v44_v57 }
  0x53   :  { %362 = vmatprep.mubr.bf16.mxu0 %v3228_v2  ;;  %475 = vmatprep.mubr.bf16.mxu1 %v3228_v2  ;;  %v2925_v2 = vld [vmem:[%s5567_s3 + $0x10] sm:$0xff]  }
  0x54   :  { %2741 = vmatpush3.bf16.msra.mxu0 %v2925_v2 }
  0x55   :  { %2742 = vmatprep.subr.bf16.mxu0 %v2928_v7 }
  0x58   :  { %2743 = vmatpush3.bf16.msra.mxu0 %v2929_v40 }
  0x5a   :  { %363 = vmatmul.mubr.bf16.gmra.mrb[28].mxu0 %v45_v60  ;;  %476 = vmatmul.mubr.bf16.gmra.mrb[28].mxu1 %v45_v60 }
  0xf5   :  { %v294_v15 = vpop.f32.mrb[0].mxu0  ;;  %v407_v16 = vpop.f32.mrb[0].mxu1 }
  0xf6   :  { %v3469_v17 = vadd.f32 %v294_v15, %v3464_v11  ;;  %v3472_v18 = vadd.f32 %v407_v16, %v3466_v12  ;;  %v296_v20 = vpop.f32.mrb[1].mxu0  ;;  %v409_v21 = vpop.f32.mrb[1].mxu1 }
  0xf7   :  { %v298_v22 = vpop.f32.mrb[2].mxu0  ;;  %v411_v23 = vpop.f32.mrb[2].mxu1  ;;  %v3487_v29 = vadd.f32 %v296_v20, %v3474_v19  ;;  %v3490_v32 = vadd.f32 %v409_v21, %v3482_v26 }
  0xf8   :  { %v3477_v24 = vmul.f32 0.70710677, %v3469_v17  ;;  %v3480_v25 = vmul.f32 0.70710677, %v3472_v18  ;;  %v300_v36 = vpop.f32.mrb[3].mxu0  ;;  %v413_v37 = vpop.f32.mrb[3].mxu1  ;;  %v3504_v42 = vadd.f32 %v298_v22, %v3464_v11  ;;  %v3511_v45 = vadd.f32 %v411_v23, %v3466_v12 }
  0xf9   :  { %v3493_v35 = vmul.f32 0.70710677, %v3487_v29  ;;  %v3501_v41 = vmul.f32 0.70710677, %v3490_v32  ;;  %v3524_v50 = vadd.f32 %v300_v36, %v3474_v19  ;;  %v3540_v56 = vadd.f32 %v413_v37, %v3482_v26 }
  0xfa   :  { %v614_v27 = vand.u32 2147483647, %v3477_v24  ;;  %v616_v28 = vand.u32 2147483647, %v3480_v25  ;;  %v3521_v49 = vmul.f32 0.70710677, %v3504_v42 }
  0xfb   :  { %v3518_v48 = vand.u32 2147483647, %v3493_v35  ;;  %v3531_v53 = vmul.f32 0.70710677, %v3511_v45  ;;  %v3534_v54 = vand.u32 2147483647, %v3501_v41 }
  0xfc   :  { %v678_v30 = vmul.f32 0.3275911, %v614_v27  ;;  %v680_v31 = vmul.f32 0.3275911, %v616_v28  ;;  %v3537_v55 = vand.u32 2147483647, %v3521_v49 }
  0xfd   :  { %v304_v38 = vpop.f32.mrb[4].mxu0  ;;  %v3495_v39 = vpop.f32.mrb[4].mxu1  ;;  %v1446_v57 = vsub.f32 0.0, %v614_v27  ;;  %v3543_v58 = vand.u32 2147483647, %v3531_v53  ;;  %v1448_v1 = vsub.f32 0.0, %v616_v28 }
  0xfe   :  { %v742_v33 = vadd.f32 1.0, %v678_v30  ;;  %v744_v34 = vadd.f32 1.0, %v680_v31  ;;  %v3506_v43 = vpop.f32.mrb[5].mxu0  ;;  %v3508_v44 = vpop.f32.mrb[5].mxu1  ;;  %v3546_v59 = vmul.f32 0.70710677, %v3524_v50  ;;  %v3591_v40 = vadd.f32 %v304_v38, %v3464_v11 }
  0xff   :  { %v3513_v46 = vpop.f32.mrb[6].mxu0  ;;  %v3515_v47 = vpop.f32.mrb[6].mxu1  ;;  %v679_v61 = vmul.f32 0.3275911, %v3518_v48  ;;  %v682_v62 = vmul.f32 0.3275911, %v3537_v55  ;;  %v1510_v9 = vmul.f32 %v1446_v57, %v614_v27  ;;  %v1512_v27 = vmul.f32 %v1448_v1, %v616_v28 }
 0x100   :  { %2948 = vrcp.f32 %v742_v33  ;;  %v3526_v51 = vpop.f32.mrb[7].mxu0  ;;  %v3528_v52 = vpop.f32.mrb[7].mxu1  ;;  %v684_v2 = vmul.f32 0.3275911, %v3543_v58  ;;  %v3558_v3 = vand.u32 2147483647, %v3546_v59 }
 0x101   :  { %2950 = vrcp.f32 %v744_v34  ;;  %v746_v5 = vadd.f32 1.0, %v682_v62  ;;  %v3563_v6 = vmul.f32 0.70710677, %v3540_v56  ;;  %v743_v16 = vadd.f32 1.0, %v679_v61  ;;  %v2931_v34 = vld [vmem:[%s5567_s3 + $0x98] sm:$0xff]   ;;  %5613 = vst [vmem:[#allocation11_spill] sm:$0xff] %v3591_v40 }
 0x102   :  { %v748_v10 = vadd.f32 1.0, %v684_v2  ;;  %v681_v20 = vmul.f32 0.3275911, %v3534_v54  ;;  %v683_v33 = vmul.f32 0.3275911, %v3558_v3  ;;  %2807 = vmatpush3.bf16.msra.mxu1 %v2931_v34  ;;  %v1450_v38 = vsub.f32 0.0, %v3537_v55 }
 0x103   :  { %2952 = vrcp.f32 %v746_v5  ;;  %v3583_v30 = vand.u32 2147483647, %v3563_v6  ;;  %v1574_v37 = vmul.f32 1.442695, %v1510_v9  ;;  %v1578_v5 = vmul.f32 1.442695, %v1512_v27 }
 0x104   :  { %2954 = vrcp.f32 %v748_v10  ;;  %v745_v62 = vadd.f32 1.0, %v681_v20  ;;  %v747_v13 = vadd.f32 1.0, %v683_v33  ;;  %vm1830_vm0 = vcmp.ge.f32.partialorder %v3477_v24, 0.0 }
 0x105   :  { %v3548_v60 = vpop.f32.mrb[8].mxu0  ;;  %v3552_v63 = vpop.f32.mrb[8].mxu1  ;;  %2956 = vrcp.f32 %v743_v16  ;;  %v685_v10 = vmul.f32 0.3275911, %v3583_v30  ;;  %v3605_v16 = vmul.f32 0.70710677, %v3591_v40 }
 0x106   :  { %v3554_v0 = vpop.f32.mrb[9].mxu0  ;;  %v3560_v4 = vpop.f32.mrb[9].mxu1  ;;  %2958 = vpow2.f32 %v1574_v37  ;;  %vm1832_vm1 = vcmp.ge.f32.partialorder %v3480_v25, 0.0  ;;  %vm1834_vm2 = vcmp.ge.f32.partialorder %v3521_v49, 0.0  ;;  %vm1836_vm3 = vcmp.ge.f32.partialorder %v3531_v53, 0.0 }
 0x107   :  { %5607 = vst [vmem:[#allocation5_spill] sm:$0xff] %v3554_v0  ;;  %5608 = vst [vmem:[#allocation6_spill] sm:$0xff] %v3560_v4  ;;  %v3565_v7 = vpop.f32.mrb[10].mxu0  ;;  %v3567_v8 = vpop.f32.mrb[10].mxu1  ;;  %2960 = vrcp.f32 %v745_v62  ;;  %v749_v27 = vadd.f32 1.0, %v685_v10  ;;  %v2932_v10 = vld [vmem:[%s5567_s3 + $0x60] sm:$0xff]   ;;  %v3688_v49 = vadd.f32 %v3506_v43, %v3474_v19 }
 0x108   :  { %5609 = vst [vmem:[#allocation7_spill] sm:$0xff] %v3565_v7  ;;  %5610 = vst [vmem:[#allocation8_spill] sm:$0xff] %v3567_v8  ;;  %v3572_v14 = vpop.f32.mrb[11].mxu0  ;;  %v3577_v21 = vpop.f32.mrb[11].mxu1  ;;  %2962 = vpow2.f32 %v1578_v5  ;;  %v3617_v62 = vand.u32 2147483647, %v3605_v16  ;;  %2744 = vmatprep.subr.bf16.mxu0 %v2932_v10 }
 0x109   :  { %5611 = vst [vmem:[#allocation9_spill] sm:$0xff] %v3572_v14  ;;  %5612 = vst [vmem:[#allocation10_spill] sm:$0xff] %v3577_v21  ;;  %2964 = vrcp.f32 %v747_v13  ;;  %vm1831_vm4 = vcmp.ge.f32.partialorder %v3493_v35, 0.0  ;;  %vm1833_vm5 = vcmp.ge.f32.partialorder %v3501_v41, 0.0  ;;  %vm1835_vm6 = vcmp.ge.f32.partialorder %v3546_v59, 0.0 }
 0x10a   :  { %v3574_v15 = vpop.eup %2948  ;;  %5617 = vst [vmem:[#allocation15_spill] sm:$0xff] %v3605_v16  ;;  %2966 = vrcp.f32 %v749_v27  ;;  %v686_v21 = vmul.f32 0.3275911, %v3617_v62  ;;  %v3665_v16 = vadd.f32 %v3495_v39, %v3466_v12  ;;  %vm1837_vm7 = vcmp.ge.f32.partialorder %v3563_v6, 0.0 }
 0x10b   :  { %v3579_v22 = vpop.eup %2950  ;;  %v870_v23 = vmul.f32 1.0614054, %v3574_v15 }
 0x10c   :  { %v872_v31 = vmul.f32 1.0614054, %v3579_v22 }
 0x10d   :  { %v934_v36 = vadd.f32 -1.4531521, %v870_v23  ;;  %v3593_v57 = vpop.f32.mrb[12].mxu0  ;;  %v3595_v28 = vpop.f32.mrb[12].mxu1 }
 0x10e   :  { %5614 = vst [vmem:[#allocation12_spill] sm:$0xff] %v3593_v57  ;;  %5615 = vst [vmem:[#allocation13_spill] sm:$0xff] %v3595_v28  ;;  %v936_v61 = vadd.f32 -1.4531521, %v872_v31  ;;  %v3597_v1 = vpop.f32.mrb[13].mxu0  ;;  %v1452_v28 = vsub.f32 0.0, %v3543_v58  ;;  %v3608_v34 = vpop.eup %2952 }
 0x10f   :  { %5616 = vst [vmem:[#allocation14_spill] sm:$0xff] %v3597_v1  ;;  %v998_v2 = vmul.f32 %v3574_v15, %v934_v36  ;;  %v3612_v33 = vpop.eup %2954  ;;  %v3624_v13 = vpop.f32.mrb[13].mxu1 }
 0x110   :  { %v1000_v9 = vmul.f32 %v3579_v22, %v936_v61  ;;  %v1514_v61 = vmul.f32 %v1450_v38, %v3537_v55  ;;  %v1516_v1 = vmul.f32 %v1452_v28, %v3543_v58  ;;  %v876_v5 = vmul.f32 1.0614054, %v3612_v33  ;;  %5618 = vst [vmem:[#allocation16_spill] sm:$0xff] %v3624_v13  ;;  %v3642_v0 = vpop.f32.mrb[14].mxu0 }
 0x111   :  { %v1062_v23 = vadd.f32 1.4214138, %v998_v2  ;;  %v874_v2 = vmul.f32 1.0614054, %v3608_v34  ;;  %5619 = vst [vmem:[#allocation17_spill] sm:$0xff] %v3642_v0 }
 0x112   :  { %v1064_v20 = vadd.f32 1.4214138, %v1000_v9  ;;  %v1582_v28 = vmul.f32 1.442695, %v1514_v61  ;;  %v1586_v57 = vmul.f32 1.442695, %v1516_v1 }
 0x113   :  { %v1126_v31 = vmul.f32 %v3574_v15, %v1062_v23  ;;  %v938_v38 = vadd.f32 -1.4531521, %v874_v2  ;;  %v3626_v23 = vpop.eup %2956 }
 0x114   :  { %v1128_v36 = vmul.f32 %v3579_v22, %v1064_v20  ;;  %v940_v20 = vadd.f32 -1.4531521, %v876_v5  ;;  %v2959_v2 = vpop.eup %2958  ;;  %v871_v13 = vmul.f32 1.0614054, %v3626_v23  ;;  %2968 = vpow2.f32 %v1582_v28 }
 0x115   :  { %v1190_v37 = vadd.f32 -0.28449672, %v1126_v31  ;;  %v3634_v7 = vpop.eup %2960  ;;  %2970 = vpow2.f32 %v1586_v57  ;;  %v1447_v57 = vsub.f32 0.0, %v3518_v48 }
 0x116   :  { %v1192_v9 = vadd.f32 -0.28449672, %v1128_v36  ;;  %v1002_v36 = vmul.f32 %v3608_v34, %v938_v38  ;;  %v2963_v5 = vpop.eup %2962 }
 0x117   :  { %v1254_v55 = vmul.f32 %v3574_v15, %v1190_v37  ;;  %v1004_v37 = vmul.f32 %v3612_v33, %v940_v20  ;;  %v3638_v38 = vpop.eup %2964  ;;  %v935_v20 = vadd.f32 -1.4531521, %v871_v13  ;;  %v486_v13 = vmul.f32 0.5, %v3469_v17 }
 0x118   :  { %v1256_v58 = vmul.f32 %v3579_v22, %v1192_v9  ;;  %v1066_v8 = vadd.f32 1.4214138, %v1002_v36 }
 0x119   :  { %v1318_v31 = vadd.f32 0.2548296, %v1254_v55  ;;  %v1068_v9 = vadd.f32 1.4214138, %v1004_v37  ;;  %v750_v55 = vadd.f32 1.0, %v686_v21 }
 0x11a   :  { %v1320_v14 = vadd.f32 0.2548296, %v1256_v58  ;;  %v1130_v1 = vmul.f32 %v3608_v34, %v1066_v8  ;;  %v875_v8 = vmul.f32 1.0614054, %v3638_v38 }
 0x11b   :  { %v1382_v27 = vmul.f32 %v3574_v15, %v1318_v31  ;;  %v1132_v15 = vmul.f32 %v3612_v33, %v1068_v9  ;;  %v873_v31 = vmul.f32 1.0614054, %v3634_v7  ;;  %2972 = vrcp.f32 %v750_v55 }
 0x11c   :  { %v1384_v61 = vmul.f32 %v3579_v22, %v1320_v14  ;;  %v1194_v36 = vadd.f32 -0.28449672, %v1130_v1  ;;  %v3644_v14 = vpop.eup %2966  ;;  %v488_v9 = vmul.f32 0.5, %v3472_v18  ;;  %v3660_v18 = vpop.f32.mrb[14].mxu1 }
 0x11d   :  { %v1702_v10 = vmul.f32 %v2959_v2, %v1382_v27  ;;  %v1196_v4 = vadd.f32 -0.28449672, %v1132_v15  ;;  %v999_v2 = vmul.f32 %v3626_v23, %v935_v20  ;;  %v937_v27 = vadd.f32 -1.4531521, %v873_v31  ;;  %5620 = vst [vmem:[#allocation18_spill] sm:$0xff] %v3660_v18 }
 0x11e   :  { %v1704_v58 = vmul.f32 %v2963_v5, %v1384_v61  ;;  %v1258_v28 = vmul.f32 %v3608_v34, %v1194_v36  ;;  %v1449_v5 = vsub.f32 0.0, %v3534_v54  ;;  %v877_v1 = vmul.f32 1.0614054, %v3644_v14 }
 0x11f   :  { %v1766_v22 = vsub.f32 1.0, %v1702_v10  ;;  %v1260_v37 = vmul.f32 %v3612_v33, %v1196_v4  ;;  %v939_v15 = vadd.f32 -1.4531521, %v875_v8  ;;  %v2969_v4 = vpop.eup %2968  ;;  %v1511_v20 = vmul.f32 %v1447_v57, %v3518_v48 }
 0x120   :  { %v1768_v21 = vsub.f32 1.0, %v1704_v58  ;;  %v1322_v61 = vadd.f32 0.2548296, %v1258_v28  ;;  %v2971_v36 = vpop.eup %2970  ;;  %v1063_v28 = vadd.f32 1.4214138, %v999_v2  ;;  %v490_v8 = vmul.f32 0.5, %v3504_v42 }
 0x121   :  { %v1324_v10 = vadd.f32 0.2548296, %v1260_v37  ;;  %v1894_v55 = vsub.f32 0.0, %v1766_v22  ;;  %v1001_v37 = vmul.f32 %v3634_v7, %v937_v27  ;;  %v941_v40 = vadd.f32 -1.4531521, %v877_v1 }
 0x122   :  { %v1386_v58 = vmul.f32 %v3608_v34, %v1322_v61  ;;  %v1896_v17 = vsub.f32 0.0, %v1768_v21  ;;  %v1513_v34 = vmul.f32 %v1449_v5, %v3534_v54  ;;  %v492_v57 = vmul.f32 0.5, %v3511_v45  ;;  %v3683_v45 = vpop.f32.mrb[15].mxu0 }
 0x123   :  { %v1388_v31 = vmul.f32 %v3612_v33, %v1324_v10  ;;  %v1958_v48 = vsel %vm1830_vm0, %v1766_v22, %v1894_v55  ;;  %v1003_v2 = vmul.f32 %v3638_v38, %v939_v15  ;;  %v1127_v42 = vmul.f32 %v3626_v23, %v1063_v28  ;;  %5621 = vst [vmem:[#allocation19_spill] sm:$0xff] %v3683_v45 }
 0x124   :  { %v1706_v0 = vmul.f32 %v2969_v4, %v1386_v58  ;;  %v1960_v27 = vsel %vm1832_vm1, %v1768_v21, %v1896_v17  ;;  %v1065_v5 = vadd.f32 1.4214138, %v1001_v37  ;;  %v2022_v22 = vadd.f32 1.0, %v1958_v48 }
 0x125   :  { %v1708_v61 = vmul.f32 %v2971_v36, %v1388_v31  ;;  %v3677_v54 = vpop.eup %2972  ;;  %v1005_v25 = vmul.f32 %v3644_v14, %v941_v40  ;;  %v2024_v21 = vadd.f32 1.0, %v1960_v27  ;;  %v1067_v55 = vadd.f32 1.4214138, %v1003_v2  ;;  %v2933_v40 = vld [vmem:[%s5567_s3 + $0x20] sm:$0xff]   ;;  %v3709_v2 = vpop.f32.mrb[15].mxu1 }
 0x126   :  { %v1770_v33 = vsub.f32 1.0, %v1706_v0  ;;  %v3681_v0 = vmul.f32 0.70710677, %v3665_v16  ;;  %v1451_v17 = vsub.f32 0.0, %v3558_v3  ;;  %v878_v31 = vmul.f32 1.0614054, %v3677_v54  ;;  %2745 = vmatpush3.bf16.msra.mxu0 %v2933_v40 }
 0x127   :  { %v1772_v39 = vsub.f32 1.0, %v1708_v61  ;;  %v1191_v43 = vadd.f32 -0.28449672, %v1127_v42  ;;  %v1129_v36 = vmul.f32 %v3634_v7, %v1065_v5  ;;  %v3702_v61 = vmul.f32 %v2022_v22, %v486_v13  ;;  %5624 = vst [vmem:[#allocation22_spill] sm:$0xff] %v3709_v2 }
 0x128   :  { %v1898_v24 = vsub.f32 0.0, %v1770_v33  ;;  %v3691_v58 = vand.u32 2147483647, %v3681_v0  ;;  %v1069_v53 = vadd.f32 1.4214138, %v1005_v25  ;;  %v3711_v27 = vmul.f32 %v2024_v21, %v488_v9 }
 0x129   :  { %v1900_v10 = vsub.f32 0.0, %v1772_v39  ;;  %5622 = vst [vmem:[#allocation20_spill] sm:$0xff] %v3702_v61  ;;  %v1131_v5 = vmul.f32 %v3638_v38, %v1067_v55  ;;  %v1453_v25 = vsub.f32 0.0, %v3583_v30  ;;  %v1255_v9 = vmul.f32 %v3626_v23, %v1191_v43 }
 0x12a   :  { %v1962_v1 = vsel %vm1834_vm2, %v1770_v33, %v1898_v24  ;;  %v688_v37 = vmul.f32 0.3275911, %v3691_v58  ;;  %v3707_v33 = vmul.f32 0.70710677, %v3688_v49  ;;  %5625 = vst [vmem:[#allocation23_spill] sm:$0xff] %v3711_v27  ;;  %v3736_v40 = vadd.f32 %v3513_v46, %v3464_v11  ;;  %v3750_v46 = vpop.f32.mrb[16].mxu0 }
 0x12b   :  { %v2026_v15 = vadd.f32 1.0, %v1962_v1  ;;  %v1964_v4 = vsel %vm1836_vm3, %v1772_v39, %v1900_v10  ;;  %v1576_v39 = vmul.f32 1.442695, %v1511_v20  ;;  %v942_v24 = vadd.f32 -1.4531521, %v878_v31  ;;  %5627 = vst [vmem:[#allocation25_spill] sm:$0xff] %v3750_v46 }
 0x12c   :  { %v2028_v28 = vadd.f32 1.0, %v1964_v4  ;;  %v752_v22 = vadd.f32 1.0, %v688_v37  ;;  %v1193_v21 = vadd.f32 -0.28449672, %v1129_v36  ;;  %v1133_v20 = vmul.f32 %v3644_v14, %v1069_v53 }
 0x12d   :  { %v3704_v48 = vmul.f32 %v2026_v15, %v490_v8  ;;  %v1515_v8 = vmul.f32 %v1451_v17, %v3558_v3  ;;  %2974 = vpow2.f32 %v1576_v39  ;;  %v1580_v1 = vmul.f32 1.442695, %v1513_v34  ;;  %v2934_v34 = vld [vmem:[%s5567_s3 + $0xe0] sm:$0xff]  }
 0x12e   :  { %v3713_v42 = vmul.f32 %v2028_v28, %v492_v57  ;;  %v3725_v57 = vand.u32 2147483647, %v3707_v33  ;;  %v1195_v55 = vadd.f32 -0.28449672, %v1131_v5  ;;  %v1006_v3 = vmul.f32 %v3677_v54, %v942_v24  ;;  %2808 = vmatprep.subr.bf16.mxu1 %v2934_v34 }
 0x12f   :  { %5623 = vst [vmem:[#allocation21_spill] sm:$0xff] %v3704_v48  ;;  %v1584_v15 = vmul.f32 1.442695, %v1515_v8  ;;  %2976 = vrcp.f32 %v752_v22  ;;  %v3730_v4 = vadd.f32 %v3508_v44, %v3482_v26  ;;  %v1517_v17 = vmul.f32 %v1453_v25, %v3583_v30  ;;  %v3756_v8 = vpop.f32.mrb[16].mxu1 }
 0x130   :  { %5626 = vst [vmem:[#allocation24_spill] sm:$0xff] %v3713_v42  ;;  %v1454_v31 = vsub.f32 0.0, %v3617_v62  ;;  %v1319_v43 = vadd.f32 0.2548296, %v1255_v9  ;;  %v1257_v36 = vmul.f32 %v3634_v7, %v1193_v21  ;;  %v1197_v28 = vadd.f32 -0.28449672, %v1133_v20 }
 0x131   :  { %v687_v37 = vmul.f32 0.3275911, %v3725_v57  ;;  %2978 = vpow2.f32 %v1580_v1  ;;  %v1259_v44 = vmul.f32 %v3638_v38, %v1195_v55  ;;  %v3745_v30 = vmul.f32 0.70710677, %v3730_v4  ;;  %5628 = vst [vmem:[#allocation26_spill] sm:$0xff] %v3756_v8 }
 0x132   :  { %v3748_v53 = vmul.f32 0.70710677, %v3736_v40  ;;  %2980 = vpow2.f32 %v1584_v15  ;;  %v1070_v39 = vadd.f32 1.4214138, %v1006_v3  ;;  %v3754_v5 = vadd.f32 %v3515_v47, %v3466_v12 }
 0x133   :  { %v3759_v24 = vand.u32 2147483647, %v3745_v30  ;;  %v1383_v25 = vmul.f32 %v3626_v23, %v1319_v43  ;;  %v1321_v9 = vadd.f32 0.2548296, %v1257_v36  ;;  %v1588_v21 = vmul.f32 1.442695, %v1517_v17 }
 0x134   :  { %v3762_v22 = vand.u32 2147483647, %v3748_v53  ;;  %v1518_v20 = vmul.f32 %v1454_v31, %v3617_v62  ;;  %v1323_v1 = vadd.f32 0.2548296, %v1259_v44  ;;  %v1261_v55 = vmul.f32 %v3644_v14, %v1197_v28 }
 0x135   :  { %v751_v15 = vadd.f32 1.0, %v687_v37  ;;  %v689_v47 = vmul.f32 0.3275911, %v3759_v24  ;;  %v1134_v3 = vmul.f32 %v3677_v54, %v1070_v39  ;;  %v3770_v34 = vmul.f32 0.70710677, %v3754_v5  ;;  %v2935_v37 = vld [vmem:[%s5567_s3 + $0xa0] sm:$0xff]  }
 0x136   :  { %v690_v27 = vmul.f32 0.3275911, %v3762_v22  ;;  %v3775_v23 = vadd.f32 %v3526_v51, %v3474_v19  ;;  %2982 = vpow2.f32 %v1588_v21  ;;  %v1590_v31 = vmul.f32 1.442695, %v1518_v20  ;;  %v3787_v51 = vpop.f32.mrb[17].mxu0  ;;  %2809 = vmatpush3.bf16.msra.mxu1 %v2935_v37 }
 0x137   :  { %v2975_v10 = vpop.eup %2974  ;;  %v753_v13 = vadd.f32 1.0, %v689_v47  ;;  %v1385_v43 = vmul.f32 %v3634_v7, %v1321_v9  ;;  %v1387_v36 = vmul.f32 %v3638_v38, %v1323_v1  ;;  %v1325_v28 = vadd.f32 0.2548296, %v1261_v55  ;;  %5629 = vst [vmem:[#allocation27_spill] sm:$0xff] %v3787_v51  ;;  %v3844_v51 = vpop.f32.mrb[17].mxu1 }
 0x138   :  { %v1703_v17 = vmul.f32 %v2975_v10, %v1383_v25  ;;  %2984 = vrcp.f32 %v751_v15  ;;  %v1198_v44 = vadd.f32 -0.28449672, %v1134_v3  ;;  %v3785_v39 = vand.u32 2147483647, %v3770_v34  ;;  %5632 = vst [vmem:[#allocation30_spill] sm:$0xff] %v3844_v51  ;;  %v3862_v18 = vpop.f32.mrb[18].mxu0 }
 0x139   :  { %v3777_v62 = vpop.eup %2976  ;;  %2986 = vrcp.f32 %v753_v13  ;;  %v754_v25 = vadd.f32 1.0, %v690_v27  ;;  %v3791_v7 = vmul.f32 0.70710677, %v3775_v23  ;;  %v3795_v9 = vadd.f32 %v3528_v52, %v3482_v26 }
 0x13a   :  { %v880_v10 = vmul.f32 1.0614054, %v3777_v62  ;;  %v3799_v21 = vadd.f32 %v3548_v60, %v3464_v11  ;;  %v1767_v20 = vsub.f32 1.0, %v1703_v17  ;;  %2988 = vpow2.f32 %v1590_v31 }
 0x13b   :  { %v2979_v47 = vpop.eup %2978  ;;  %v1262_v13 = vmul.f32 %v3677_v54, %v1198_v44  ;;  %v692_v27 = vmul.f32 0.3275911, %v3785_v39  ;;  %v3804_v15 = vand.u32 2147483647, %v3791_v7  ;;  %v3807_v3 = vmul.f32 0.70710677, %v3795_v9 }
 0x13c   :  { %v2981_v38 = vpop.eup %2980  ;;  %v1705_v1 = vmul.f32 %v2979_v47, %v1385_v43  ;;  %v1389_v52 = vmul.f32 %v3644_v14, %v1325_v28  ;;  %v944_v37 = vadd.f32 -1.4531521, %v880_v10  ;;  %2990 = vrcp.f32 %v754_v25 }
 0x13d   :  { %v1707_v55 = vmul.f32 %v2981_v38, %v1387_v36  ;;  %5630 = vst [vmem:[#allocation28_spill] sm:$0xff] %v3807_v3  ;;  %v487_v60 = vmul.f32 0.5, %v3487_v29  ;;  %v3812_v17 = vand.u32 2147483647, %v3807_v3  ;;  %v3815_v31 = vmul.f32 0.70710677, %v3799_v21 }
 0x13e   :  { %v1895_v43 = vsub.f32 0.0, %v1767_v20  ;;  %v3818_v36 = vmul.f32 0.5, %v3490_v32  ;;  %v1769_v44 = vsub.f32 1.0, %v1705_v1  ;;  %v1326_v14 = vadd.f32 0.2548296, %v1262_v13  ;;  %v2936_v13 = vld [vmem:[%s5567_s3 + $0x68] sm:$0xff]  }
 0x13f   :  { %5631 = vst [vmem:[#allocation29_spill] sm:$0xff] %v3815_v31  ;;  %v1771_v47 = vsub.f32 1.0, %v1707_v55  ;;  %v756_v28 = vadd.f32 1.0, %v692_v27  ;;  %v691_v10 = vmul.f32 0.3275911, %v3804_v15  ;;  %v3826_v25 = vmul.f32 0.5, %v3524_v50  ;;  %2746 = vmatprep.subr.bf16.mxu0 %v2936_v13 }
 0x140   :  { %v2983_v38 = vpop.eup %2982  ;;  %v1008_v32 = vmul.f32 %v3777_v62, %v944_v37  ;;  %v3830_v1 = vmul.f32 0.5, %v3540_v56  ;;  %v693_v55 = vmul.f32 0.3275911, %v3812_v17  ;;  %v3834_v35 = vand.u32 2147483647, %v3815_v31 }
 0x141   :  { %v1709_v42 = vmul.f32 %v2983_v38, %v1389_v52  ;;  %v1959_v61 = vsel %vm1831_vm4, %v1767_v20, %v1895_v43  ;;  %v1897_v50 = vsub.f32 0.0, %v1769_v44  ;;  %v1899_v48 = vsub.f32 0.0, %v1771_v47 }
 0x142   :  { %v3822_v29 = vpop.eup %2984  ;;  %v1456_v52 = vsub.f32 0.0, %v3691_v58  ;;  %v1390_v37 = vmul.f32 %v3677_v54, %v1326_v14  ;;  %2992 = vrcp.f32 %v756_v28  ;;  %v755_v38 = vadd.f32 1.0, %v691_v10 }
 0x143   :  { %v3839_v27 = vpop.eup %2986  ;;  %v879_v56 = vmul.f32 1.0614054, %v3822_v29  ;;  %v1773_v46 = vsub.f32 1.0, %v1709_v42  ;;  %v1072_v20 = vadd.f32 1.4214138, %v1008_v32  ;;  %v757_v2 = vadd.f32 1.0, %v693_v55 }
 0x144   :  { %v2989_v8 = vpop.eup %2988  ;;  %v881_v43 = vmul.f32 1.0614054, %v3839_v27  ;;  %v694_v45 = vmul.f32 0.3275911, %v3834_v35  ;;  %v3852_v54 = vadd.f32 %v3552_v63, %v3466_v12  ;;  %v2023_v28 = vadd.f32 1.0, %v1959_v61  ;;  %v5633_v42 = vld [vmem:[#allocation11_spill] sm:$0xff] }
 0x145   :  { %v1961_v10 = vsel %vm1833_vm5, %v1769_v44, %v1897_v50  ;;  %v1963_v59 = vsel %vm1835_vm6, %v1771_v47, %v1899_v48  ;;  %v3859_v13 = vmul.f32 0.5, %v5633_v42  ;;  %v1710_v32 = vmul.f32 %v2989_v8, %v1390_v37  ;;  %5634 = vst [vmem:[#allocation11_spill] sm:$0xff] %v3862_v18  ;;  %v5636_v47 = vld [vmem:[#allocation15_spill] sm:$0xff] }
 0x146   :  { %v3854_v14 = vpop.eup %2990  ;;  %v1520_v51 = vmul.f32 %v1456_v52, %v3691_v58  ;;  %v943_v55 = vadd.f32 -1.4531521, %v879_v56  ;;  %2994 = vrcp.f32 %v755_v38  ;;  %v1901_v31 = vsub.f32 0.0, %v1773_v46 }
 0x147   :  { %v1136_v63 = vmul.f32 %v3777_v62, %v1072_v20  ;;  %v1455_v3 = vsub.f32 0.0, %v3725_v57  ;;  %v3867_v61 = vmul.f32 0.70710677, %v3852_v54  ;;  %v945_v41 = vadd.f32 -1.4531521, %v881_v43 }
 0x148   :  { %v882_v48 = vmul.f32 1.0614054, %v3854_v14  ;;  %2996 = vrcp.f32 %v757_v2  ;;  %v758_v44 = vadd.f32 1.0, %v694_v45  ;;  %v3870_v8 = vmul.f32 %v2023_v28, %v487_v60 }
 0x149   :  { %v2025_v58 = vadd.f32 1.0, %v1961_v10  ;;  %vm1838_vm8 = vcmp.ge.f32.partialorder %v5636_v47, 0.0  ;;  %v3874_v50 = vmul.f32 0.5, %v3665_v16  ;;  %v3877_v52 = vand.u32 2147483647, %v3867_v61  ;;  %v5641_v47 = vld [vmem:[#allocation5_spill] sm:$0xff] }
 0x14a   :  { %5635 = vst [vmem:[#allocation31_spill] sm:$0xff] %v3870_v8  ;;  %v2027_v37 = vadd.f32 1.0, %v1963_v59  ;;  %v1774_v56 = vsub.f32 1.0, %v1710_v32  ;;  %v1007_v38 = vmul.f32 %v3822_v29, %v943_v55  ;;  %v1457_v20 = vsub.f32 0.0, %v3759_v24 }
 0x14b   :  { %v1200_v43 = vadd.f32 -0.28449672, %v1136_v63  ;;  %v1594_v2 = vmul.f32 1.442695, %v1520_v51  ;;  %v1519_v45 = vmul.f32 %v1455_v3, %v3725_v57  ;;  %v696_v60 = vmul.f32 0.3275911, %v3877_v52 }
 0x14c   :  { %v3883_v28 = vpop.eup %2992  ;;  %v1965_v16 = vsel %vm1837_vm7, %v1773_v46, %v1901_v31  ;;  %v1009_v10 = vmul.f32 %v3839_v27, %v945_v41  ;;  %v946_v42 = vadd.f32 -1.4531521, %v882_v48  ;;  %2998 = vrcp.f32 %v758_v44  ;;  %v3902_v48 = vpop.f32.mrb[18].mxu1 }
 0x14d   :  { %v3889_v59 = vmul.f32 %v2025_v58, %v3818_v36  ;;  %v3892_v32 = vmul.f32 0.5, %v3688_v49  ;;  %v1458_v51 = vsub.f32 0.0, %v3762_v22  ;;  %v760_v57 = vadd.f32 1.0, %v696_v60  ;;  %5639 = vst [vmem:[#allocation33_spill] sm:$0xff] %v3902_v48 }
 0x14e   :  { %v1902_v3 = vsub.f32 0.0, %v1774_v56  ;;  %v1071_v55 = vadd.f32 1.4214138, %v1007_v38  ;;  %v1521_v63 = vmul.f32 %v1457_v20, %v3759_v24  ;;  %v1460_v6 = vsub.f32 0.0, %v3785_v39  ;;  %v2937_v24 = vld [vmem:[%s5567_s3 + $0x28] sm:$0xff]  }
 0x14f   :  { %5637 = vst [vmem:[#allocation15_spill] sm:$0xff] %v3889_v59  ;;  %v3898_v46 = vmul.f32 %v2027_v37, %v3826_v25  ;;  %v2029_v31 = vadd.f32 1.0, %v1965_v16  ;;  %v1264_v41 = vmul.f32 %v3777_v62, %v1200_v43  ;;  %v884_v36 = vmul.f32 1.0614054, %v3883_v28  ;;  %2747 = vmatpush3.bf16.msra.mxu0 %v2937_v24  ;;  %v5645_v59 = vld [vmem:[#allocation6_spill] sm:$0xff] }
 0x150   :  { %v3904_v49 = vpop.eup %2994  ;;  %3000 = vpow2.f32 %v1594_v2  ;;  %v1592_v44 = vmul.f32 1.442695, %v1519_v45  ;;  %v1073_v58 = vadd.f32 1.4214138, %v1009_v10  ;;  %v1010_v38 = vmul.f32 %v3854_v14, %v946_v42 }
 0x151   :  { %5638 = vst [vmem:[#allocation32_spill] sm:$0xff] %v3898_v46  ;;  %v3911_v25 = vmul.f32 0.5, %v3730_v4  ;;  %v3914_v37 = vmul.f32 0.5, %v3736_v40  ;;  %v1522_v20 = vmul.f32 %v1458_v51, %v3762_v22  ;;  %3002 = vrcp.f32 %v760_v57 }
 0x152   :  { %v3917_v43 = vpop.eup %2996  ;;  %v1966_v2 = vsel %vm1838_vm8, %v1774_v56, %v1902_v3  ;;  %v1135_v45 = vmul.f32 %v3822_v29, %v1071_v55  ;;  %v1596_v60 = vmul.f32 1.442695, %v1521_v63  ;;  %v1524_v16 = vmul.f32 %v1460_v6, %v3785_v39 }
 0x153   :  { %v3924_v4 = vmul.f32 %v2029_v31, %v3830_v1  ;;  %v1328_v10 = vadd.f32 0.2548296, %v1264_v41  ;;  %v948_v40 = vadd.f32 -1.4531521, %v884_v36  ;;  %v883_v42 = vmul.f32 1.0614054, %v3904_v49 }
 0x154   :  { %3004 = vpow2.f32 %v1592_v44  ;;  %v1137_v22 = vmul.f32 %v3839_v27, %v1073_v58  ;;  %v1074_v51 = vadd.f32 1.4214138, %v1010_v38  ;;  %v3930_v56 = vadd.f32 %v5641_v47, %v3474_v19 }
 0x155   :  { %5640 = vst [vmem:[#allocation34_spill] sm:$0xff] %v3924_v4  ;;  %v2030_v57 = vadd.f32 1.0, %v1966_v2  ;;  %v1598_v3 = vmul.f32 1.442695, %v1522_v20  ;;  %v3933_v39 = vmul.f32 0.5, %v3754_v5  ;;  %v3939_v31 = vmul.f32 0.5, %v3775_v23 }
 0x156   :  { %v885_v1 = vmul.f32 1.0614054, %v3917_v43  ;;  %v3936_v55 = vpop.eup %2998  ;;  %v1199_v63 = vadd.f32 -0.28449672, %v1135_v45  ;;  %v1602_v6 = vmul.f32 1.442695, %v1524_v16  ;;  %v1392_v36 = vmul.f32 %v3777_v62, %v1328_v10 }
 0x157   :  { %v1459_v41 = vsub.f32 0.0, %v3804_v15  ;;  %3006 = vpow2.f32 %v1596_v60  ;;  %v1012_v44 = vmul.f32 %v3883_v28, %v948_v40  ;;  %v947_v58 = vadd.f32 -1.4531521, %v883_v42  ;;  %v3949_v2 = vpop.f32.mrb[19].mxu0 }
 0x158   :  { %v1201_v38 = vadd.f32 -0.28449672, %v1137_v22  ;;  %v1138_v5 = vmul.f32 %v3854_v14, %v1074_v51  ;;  %v1461_v24 = vsub.f32 0.0, %v3812_v17  ;;  %v3947_v20 = vmul.f32 0.70710677, %v3930_v56  ;;  %5642 = vst [vmem:[#allocation5_spill] sm:$0xff] %v3949_v2 }
 0x159   :  { %v3952_v23 = vmul.f32 %v2030_v57, %v3859_v13  ;;  %3008 = vpow2.f32 %v1598_v3  ;;  %v949_v45 = vadd.f32 -1.4531521, %v885_v1  ;;  %v886_v62 = vmul.f32 1.0614054, %v3936_v55 }
 0x15a   :  { %v3001_v60 = vpop.eup %3000  ;;  %v1263_v16 = vmul.f32 %v3822_v29, %v1199_v63  ;;  %3010 = vpow2.f32 %v1602_v6  ;;  %v1523_v10 = vmul.f32 %v1459_v41, %v3804_v15  ;;  %v1462_v40 = vsub.f32 0.0, %v3834_v35  ;;  %v3969_v15 = vpop.f32.mrb[19].mxu1 }
 0x15b   :  { %5643 = vst [vmem:[#allocation35_spill] sm:$0xff] %v3952_v23  ;;  %v3958_v42 = vpop.eup %3002  ;;  %v1712_v22 = vmul.f32 %v3001_v60, %v1392_v36  ;;  %v1076_v51 = vadd.f32 1.4214138, %v1012_v44  ;;  %v1011_v47 = vmul.f32 %v3904_v49, %v947_v58  ;;  %v3962_v13 = vand.u32 2147483647, %v3947_v20  ;;  %5644 = vst [vmem:[#allocation36_spill] sm:$0xff] %v3969_v15 }
 0x15c   :  { %v1265_v57 = vmul.f32 %v3839_v27, %v1201_v38  ;;  %v1202_v3 = vadd.f32 -0.28449672, %v1138_v5  ;;  %v3966_v1 = vmul.f32 0.5, %v3795_v9  ;;  %v1525_v63 = vmul.f32 %v1461_v24, %v3812_v17 }
 0x15d   :  { %v1013_v6 = vmul.f32 %v3917_v43, %v949_v45  ;;  %v3973_v41 = vmul.f32 0.5, %v3799_v21  ;;  %v950_v36 = vadd.f32 -1.4531521, %v886_v62  ;;  %v695_v44 = vmul.f32 0.3275911, %v3962_v13 }
 0x15e   :  { %v3005_v58 = vpop.eup %3004  ;;  %vm1840_vm9 = vcmp.ge.f32.partialorder %v3681_v0, 0.0  ;;  %v1327_v38 = vadd.f32 0.2548296, %v1263_v16  ;;  %v1600_v5 = vmul.f32 1.442695, %v1523_v10  ;;  %v1526_v9 = vmul.f32 %v1462_v40, %v3834_v35  ;;  %v2938_v16 = vld [vmem:[%s5567_s3 + $0xe8] sm:$0xff]  }
 0x15f   :  { %v888_v60 = vmul.f32 1.0614054, %v3958_v42  ;;  %v1776_v17 = vsub.f32 1.0, %v1712_v22  ;;  %v1140_v24 = vmul.f32 %v3883_v28, %v1076_v51  ;;  %v1075_v23 = vadd.f32 1.4214138, %v1011_v47  ;;  %v5646_v22 = vld [vmem:[#allocation7_spill] sm:$0xff]  ;;  %2810 = vmatprep.subr.bf16.mxu1 %v2938_v16 }
 0x160   :  { %v759_v45 = vadd.f32 1.0, %v695_v44  ;;  %v1329_v4 = vadd.f32 0.2548296, %v1265_v57  ;;  %v1266_v21 = vmul.f32 %v3854_v14, %v1202_v3  ;;  %v1604_v62 = vmul.f32 1.442695, %v1525_v63 }
 0x161   :  { %v3983_v46 = vadd.f32 %v5645_v59, %v3482_v26  ;;  %v3007_v35 = vpop.eup %3006  ;;  %v1077_v10 = vadd.f32 1.4214138, %v1013_v6  ;;  %v1014_v40 = vmul.f32 %v3936_v55, %v950_v36  ;;  %v3991_v51 = vadd.f32 %v5646_v22, %v3464_v11 }
 0x162   :  { %3012 = vrcp.f32 %v759_v45  ;;  %v1391_v47 = vmul.f32 %v3822_v29, %v1327_v38  ;;  %v1606_v57 = vmul.f32 1.442695, %v1526_v9  ;;  %v952_v3 = vadd.f32 -1.4531521, %v888_v60  ;;  %v4004_v38 = vpop.f32.mrb[20].mxu0 }
 0x163   :  { %3014 = vpow2.f32 %v1600_v5  ;;  %v3009_v59 = vpop.eup %3008  ;;  %v1904_v63 = vsub.f32 0.0, %v1776_v17  ;;  %v1204_v44 = vadd.f32 -0.28449672, %v1140_v24  ;;  %v1139_v8 = vmul.f32 %v3904_v49, %v1075_v23  ;;  %5649 = vst [vmem:[#allocation37_spill] sm:$0xff] %v4004_v38  ;;  %v4013_v24 = vpop.f32.mrb[20].mxu1 }
 0x164   :  { %v3996_v6 = vmul.f32 0.70710677, %v3983_v46  ;;  %v3998_v36 = vpop.eup %3010  ;;  %v1393_v45 = vmul.f32 %v3839_v27, %v1329_v4  ;;  %v1330_v22 = vadd.f32 0.2548296, %v1266_v21  ;;  %3016 = vpow2.f32 %v1604_v62  ;;  %5650 = vst [vmem:[#allocation38_spill] sm:$0xff] %v4013_v24 }
 0x165   :  { %v4002_v29 = vmul.f32 0.70710677, %v3991_v51  ;;  %v1141_v5 = vmul.f32 %v3917_v43, %v1077_v10  ;;  %v1078_v9 = vadd.f32 1.4214138, %v1014_v40  ;;  %v4008_v60 = vmul.f32 0.5, %v3852_v54 }
 0x166   :  { %5647 = vst [vmem:[#allocation6_spill] sm:$0xff] %v3996_v6  ;;  %v4011_v23 = vand.u32 2147483647, %v3996_v6  ;;  %v1711_v16 = vmul.f32 %v3005_v58, %v1391_v47  ;;  %3018 = vpow2.f32 %v1606_v57  ;;  %v1016_v27 = vmul.f32 %v3958_v42, %v952_v3  ;;  %v2939_v47 = vld [vmem:[%s5567_s3 + $0xa8] sm:$0xff]  }
 0x167   :  { %5648 = vst [vmem:[#allocation7_spill] sm:$0xff] %v4002_v29  ;;  %v4017_v4 = vand.u32 2147483647, %v4002_v29  ;;  %v1968_v21 = vsel %vm1840_vm9, %v1776_v17, %v1904_v63  ;;  %v1268_v62 = vmul.f32 %v3883_v28, %v1204_v44  ;;  %v1203_v10 = vadd.f32 -0.28449672, %v1139_v8  ;;  %v5651_v8 = vld [vmem:[#allocation8_spill] sm:$0xff]  ;;  %2811 = vmatpush3.bf16.msra.mxu1 %v2939_v47 }
 0x168   :  { %v697_v54 = vmul.f32 0.3275911, %v4011_v23  ;;  %v1713_v40 = vmul.f32 %v3007_v35, %v1393_v45  ;;  %v1394_v38 = vmul.f32 %v3854_v14, %v1330_v22  ;;  %v1464_v24 = vsub.f32 0.0, %v3877_v52 }
 0x169   :  { %v698_v58 = vmul.f32 0.3275911, %v4017_v4  ;;  %vm1839_vm10 = vcmp.ge.f32.partialorder %v3707_v33, 0.0  ;;  %v1205_v0 = vadd.f32 -0.28449672, %v1141_v5  ;;  %v1142_v17 = vmul.f32 %v3936_v55, %v1078_v9 }
 0x16a   :  { %v761_v57 = vadd.f32 1.0, %v697_v54  ;;  %v4033_v3 = vadd.f32 %v5651_v8, %v3466_v12  ;;  %v2032_v35 = vadd.f32 1.0, %v1968_v21  ;;  %v1775_v14 = vsub.f32 1.0, %v1711_v16 }
 0x16b   :  { %v1080_v63 = vadd.f32 1.4214138, %v1016_v27  ;;  %v762_v44 = vadd.f32 1.0, %v698_v58  ;;  %vm1841_vm11 = vcmp.ge.f32.partialorder %v3745_v30, 0.0  ;;  %v1332_v22 = vadd.f32 0.2548296, %v1268_v62 }
 0x16c   :  { %v4035_v45 = vpop.eup %3012  ;;  %v1267_v15 = vmul.f32 %v3904_v49, %v1203_v10  ;;  %3020 = vrcp.f32 %v761_v57  ;;  %v4040_v5 = vmul.f32 0.70710677, %v4033_v3  ;;  %v1777_v54 = vsub.f32 1.0, %v1713_v40  ;;  %v4044_v27 = vpop.f32.mrb[21].mxu0  ;;  %v5654_v40 = vld [vmem:[#allocation9_spill] sm:$0xff] }
 0x16d   :  { %v3015_v9 = vpop.eup %3014  ;;  %v1714_v8 = vmul.f32 %v3009_v59, %v1394_v38  ;;  %v1528_v21 = vmul.f32 %v1464_v24, %v3877_v52  ;;  %v887_v16 = vmul.f32 1.0614054, %v4035_v45  ;;  %5653 = vst [vmem:[#allocation39_spill] sm:$0xff] %v4044_v27  ;;  %v1269_v58 = vmul.f32 %v3917_v43, %v1205_v0  ;;  %v5655_v52 = vld [vmem:[#allocation10_spill] sm:$0xff] }
 0x16e   :  { %5652 = vst [vmem:[#allocation8_spill] sm:$0xff] %v4040_v5  ;;  %v1206_v47 = vadd.f32 -0.28449672, %v1142_v17  ;;  %3022 = vrcp.f32 %v762_v44  ;;  %v4048_v62 = vand.u32 2147483647, %v4040_v5  ;;  %v3017_v10 = vpop.eup %3016  ;;  %v1903_v57 = vsub.f32 0.0, %v1775_v14 }
 0x16f   :  { %v1144_v2 = vmul.f32 %v3958_v42, %v1080_v63  ;;  %v4053_v59 = vadd.f32 %v5654_v40, %v3474_v19  ;;  %v4057_v38 = vadd.f32 %v5655_v52, %v3482_v26  ;;  %vm1842_vm12 = vcmp.ge.f32.partialorder %v3748_v53, 0.0 }
 0x170   :  { %v1396_v24 = vmul.f32 %v3883_v28, %v1332_v22  ;;  %v1331_v0 = vadd.f32 0.2548296, %v1267_v15  ;;  %v951_v17 = vadd.f32 -1.4531521, %v887_v16  ;;  %v700_v44 = vmul.f32 0.3275911, %v4048_v62  ;;  %v4062_v27 = vpop.eup %3018 }
 0x171   :  { %v1905_v48 = vsub.f32 0.0, %v1777_v54  ;;  %v1778_v63 = vsub.f32 1.0, %v1714_v8  ;;  %v1610_v18 = vmul.f32 1.442695, %v1528_v21  ;;  %v4065_v40 = vmul.f32 0.70710677, %v4053_v59 }
 0x172   :  { %v1333_v5 = vadd.f32 0.2548296, %v1269_v58  ;;  %v1270_v52 = vmul.f32 %v3936_v55, %v1206_v47  ;;  %v764_v29 = vadd.f32 1.0, %v700_v44  ;;  %v4069_v6 = vmul.f32 0.70710677, %v4057_v38  ;;  %v2940_v21 = vld [vmem:[%s5567_s3 + $0x70] sm:$0xff]  }
 0x173   :  { %v4072_v28 = vmul.f32 %v2032_v35, %v3874_v50  ;;  %v1967_v15 = vsel %vm1839_vm10, %v1775_v14, %v1903_v57  ;;  %v1208_v22 = vadd.f32 -0.28449672, %v1144_v2  ;;  %v4077_v8 = vand.u32 2147483647, %v4065_v40  ;;  %v4087_v50 = vpop.f32.mrb[21].mxu1  ;;  %2748 = vmatprep.subr.bf16.mxu0 %v2940_v21 }
 0x174   :  { %v1395_v16 = vmul.f32 %v3904_v49, %v1331_v0  ;;  %v1015_v58 = vmul.f32 %v4035_v45, %v951_v17  ;;  %3024 = vrcp.f32 %v764_v29  ;;  %v4085_v47 = vand.u32 2147483647, %v4069_v6  ;;  %5657 = vst [vmem:[#allocation10_spill] sm:$0xff] %v4087_v50  ;;  %v5658_v17 = vld [vmem:[#allocation12_spill] sm:$0xff] }
 0x175   :  { %5656 = vst [vmem:[#allocation9_spill] sm:$0xff] %v4072_v28  ;;  %v1969_v33 = vsel %vm1841_vm11, %v1777_v54, %v1905_v48  ;;  %v1906_v2 = vsub.f32 0.0, %v1778_v63  ;;  %v1716_v35 = vmul.f32 %v3998_v36, %v1396_v24  ;;  %v699_v14 = vmul.f32 0.3275911, %v4077_v8 }
 0x176   :  { %v4093_v57 = vpop.eup %3020  ;;  %v1397_v49 = vmul.f32 %v3917_v43, %v1333_v5  ;;  %v1334_v0 = vadd.f32 0.2548296, %v1270_v52  ;;  %v701_v29 = vmul.f32 0.3275911, %v4085_v47  ;;  %v4099_v44 = vadd.f32 %v5658_v17, %v3464_v11 }
 0x177   :  { %v2031_v28 = vadd.f32 1.0, %v1967_v15  ;;  %v1272_v30 = vmul.f32 %v3958_v42, %v1208_v22  ;;  %3026 = vpow2.f32 %v1610_v18  ;;  %v763_v48 = vadd.f32 1.0, %v699_v14  ;;  %v5661_v14 = vld [vmem:[#allocation28_spill] sm:$0xff] }
 0x178   :  { %v4102_v36 = vpop.eup %3022  ;;  %vm1844_vm13 = vcmp.ge.f32.partialorder %v3770_v34, 0.0  ;;  %v1715_v54 = vmul.f32 %v3015_v9, %v1395_v16  ;;  %v1079_v24 = vadd.f32 1.4214138, %v1015_v58  ;;  %v1463_v43 = vsub.f32 0.0, %v3962_v13  ;;  %v5659_v58 = vld [vmem:[#allocation13_spill] sm:$0xff] }
 0x179   :  { %v765_v5 = vadd.f32 1.0, %v701_v29  ;;  %v2033_v52 = vadd.f32 1.0, %v1969_v33  ;;  %v1970_v21 = vsel %vm1842_vm12, %v1778_v63, %v1906_v2  ;;  %v1780_v17 = vsub.f32 1.0, %v1716_v35  ;;  %v4131_v29 = vpop.f32.mrb[22].mxu0 }
 0x17a   :  { %v889_v15 = vmul.f32 1.0614054, %v4093_v57  ;;  %v1717_v50 = vmul.f32 %v3017_v10, %v1397_v49  ;;  %v1398_v18 = vmul.f32 %v3936_v55, %v1334_v0  ;;  %3028 = vrcp.f32 %v763_v48  ;;  %5663 = vst [vmem:[#allocation28_spill] sm:$0xff] %v4131_v29 }
 0x17b   :  { %v4111_v22 = vmul.f32 0.70710677, %v4099_v44  ;;  %vm1843_vm14 = vcmp.ge.f32.partialorder %v3791_v7, 0.0  ;;  %v1336_v9 = vadd.f32 0.2548296, %v1272_v30  ;;  %3030 = vrcp.f32 %v765_v5 }
 0x17c   :  { %v890_v16 = vmul.f32 1.0614054, %v4102_v36  ;;  %v4117_v53 = vadd.f32 %v5659_v58, %v3466_v12  ;;  %v1779_v63 = vsub.f32 1.0, %v1715_v54  ;;  %v1143_v33 = vmul.f32 %v4035_v45, %v1079_v24 }
 0x17d   :  { %v1527_v10 = vmul.f32 %v1463_v43, %v3962_v13  ;;  %v4122_v55 = vand.u32 2147483647, %v4111_v22  ;;  %v4125_v2 = vmul.f32 %v2031_v28, %v3892_v32  ;;  %v1908_v35 = vsub.f32 0.0, %v1780_v17 }
 0x17e   :  { %vm1845_vm15 = vcmp.ge.f32.partialorder %v5661_v14, 0.0  ;;  %v953_v49 = vadd.f32 -1.4531521, %v889_v15  ;;  %v4129_v0 = vmul.f32 0.70710677, %v4117_v53  ;;  %v4133_v30 = vpop.eup %3024  ;;  %v1781_v48 = vsub.f32 1.0, %v1717_v50 }
 0x17f   :  { %5660 = vst [vmem:[#allocation12_spill] sm:$0xff] %v4125_v2  ;;  %v1718_v13 = vmul.f32 %v4062_v27, %v1398_v18  ;;  %v4137_v54 = vmul.f32 0.5, %v3930_v56  ;;  %v702_v32 = vmul.f32 0.3275911, %v4122_v55  ;;  %v2034_v28 = vadd.f32 1.0, %v1970_v21  ;;  %v5665_v27 = vld [vmem:[#allocation29_spill] sm:$0xff] }
 0x180   :  { %5662 = vst [vmem:[#allocation13_spill] sm:$0xff] %v4129_v0  ;;  %v1400_v24 = vmul.f32 %v3958_v42, %v1336_v9  ;;  %v954_v43 = vadd.f32 -1.4531521, %v890_v16  ;;  %v4142_v5 = vand.u32 2147483647, %v4129_v0  ;;  %v4145_v15 = vmul.f32 %v2033_v52, %v3911_v25 }
 0x181   :  { %v1907_v58 = vsub.f32 0.0, %v1779_v63  ;;  %v1207_v2 = vadd.f32 -0.28449672, %v1143_v33  ;;  %v1608_v50 = vmul.f32 1.442695, %v1527_v10  ;;  %v3027_v29 = vpop.eup %3026  ;;  %v1972_v56 = vsel %vm1844_vm13, %v1780_v17, %v1908_v35  ;;  %v2941_v10 = vld [vmem:[%s5567_s3 + $0x30] sm:$0xff]  }
 0x182   :  { %5664 = vst [vmem:[#allocation40_spill] sm:$0xff] %v4145_v15  ;;  %vm1846_vm0 = vcmp.ge.f32.partialorder %v5665_v27, 0.0  ;;  %v1017_v21 = vmul.f32 %v4093_v57, %v953_v49  ;;  %v892_v42 = vmul.f32 1.0614054, %v4133_v30  ;;  %v766_v18 = vadd.f32 1.0, %v702_v32  ;;  %2749 = vmatpush3.bf16.msra.mxu0 %v2941_v10 }
 0x183   :  { %v1909_v9 = vsub.f32 0.0, %v1781_v48  ;;  %v1782_v16 = vsub.f32 1.0, %v1718_v13  ;;  %v1465_v0 = vsub.f32 0.0, %v4011_v23  ;;  %v704_v25 = vmul.f32 0.3275911, %v4142_v5 }
 0x184   :  { %v4155_v52 = vmul.f32 %v2034_v28, %v3914_v37  ;;  %v1720_v33 = vmul.f32 %v3027_v29, %v1400_v24  ;;  %v1018_v34 = vmul.f32 %v4102_v36, %v954_v43  ;;  %v1466_v17 = vsub.f32 0.0, %v4017_v4  ;;  %v4162_v35 = vpop.eup %3028  ;;  %v4167_v37 = vpop.f32.mrb[22].mxu1 }
 0x185   :  { %v2036_v49 = vadd.f32 1.0, %v1972_v56  ;;  %v1971_v13 = vsel %vm1843_vm14, %v1779_v63, %v1907_v58  ;;  %v1271_v32 = vmul.f32 %v4035_v45, %v1207_v2  ;;  %3032 = vpow2.f32 %v1608_v50  ;;  %5667 = vst [vmem:[#allocation41_spill] sm:$0xff] %v4167_v37  ;;  %v4169_v29 = vpop.eup %3030  ;;  %v5668_v63 = vld [vmem:[#allocation14_spill] sm:$0xff] }
 0x186   :  { %5666 = vst [vmem:[#allocation29_spill] sm:$0xff] %v4155_v52  ;;  %v1081_v28 = vadd.f32 1.4214138, %v1017_v21  ;;  %v956_v24 = vadd.f32 -1.4531521, %v892_v42  ;;  %3034 = vrcp.f32 %v766_v18  ;;  %v768_v43 = vadd.f32 1.0, %v704_v25 }
 0x187   :  { %v1973_v52 = vsel %vm1845_vm15, %v1781_v48, %v1909_v9  ;;  %v1910_v15 = vsub.f32 0.0, %v1782_v16  ;;  %vm1848_vm1 = vcmp.ge.f32.partialorder %v3867_v61, 0.0  ;;  %v1529_v7 = vmul.f32 %v1465_v0, %v4011_v23  ;;  %v2942_v61 = vld [vmem:[%s5567_s3 + $0xf0] sm:$0xff]  }
 0x188   :  { %v4177_v2 = vadd.f32 %v5668_v63, %v3474_v19  ;;  %v1784_v58 = vsub.f32 1.0, %v1720_v33  ;;  %v1082_v50 = vadd.f32 1.4214138, %v1018_v34  ;;  %v1530_v56 = vmul.f32 %v1466_v17, %v4017_v4  ;;  %2812 = vmatprep.subr.bf16.mxu1 %v2942_v61 }
 0x189   :  { %v891_v21 = vmul.f32 1.0614054, %v4162_v35  ;;  %v4182_v42 = vmul.f32 %v2036_v49, %v3933_v39  ;;  %v1335_v14 = vadd.f32 0.2548296, %v1271_v32  ;;  %v4185_v48 = vmul.f32 0.5, %v3983_v46 }
 0x18a   :  { %v893_v18 = vmul.f32 1.0614054, %v4169_v29  ;;  %v2035_v23 = vadd.f32 1.0, %v1971_v13  ;;  %v1145_v0 = vmul.f32 %v4093_v57, %v1081_v28  ;;  %v1020_v9 = vmul.f32 %v4133_v30, %v956_v24  ;;  %v4207_v24 = vpop.f32.mrb[23].mxu0 }
 0x18b   :  { %5669 = vst [vmem:[#allocation14_spill] sm:$0xff] %v4182_v42  ;;  %3036 = vrcp.f32 %v768_v43  ;;  %v2037_v25 = vadd.f32 1.0, %v1973_v52  ;;  %v1974_v4 = vsel %vm1846_vm0, %v1782_v16, %v1910_v15  ;;  %v1612_v33 = vmul.f32 1.442695, %v1529_v7  ;;  %5671 = vst [vmem:[#allocation43_spill] sm:$0xff] %v4207_v24 }
 0x18c   :  { %v4193_v39 = vmul.f32 0.70710677, %v4177_v2  ;;  %v1912_v34 = vsub.f32 0.0, %v1784_v58  ;;  %v1146_v46 = vmul.f32 %v4102_v36, %v1082_v50  ;;  %v1614_v17 = vmul.f32 1.442695, %v1530_v56 }
 0x18d   :  { %v955_v10 = vadd.f32 -1.4531521, %v891_v21  ;;  %v1399_v49 = vmul.f32 %v4035_v45, %v1335_v14  ;;  %v1468_v13 = vsub.f32 0.0, %v4048_v62  ;;  %v957_v32 = vadd.f32 -1.4531521, %v893_v18 }
 0x18e   :  { %v4199_v28 = vand.u32 2147483647, %v4193_v39  ;;  %v4202_v27 = vmul.f32 %v2035_v23, %v3939_v31  ;;  %v1209_v15 = vadd.f32 -0.28449672, %v1145_v0  ;;  %v4205_v16 = vmul.f32 0.5, %v3991_v51 }
 0x18f   :  { %v1084_v52 = vadd.f32 1.4214138, %v1020_v9  ;;  %v3033_v43 = vpop.eup %3032  ;;  %v4210_v7 = vmul.f32 %v2037_v25, %v3966_v1  ;;  %v2038_v45 = vadd.f32 1.0, %v1974_v4  ;;  %v4213_v63 = vmul.f32 0.5, %v4033_v3  ;;  %v5673_v9 = vld [vmem:[#allocation16_spill] sm:$0xff] }
 0x190   :  { %5670 = vst [vmem:[#allocation42_spill] sm:$0xff] %v4202_v27  ;;  %v703_v50 = vmul.f32 0.3275911, %v4199_v28  ;;  %v4216_v56 = vpop.eup %3034  ;;  %v1976_v31 = vsel %vm1848_vm1, %v1784_v58, %v1912_v34  ;;  %3038 = vpow2.f32 %v1612_v33  ;;  %v1210_v51 = vadd.f32 -0.28449672, %v1146_v46  ;;  %v4232_v58 = vpop.f32.mrb[23].mxu1 }
 0x191   :  { %5672 = vst [vmem:[#allocation44_spill] sm:$0xff] %v4210_v7  ;;  %v1019_v21 = vmul.f32 %v4162_v35, %v955_v10  ;;  %v1719_v14 = vmul.f32 %v3033_v43, %v1399_v49  ;;  %v1532_v18 = vmul.f32 %v1468_v13, %v4048_v62  ;;  %v1021_v1 = vmul.f32 %v4169_v29, %v957_v32 }
 0x192   :  { %v767_v23 = vadd.f32 1.0, %v703_v50  ;;  %v1273_v3 = vmul.f32 %v4093_v57, %v1209_v15  ;;  %3040 = vpow2.f32 %v1614_v17  ;;  %v1148_v0 = vmul.f32 %v4133_v30, %v1084_v52  ;;  %5674 = vst [vmem:[#allocation16_spill] sm:$0xff] %v4232_v58 }
 0x193   :  { %v4227_v25 = vadd.f32 %v5673_v9, %v3482_v26  ;;  %v2040_v4 = vadd.f32 1.0, %v1976_v31  ;;  %v1467_v62 = vsub.f32 0.0, %v4077_v8  ;;  %v894_v33 = vmul.f32 1.0614054, %v4216_v56 }
 0x194   :  { %3042 = vrcp.f32 %v767_v23  ;;  %v1274_v46 = vmul.f32 %v4102_v36, %v1210_v51  ;;  %v4240_v17 = vmul.f32 0.5, %v4053_v59  ;;  %v1083_v10 = vadd.f32 1.4214138, %v1019_v21 }
 0x195   :  { %v4236_v34 = vpop.eup %3036  ;;  %v1469_v49 = vsub.f32 0.0, %v4085_v47  ;;  %v1783_v13 = vsub.f32 1.0, %v1719_v14  ;;  %vm1847_vm2 = vcmp.ge.f32.partialorder %v3947_v20, 0.0  ;;  %v1618_v32 = vmul.f32 1.442695, %v1532_v18 }
 0x196   :  { %v4245_v15 = vmul.f32 0.5, %v4057_v38  ;;  %v1085_v52 = vadd.f32 1.4214138, %v1021_v1  ;;  %v4248_v43 = vmul.f32 %v2038_v45, %v3973_v41  ;;  %v1337_v50 = vadd.f32 0.2548296, %v1273_v3 }
 0x197   :  { %v1212_v31 = vadd.f32 -0.28449672, %v1148_v0  ;;  %v4251_v59 = vmul.f32 0.70710677, %v4227_v25  ;;  %v4254_v51 = vmul.f32 %v2040_v4, %v4008_v60  ;;  %v1531_v21 = vmul.f32 %v1467_v62, %v4077_v8  ;;  %v5677_v60 = vld [vmem:[#allocation17_spill] sm:$0xff] }
 0x198   :  { %5675 = vst [vmem:[#allocation45_spill] sm:$0xff] %v4248_v43  ;;  %v958_v14 = vadd.f32 -1.4531521, %v894_v33  ;;  %v896_v18 = vmul.f32 1.0614054, %v4236_v34  ;;  %v1147_v38 = vmul.f32 %v4162_v35, %v1083_v10  ;;  %v1533_v1 = vmul.f32 %v1469_v49, %v4085_v47 }
 0x199   :  { %5676 = vst [vmem:[#allocation46_spill] sm:$0xff] %v4254_v51  ;;  %v1338_v23 = vadd.f32 0.2548296, %v1274_v46  ;;  %v4261_v41 = vand.u32 2147483647, %v4251_v59  ;;  %3044 = vpow2.f32 %v1618_v32  ;;  %v1149_v45 = vmul.f32 %v4169_v29, %v1085_v52 }
 0x19a   :  { %v1470_v3 = vsub.f32 0.0, %v4122_v55  ;;  %v4267_v0 = vadd.f32 %v5677_v60, %v3464_v11  ;;  %v3039_v8 = vpop.eup %3038  ;;  %v1911_v9 = vsub.f32 0.0, %v1783_v13  ;;  %v1401_v61 = vmul.f32 %v4093_v57, %v1337_v50 }
 0x19b   :  { %v1276_v4 = vmul.f32 %v4133_v30, %v1212_v31  ;;  %v705_v47 = vmul.f32 0.3275911, %v4261_v41  ;;  %v1616_v62 = vmul.f32 1.442695, %v1531_v21  ;;  %v4273_v33 = vmul.f32 0.5, %v4099_v44 }
 0x19c   :  { %v1022_v46 = vmul.f32 %v4216_v56, %v958_v14  ;;  %v960_v10 = vadd.f32 -1.4531521, %v896_v18  ;;  %v3041_v49 = vpop.eup %3040  ;;  %v1402_v32 = vmul.f32 %v4102_v36, %v1338_v23  ;;  %v1211_v52 = vadd.f32 -0.28449672, %v1147_v38 }
 0x19d   :  { %v1620_v60 = vmul.f32 1.442695, %v1533_v1  ;;  %v769_v51 = vadd.f32 1.0, %v705_v47  ;;  %v1213_v57 = vadd.f32 -0.28449672, %v1149_v45  ;;  %v1534_v50 = vmul.f32 %v1470_v3, %v4122_v55  ;;  %v5678_v1 = vld [vmem:[#allocation18_spill] sm:$0xff] }
 0x19e   :  { %v4277_v43 = vpop.eup %3042  ;;  %v1472_v31 = vsub.f32 0.0, %v4142_v5  ;;  %v4282_v21 = vmul.f32 0.70710677, %v4267_v0  ;;  %v1975_v44 = vsel %vm1847_vm2, %v1783_v13, %v1911_v9  ;;  %v4286_v14 = vmul.f32 %v3039_v8, %v1401_v61  ;;  %v2943_v13 = vld [vmem:[%s5567_s3 + $0xb0] sm:$0xff]   ;;  %v4303_v8 = vpop.f32.mrb[24].mxu0 }
 0x19f   :  { %v1340_v18 = vadd.f32 0.2548296, %v1276_v4  ;;  %v895_v36 = vmul.f32 1.0614054, %v4277_v43  ;;  %v1086_v23 = vadd.f32 1.4214138, %v1022_v46  ;;  %v1024_v38 = vmul.f32 %v4236_v34, %v960_v10  ;;  %2813 = vmatpush3.bf16.msra.mxu1 %v2943_v13 }
 0x1a0   :  { %3046 = vrcp.f32 %v769_v51  ;;  %v4292_v55 = vadd.f32 %v5678_v1, %v3466_v12  ;;  %v4294_v45 = vmul.f32 %v3041_v49, %v1402_v32  ;;  %v1275_v3 = vmul.f32 %v4162_v35, %v1211_v52  ;;  %5679 = vst [vmem:[#allocation17_spill] sm:$0xff] %v4303_v8  ;;  %v4307_v4 = vpop.f32.mrb[24].mxu1  ;;  %v5681_v46 = vld [vmem:[#allocation6_spill] sm:$0xff]  ;;  %v5682_v1 = vld [vmem:[#allocation7_spill] sm:$0xff] }
 0x1a1   :  { %3048 = vpow2.f32 %v1616_v62  ;;  %v4298_v20 = vand.u32 2147483647, %v4282_v21  ;;  %v1277_v51 = vmul.f32 %v4169_v29, %v1213_v57  ;;  %v1622_v9 = vmul.f32 1.442695, %v1534_v50  ;;  %5680 = vst [vmem:[#allocation18_spill] sm:$0xff] %v4307_v4 }
 0x1a2   :  { %3050 = vpow2.f32 %v1620_v60  ;;  %v1536_v61 = vmul.f32 %v1472_v31, %v4142_v5  ;;  %v2039_v47 = vadd.f32 1.0, %v1975_v44  ;;  %vm1849_vm3 = vcmp.ge.f32.partialorder %v5681_v46, 0.0  ;;  %v5689_v46 = vld [vmem:[#allocation25_spill] sm:$0xff] }
 0x1a3   :  { %v1404_v62 = vmul.f32 %v4133_v30, %v1340_v18  ;;  %v959_v10 = vadd.f32 -1.4531521, %v895_v36  ;;  %v706_v49 = vmul.f32 0.3275911, %v4298_v20  ;;  %v3045_v32 = vpop.eup %3044  ;;  %v1785_v52 = vsub.f32 1.0, %v4286_v14  ;;  %v5683_v30 = vld [vmem:[#allocation19_spill] sm:$0xff] }
 0x1a4   :  { %vm1850_vm4 = vcmp.ge.f32.partialorder %v5682_v1, 0.0  ;;  %v1150_v60 = vmul.f32 %v4216_v56, %v1086_v23  ;;  %v1088_v57 = vadd.f32 1.4214138, %v1024_v38  ;;  %v4316_v5 = vmul.f32 0.70710677, %v4292_v55  ;;  %v4329_v23 = vpop.f32.mrb[25].mxu0 }
 0x1a5   :  { %v1786_v50 = vsub.f32 1.0, %v4294_v45  ;;  %v1339_v31 = vadd.f32 0.2548296, %v1275_v3  ;;  %v770_v44 = vadd.f32 1.0, %v706_v49  ;;  %v4321_v18 = vadd.f32 %v5683_v30, %v3474_v19  ;;  %5684 = vst [vmem:[#allocation6_spill] sm:$0xff] %v4329_v23  ;;  %v4405_v24 = vpop.f32.mrb[26].mxu0 }
 0x1a6   :  { %v1341_v36 = vadd.f32 0.2548296, %v1277_v51  ;;  %3052 = vpow2.f32 %v1622_v9  ;;  %v4324_v14 = vmul.f32 0.5, %v4117_v53  ;;  %v4327_v13 = vand.u32 2147483647, %v4316_v5  ;;  %v2944_v53 = vld [vmem:[%s5567_s3 + $0x78] sm:$0xff]  }
 0x1a7   :  { %v4331_v38 = vmul.f32 %v3045_v32, %v1404_v62  ;;  %v1626_v42 = vmul.f32 1.442695, %v1536_v61  ;;  %v1023_v45 = vmul.f32 %v4277_v43, %v959_v10  ;;  %3054 = vrcp.f32 %v770_v44  ;;  %v5686_v44 = vld [vmem:[#allocation22_spill] sm:$0xff]  ;;  %2750 = vmatprep.subr.bf16.mxu0 %v2944_v53  ;;  %5693 = vst [vmem:[#allocation47_spill] sm:$0xff] %v4405_v24 }
 0x1a8   :  { %v1913_v3 = vsub.f32 0.0, %v1785_v52  ;;  %v1214_v49 = vadd.f32 -0.28449672, %v1150_v60  ;;  %v1152_v30 = vmul.f32 %v4236_v34, %v1088_v57  ;;  %v708_v51 = vmul.f32 0.3275911, %v4327_v13 }
 0x1a9   :  { %v4340_v9 = vmul.f32 %v2039_v47, %v4137_v54  ;;  %v1914_v7 = vsub.f32 0.0, %v1786_v50  ;;  %v1403_v62 = vmul.f32 %v4162_v35, %v1339_v31  ;;  %v4344_v61 = vmul.f32 0.70710677, %v4321_v18  ;;  %v5687_v35 = vld [vmem:[#allocation8_spill] sm:$0xff] }
 0x1aa   :  { %v4346_v10 = vpop.eup %3046  ;;  %v1405_v32 = vmul.f32 %v4169_v29, %v1341_v36  ;;  %v4350_v60 = vmul.f32 0.5, %v4177_v2  ;;  %v772_v57 = vadd.f32 1.0, %v708_v51  ;;  %v4354_v27 = vadd.f32 %v5686_v44, %v3482_v26 }
 0x1ab   :  { %5685 = vst [vmem:[#allocation7_spill] sm:$0xff] %v4340_v9  ;;  %v3049_v54 = vpop.eup %3048  ;;  %v1788_v47 = vsub.f32 1.0, %v4331_v38  ;;  %vm1852_vm5 = vcmp.ge.f32.partialorder %v5687_v35, 0.0  ;;  %v1087_v31 = vadd.f32 1.4214138, %v1023_v45  ;;  %v1471_v9 = vsub.f32 0.0, %v4199_v28 }
 0x1ac   :  { %v4360_v23 = vand.u32 2147483647, %v4344_v61  ;;  %v3051_v29 = vpop.eup %3050  ;;  %v1977_v2 = vsel %vm1849_vm3, %v1785_v52, %v1913_v3  ;;  %v1278_v36 = vmul.f32 %v4216_v56, %v1214_v49  ;;  %v1216_v51 = vadd.f32 -0.28449672, %v1152_v30  ;;  %v4378_v3 = vpop.f32.mrb[25].mxu1 }
 0x1ad   :  { %3056 = vrcp.f32 %v772_v57  ;;  %v1978_v53 = vsel %vm1850_vm4, %v1786_v50, %v1914_v7  ;;  %v4367_v38 = vmul.f32 %v3049_v54, %v1403_v62  ;;  %v897_v45 = vmul.f32 1.0614054, %v4346_v10  ;;  %5690 = vst [vmem:[#allocation22_spill] sm:$0xff] %v4378_v3 }
 0x1ae   :  { %3058 = vpow2.f32 %v1626_v42  ;;  %v1725_v44 = vmul.f32 %v3051_v29, %v1405_v32  ;;  %v707_v4 = vmul.f32 0.3275911, %v4360_v23  ;;  %v4372_v8 = vmul.f32 0.70710677, %v4354_v27 }
 0x1af   :  { %v4376_v52 = vadd.f32 %v5689_v46, %v3464_v11  ;;  %v2041_v49 = vadd.f32 1.0, %v1977_v2  ;;  %v1916_v1 = vsub.f32 0.0, %v1788_v47  ;;  %v1151_v7 = vmul.f32 %v4277_v43, %v1087_v31 }
 0x1b0   :  { %5688 = vst [vmem:[#allocation19_spill] sm:$0xff] %v4372_v8  ;;  %v1535_v42 = vmul.f32 %v1471_v9, %v4199_v28  ;;  %v3053_v50 = vpop.eup %3052  ;;  %v1342_v30 = vadd.f32 0.2548296, %v1278_v36  ;;  %v1280_v62 = vmul.f32 %v4236_v34, %v1216_v51  ;;  %v771_v32 = vadd.f32 1.0, %v707_v4 }
 0x1b1   :  { %v4384_v57 = vand.u32 2147483647, %v4372_v8  ;;  %v4386_v54 = vpop.eup %3054  ;;  %v2042_v29 = vadd.f32 1.0, %v1978_v53  ;;  %v1787_v46 = vsub.f32 1.0, %v4367_v38  ;;  %vm1851_vm6 = vcmp.ge.f32.partialorder %v4065_v40, 0.0 }
 0x1b2   :  { %vm1853_vm7 = vcmp.ge.f32.partialorder %v4069_v6, 0.0  ;;  %v961_v31 = vadd.f32 -1.4531521, %v897_v45  ;;  %v4392_v28 = vmul.f32 0.70710677, %v4376_v52  ;;  %v1789_v9 = vsub.f32 1.0, %v1725_v44 }
 0x1b3   :  { %v898_v2 = vmul.f32 1.0614054, %v4386_v54  ;;  %3060 = vrcp.f32 %v771_v32  ;;  %v709_v4 = vmul.f32 0.3275911, %v4384_v57  ;;  %v4397_v36 = vmul.f32 %v2041_v49, %v4185_v48 }
 0x1b4   :  { %5691 = vst [vmem:[#allocation8_spill] sm:$0xff] %v4392_v28  ;;  %v1215_v51 = vadd.f32 -0.28449672, %v1151_v7  ;;  %v1624_v53 = vmul.f32 1.442695, %v1535_v42  ;;  %v1980_v45 = vsel %vm1852_vm5, %v1788_v47, %v1916_v1  ;;  %v1406_v3 = vmul.f32 %v4216_v56, %v1342_v30  ;;  %v5694_v47 = vld [vmem:[#allocation26_spill] sm:$0xff] }
 0x1b5   :  { %5692 = vst [vmem:[#allocation25_spill] sm:$0xff] %v4397_v36  ;;  %v4400_v38 = vand.u32 2147483647, %v4392_v28  ;;  %v1344_v58 = vadd.f32 0.2548296, %v1280_v62  ;;  %v773_v44 = vadd.f32 1.0, %v709_v4  ;;  %v1025_v32 = vmul.f32 %v4346_v10, %v961_v31 }
 0x1b6   :  { %v1473_v37 = vsub.f32 0.0, %v4261_v41  ;;  %v962_v48 = vadd.f32 -1.4531521, %v898_v2  ;;  %v1915_v42 = vsub.f32 0.0, %v1787_v46  ;;  %v1917_v36 = vsub.f32 0.0, %v1789_v9  ;;  %v2945_v56 = vld [vmem:[%s5567_s3 + $0x38] sm:$0xff]  }
 0x1b7   :  { %v710_v49 = vmul.f32 0.3275911, %v4400_v38  ;;  %v4410_v7 = vpop.eup %3056  ;;  %3062 = vrcp.f32 %v773_v44  ;;  %v4414_v35 = vadd.f32 %v5694_v47, %v3466_v12  ;;  %v4420_v30 = vmul.f32 %v2042_v29, %v4205_v16  ;;  %2751 = vmatpush3.bf16.msra.mxu0 %v2945_v56 }
 0x1b8   :  { %v3059_v1 = vpop.eup %3058  ;;  %v1279_v62 = vmul.f32 %v4277_v43, %v1215_v51  ;;  %v900_v31 = vmul.f32 1.0614054, %v4410_v7  ;;  %v1726_v4 = vmul.f32 %v3053_v50, %v1406_v3  ;;  %v1408_v44 = vmul.f32 %v4236_v34, %v1344_v58  ;;  %v5696_v51 = vld [vmem:[#allocation27_spill] sm:$0xff] }
 0x1b9   :  { %5695 = vst [vmem:[#allocation26_spill] sm:$0xff] %v4420_v30  ;;  %v774_v2 = vadd.f32 1.0, %v710_v49  ;;  %3064 = vpow2.f32 %v1624_v53  ;;  %v4426_v47 = vmul.f32 0.5, %v4227_v25  ;;  %v2044_v24 = vadd.f32 1.0, %v1980_v45 }
 0x1ba   :  { %v1089_v28 = vadd.f32 1.4214138, %v1025_v32  ;;  %v1026_v8 = vmul.f32 %v4386_v54, %v962_v48  ;;  %v1979_v16 = vsel %vm1851_vm6, %v1787_v46, %v1915_v42  ;;  %v1981_v29 = vsel %vm1853_vm7, %v1789_v9, %v1917_v36  ;;  %v4454_v48 = vpop.f32.mrb[26].mxu1 }
 0x1bb   :  { %3066 = vrcp.f32 %v774_v2  ;;  %v1537_v3 = vmul.f32 %v1473_v37, %v4261_v41  ;;  %v4435_v58 = vmul.f32 0.70710677, %v4414_v35  ;;  %vm1854_vm8 = vcmp.ge.f32.partialorder %v4111_v22, 0.0  ;;  %5697 = vst [vmem:[#allocation27_spill] sm:$0xff] %v4454_v48  ;;  %v5728_v48 = vld [vmem:[#allocation10_spill] sm:$0xff] }
 0x1bc   :  { %v1343_v25 = vadd.f32 0.2548296, %v1279_v62  ;;  %v1474_v34 = vsub.f32 0.0, %v4298_v20  ;;  %v964_v50 = vadd.f32 -1.4531521, %v900_v31  ;;  %v4441_v53 = vadd.f32 %v5696_v51, %v3474_v19 }
 0x1bd   :  { %v4443_v40 = vpop.eup %3060  ;;  %v1790_v46 = vsub.f32 1.0, %v1726_v4  ;;  %v4445_v6 = vmul.f32 %v3059_v1, %v1408_v44  ;;  %v4448_v37 = vmul.f32 0.5, %v4267_v0  ;;  %v4451_v41 = vand.u32 2147483647, %v4435_v58 }
 0x1be   :  { %v2043_v9 = vadd.f32 1.0, %v1979_v16  ;;  %v2045_v36 = vadd.f32 1.0, %v1981_v29  ;;  %v1153_v45 = vmul.f32 %v4346_v10, %v1089_v28  ;;  %v1090_v32 = vadd.f32 1.4214138, %v1026_v8 }
 0x1bf   :  { %v4457_v49 = vmul.f32 %v2044_v24, %v4213_v63  ;;  %v899_v42 = vmul.f32 1.0614054, %v4443_v40  ;;  %v712_v56 = vmul.f32 0.3275911, %v4451_v41  ;;  %v4462_v0 = vmul.f32 0.70710677, %v4441_v53 }
 0x1c0   :  { %v1407_v1 = vmul.f32 %v4277_v43, %v1343_v25  ;;  %v1628_v62 = vmul.f32 1.442695, %v1537_v3  ;;  %v1538_v31 = vmul.f32 %v1474_v34, %v4298_v20  ;;  %v1028_v28 = vmul.f32 %v4410_v7, %v964_v50  ;;  %v5701_v43 = vld [vmem:[#allocation13_spill] sm:$0xff] }
 0x1c1   :  { %5698 = vst [vmem:[#allocation48_spill] sm:$0xff] %v4457_v49  ;;  %v4467_v8 = vpop.eup %3062  ;;  %v1918_v2 = vsub.f32 0.0, %v1790_v46  ;;  %v1792_v24 = vsub.f32 1.0, %v4445_v6  ;;  %v776_v63 = vadd.f32 1.0, %v712_v56  ;;  %v4471_v4 = vand.u32 2147483647, %v4462_v0 }
 0x1c2   :  { %v4474_v44 = vmul.f32 %v2043_v9, %v4240_v17  ;;  %v4477_v16 = vmul.f32 %v2045_v36, %v4245_v15  ;;  %vm1856_vm9 = vcmp.ge.f32.partialorder %v5701_v43, 0.0  ;;  %v1217_v20 = vadd.f32 -0.28449672, %v1153_v45  ;;  %v4530_v43 = vpop.f32.mrb[27].mxu1 }
 0x1c3   :  { %v901_v29 = vmul.f32 1.0614054, %v4467_v8  ;;  %v3065_v3 = vpop.eup %3064  ;;  %v1154_v25 = vmul.f32 %v4386_v54, %v1090_v32  ;;  %v1476_v34 = vsub.f32 0.0, %v4327_v13  ;;  %v963_v50 = vadd.f32 -1.4531521, %v899_v42  ;;  %v2946_v32 = vld [vmem:[%s5567_s3 + $0xf8] sm:$0xff]  }
 0x1c4   :  { %5699 = vst [vmem:[#allocation49_spill] sm:$0xff] %v4474_v44  ;;  %5700 = vst [vmem:[#allocation50_spill] sm:$0xff] %v4477_v16  ;;  %v711_v51 = vmul.f32 0.3275911, %v4471_v4  ;;  %v1727_v17 = vmul.f32 %v3065_v3, %v1407_v1  ;;  %v1630_v9 = vmul.f32 1.442695, %v1538_v31  ;;  %3068 = vrcp.f32 %v776_v63  ;;  %2814 = vmatprep.subr.bf16.mxu1 %v2946_v32 }
 0x1c5   :  { %v4484_v6 = vpop.eup %3066  ;;  %v1092_v56 = vadd.f32 1.4214138, %v1028_v28  ;;  %v1982_v15 = vsel %vm1854_vm8, %v1790_v46, %v1918_v2  ;;  %v1920_v36 = vsub.f32 0.0, %v1792_v24  ;;  %3070 = vpow2.f32 %v1628_v62  ;;  %v4492_v42 = vpop.f32.mrb[27].mxu0  ;;  %v5703_v31 = vld [vmem:[#allocation30_spill] sm:$0xff]  ;;  %5705 = vst [vmem:[#allocation51_spill] sm:$0xff] %v4530_v43 }
 0x1c6   :  { %v902_v45 = vmul.f32 1.0614054, %v4484_v6  ;;  %5702 = vst [vmem:[#allocation13_spill] sm:$0xff] %v4492_v42  ;;  %v1281_v49 = vmul.f32 %v4346_v10, %v1217_v20  ;;  %v965_v30 = vadd.f32 -1.4531521, %v901_v29  ;;  %v775_v1 = vadd.f32 1.0, %v711_v51 }
 0x1c7   :  { %v4497_v28 = vadd.f32 %v5703_v31, %v3482_v26  ;;  %vm1855_vm10 = vcmp.ge.f32.partialorder %v4193_v39, 0.0  ;;  %v1218_v22 = vadd.f32 -0.28449672, %v1154_v25  ;;  %v1540_v46 = vmul.f32 %v1476_v34, %v4327_v13 }
 0x1c8   :  { %v1027_v62 = vmul.f32 %v4443_v40, %v963_v50  ;;  %v966_v2 = vadd.f32 -1.4531521, %v902_v45  ;;  %v1791_v63 = vsub.f32 1.0, %v1727_v17  ;;  %v1156_v3 = vmul.f32 %v4410_v7, %v1092_v56 }
 0x1c9   :  { %v1475_v20 = vsub.f32 0.0, %v4360_v23  ;;  %3072 = vrcp.f32 %v775_v1  ;;  %v2046_v29 = vadd.f32 1.0, %v1982_v15  ;;  %v4505_v51 = vmul.f32 0.5, %v4292_v55 }
 0x1ca   :  { %3074 = vpow2.f32 %v1630_v9  ;;  %v4508_v31 = vmul.f32 0.5, %v4321_v18  ;;  %v1345_v25 = vadd.f32 0.2548296, %v1281_v49  ;;  %v1029_v13 = vmul.f32 %v4467_v8, %v965_v30 }
 0x1cb   :  { %v1477_v34 = vsub.f32 0.0, %v4384_v57  ;;  %v4513_v50 = vmul.f32 0.70710677, %v4497_v28  ;;  %v1984_v17 = vsel %vm1856_vm9, %v1792_v24, %v1920_v36  ;;  %v1282_v56 = vmul.f32 %v4386_v54, %v1218_v22 }
 0x1cc   :  { %v1091_v9 = vadd.f32 1.4214138, %v1027_v62  ;;  %v1030_v55 = vmul.f32 %v4484_v6, %v966_v2  ;;  %v1919_v15 = vsub.f32 0.0, %v1791_v63  ;;  %v1220_v45 = vadd.f32 -0.28449672, %v1156_v3 }
 0x1cd   :  { %v1634_v18 = vmul.f32 1.442695, %v1540_v46  ;;  %v1539_v49 = vmul.f32 %v1475_v20, %v4360_v23  ;;  %v4521_v30 = vmul.f32 %v2046_v29, %v4273_v33  ;;  %v4524_v32 = vmul.f32 0.5, %v4354_v27 }
 0x1ce   :  { %v1478_v1 = vsub.f32 0.0, %v4400_v38  ;;  %v4528_v24 = vand.u32 2147483647, %v4513_v50  ;;  %v4532_v36 = vpop.eup %3068  ;;  %v2048_v22 = vadd.f32 1.0, %v1984_v17  ;;  %v1409_v46 = vmul.f32 %v4346_v10, %v1345_v25 }
 0x1cf   :  { %5704 = vst [vmem:[#allocation30_spill] sm:$0xff] %v4521_v30  ;;  %v1093_v62 = vadd.f32 1.4214138, %v1029_v13  ;;  %v1541_v23 = vmul.f32 %v1477_v34, %v4384_v57  ;;  %v3071_v33 = vpop.eup %3070  ;;  %v1346_v2 = vadd.f32 0.2548296, %v1282_v56  ;;  %v1155_v27 = vmul.f32 %v4443_v40, %v1091_v9  ;;  %v5706_v57 = vld [vmem:[#allocation11_spill] sm:$0xff] }
 0x1d0   :  { %v1094_v3 = vadd.f32 1.4214138, %v1030_v55  ;;  %v713_v20 = vmul.f32 0.3275911, %v4528_v24  ;;  %v1983_v29 = vsel %vm1855_vm10, %v1791_v63, %v1919_v15  ;;  %v1284_v30 = vmul.f32 %v4410_v7, %v1220_v45 }
 0x1d1   :  { %3076 = vpow2.f32 %v1634_v18  ;;  %v1632_v16 = vmul.f32 1.442695, %v1539_v49  ;;  %v1542_v17 = vmul.f32 %v1478_v1, %v4400_v38  ;;  %v904_v10 = vmul.f32 1.0614054, %v4532_v36  ;;  %v2947_v38 = vld [vmem:[%s5567_s3 + $0xb8] sm:$0xff]  }
 0x1d2   :  { %v777_v25 = vadd.f32 1.0, %v713_v20  ;;  %v4545_v13 = vadd.f32 %v5706_v57, %v3464_v11  ;;  %v4550_v56 = vmul.f32 %v2048_v22, %v4324_v14  ;;  %v1729_v39 = vmul.f32 %v3071_v33, %v1409_v46  ;;  %v5708_v14 = vld [vmem:[#allocation33_spill] sm:$0xff]  ;;  %2815 = vmatpush3.bf16.msra.mxu1 %v2947_v38 }
 0x1d3   :  { %v4547_v34 = vpop.eup %3072  ;;  %v1157_v63 = vmul.f32 %v4467_v8, %v1093_v62  ;;  %v1636_v9 = vmul.f32 1.442695, %v1541_v23  ;;  %v2047_v15 = vadd.f32 1.0, %v1983_v29  ;;  %v1410_v45 = vmul.f32 %v4386_v54, %v1346_v2  ;;  %v4570_v2 = vpop.f32.mrb[28].mxu0 }
 0x1d4   :  { %5707 = vst [vmem:[#allocation11_spill] sm:$0xff] %v4550_v56  ;;  %v3075_v55 = vpop.eup %3074  ;;  %v1219_v18 = vadd.f32 -0.28449672, %v1155_v27  ;;  %v1158_v49 = vmul.f32 %v4484_v6, %v1094_v3  ;;  %v1348_v1 = vadd.f32 0.2548296, %v1284_v30  ;;  %3078 = vrcp.f32 %v777_v25  ;;  %5709 = vst [vmem:[#allocation33_spill] sm:$0xff] %v4570_v2 }
 0x1d5   :  { %v903_v20 = vmul.f32 1.0614054, %v4547_v34  ;;  %v4561_v22 = vadd.f32 %v5708_v14, %v3466_v12  ;;  %vm1857_vm11 = vcmp.ge.f32.partialorder %v4251_v59, 0.0  ;;  %3080 = vpow2.f32 %v1632_v16  ;;  %v4572_v27 = vpop.f32.mrb[28].mxu1  ;;  %v5712_v59 = vld [vmem:[#allocation5_spill] sm:$0xff] }
 0x1d6   :  { %v1638_v46 = vmul.f32 1.442695, %v1542_v17  ;;  %v968_v62 = vadd.f32 -1.4531521, %v904_v10  ;;  %v4565_v23 = vmul.f32 0.70710677, %v4545_v13  ;;  %3082 = vpow2.f32 %v1636_v9 }
 0x1d7   :  { %v1793_v54 = vsub.f32 1.0, %v1729_v39  ;;  %v1221_v33 = vadd.f32 -0.28449672, %v1157_v63  ;;  %v4568_v30 = vmul.f32 0.5, %v4376_v52  ;;  %5710 = vst [vmem:[#allocation52_spill] sm:$0xff] %v4572_v27  ;;  %v1730_v3 = vmul.f32 %v3075_v55, %v1410_v45  ;;  %v5717_v27 = vld [vmem:[#allocation19_spill] sm:$0xff] }
 0x1d8   :  { %v1283_v29 = vmul.f32 %v4443_v40, %v1219_v18  ;;  %v1222_v25 = vadd.f32 -0.28449672, %v1158_v49  ;;  %v4576_v16 = vmul.f32 0.5, %v4414_v35  ;;  %v1412_v17 = vmul.f32 %v4410_v7, %v1348_v1 }
 0x1d9   :  { %v967_v10 = vadd.f32 -1.4531521, %v903_v20  ;;  %v4580_v57 = vand.u32 2147483647, %v4565_v23  ;;  %v4583_v52 = vmul.f32 0.70710677, %v4561_v22  ;;  %v4586_v39 = vmul.f32 %v2047_v15, %v4350_v60 }
 0x1da   :  { %3084 = vpow2.f32 %v1638_v46  ;;  %v1032_v63 = vmul.f32 %v4532_v36, %v968_v62  ;;  %v1480_v9 = vsub.f32 0.0, %v4451_v41  ;;  %v1921_v35 = vsub.f32 0.0, %v1793_v54 }
 0x1db   :  { %5711 = vst [vmem:[#allocation53_spill] sm:$0xff] %v4586_v39  ;;  %v3077_v38 = vpop.eup %3076  ;;  %vm1858_vm12 = vcmp.ge.f32.partialorder %v4282_v21, 0.0  ;;  %v1285_v7 = vmul.f32 %v4467_v8, %v1221_v33  ;;  %v714_v55 = vmul.f32 0.3275911, %v4580_v57  ;;  %v4594_v45 = vand.u32 2147483647, %v4583_v52 }
 0x1dc   :  { %v1794_v18 = vsub.f32 1.0, %v1730_v3  ;;  %v1347_v49 = vadd.f32 0.2548296, %v1283_v29  ;;  %v1286_v60 = vmul.f32 %v4484_v6, %v1222_v25  ;;  %v1479_v15 = vsub.f32 0.0, %v4471_v4 }
 0x1dd   :  { %v1732_v1 = vmul.f32 %v3077_v38, %v1412_v17  ;;  %v1031_v20 = vmul.f32 %v4547_v34, %v967_v10  ;;  %v778_v14 = vadd.f32 1.0, %v714_v55  ;;  %v716_v46 = vmul.f32 0.3275911, %v4594_v45 }
 0x1de   :  { %v1096_v62 = vadd.f32 1.4214138, %v1032_v63  ;;  %v1544_v33 = vmul.f32 %v1480_v9, %v4451_v41  ;;  %v4602_v56 = vmul.f32 0.5, %v4441_v53  ;;  %v4605_v39 = vmul.f32 0.5, %v4497_v28  ;;  %v4607_v3 = vpop.eup %3078 }
 0x1df   :  { %v1985_v29 = vsel %vm1857_vm11, %v1793_v54, %v1921_v35  ;;  %v1349_v25 = vadd.f32 0.2548296, %v1285_v7  ;;  %3086 = vrcp.f32 %v778_v14  ;;  %v780_v17 = vadd.f32 1.0, %v716_v46  ;;  %v3081_v10 = vpop.eup %3080 }
 0x1e0   :  { %v1922_v38 = vsub.f32 0.0, %v1794_v18  ;;  %vm1860_vm13 = vcmp.ge.f32.partialorder %v4316_v5, 0.0  ;;  %v1411_v41 = vmul.f32 %v4443_v40, %v1347_v49  ;;  %v1350_v63 = vadd.f32 0.2548296, %v1286_v60  ;;  %v3083_v9 = vpop.eup %3082  ;;  %v5713_v60 = vld [vmem:[#allocation36_spill] sm:$0xff] }
 0x1e1   :  { %v905_v53 = vmul.f32 1.0614054, %v4607_v3  ;;  %v1796_v28 = vsub.f32 1.0, %v1732_v1  ;;  %v1095_v55 = vadd.f32 1.4214138, %v1031_v20  ;;  %v1543_v44 = vmul.f32 %v1479_v15, %v4471_v4  ;;  %v5719_v5 = vld [vmem:[#allocation8_spill] sm:$0xff] }
 0x1e2   :  { %v4617_v54 = vadd.f32 %v5712_v59, %v3474_v19  ;;  %v1160_v35 = vmul.f32 %v4532_v36, %v1096_v62  ;;  %v1642_v7 = vmul.f32 1.442695, %v1544_v33  ;;  %3088 = vrcp.f32 %v780_v17  ;;  %v4632_v17 = vpop.f32.mrb[29].mxu0  ;;  %v4638_v59 = vpop.f32.mrb[29].mxu1 }
 0x1e3   :  { %v969_v14 = vadd.f32 -1.4531521, %v905_v53  ;;  %v2049_v46 = vadd.f32 1.0, %v1985_v29  ;;  %v1413_v40 = vmul.f32 %v4467_v8, %v1349_v25  ;;  %v4626_v1 = vadd.f32 %v5713_v60, %v3482_v26  ;;  %5714 = vst [vmem:[#allocation5_spill] sm:$0xff] %v4632_v17  ;;  %5715 = vst [vmem:[#allocation36_spill] sm:$0xff] %v4638_v59 }
 0x1e4   :  { %v4622_v49 = vmul.f32 0.70710677, %v4617_v54  ;;  %v3085_v4 = vpop.eup %3084  ;;  %v1986_v15 = vsel %vm1858_vm12, %v1794_v18, %v1922_v38  ;;  %v1731_v20 = vmul.f32 %v3081_v10, %v1411_v41  ;;  %v1414_v62 = vmul.f32 %v4484_v6, %v1350_v63  ;;  %v5716_v6 = vld [vmem:[#allocation37_spill] sm:$0xff] }
 0x1e5   :  { %v1033_v33 = vmul.f32 %v4607_v3, %v969_v14  ;;  %v1924_v29 = vsub.f32 0.0, %v1796_v28  ;;  %v1159_v8 = vmul.f32 %v4547_v34, %v1095_v55  ;;  %v1640_v25 = vmul.f32 1.442695, %v1543_v44 }
 0x1e6   :  { %v4636_v53 = vand.u32 2147483647, %v4622_v49  ;;  %v1224_v60 = vadd.f32 -0.28449672, %v1160_v35  ;;  %v1481_v21 = vsub.f32 0.0, %v4528_v24  ;;  %v4646_v10 = vadd.f32 %v5716_v6, %v3464_v11 }
 0x1e7   :  { %v4642_v18 = vmul.f32 0.70710677, %v4626_v1  ;;  %v2050_v38 = vadd.f32 1.0, %v1986_v15  ;;  %vm1859_vm14 = vcmp.ge.f32.partialorder %v4344_v61, 0.0  ;;  %v1733_v41 = vmul.f32 %v3083_v9, %v1413_v40  ;;  %v5723_v61 = vld [vmem:[#allocation39_spill] sm:$0xff] }
 0x1e8   :  { %3090 = vpow2.f32 %v1642_v7  ;;  %v715_v44 = vmul.f32 0.3275911, %v4636_v53  ;;  %v1795_v63 = vsub.f32 1.0, %v1731_v20  ;;  %v1734_v55 = vmul.f32 %v3085_v4, %v1414_v62 }
 0x1e9   :  { %v1097_v14 = vadd.f32 1.4214138, %v1033_v33  ;;  %v4651_v35 = vand.u32 2147483647, %v4642_v18  ;;  %v4653_v59 = vpop.eup %3086  ;;  %v1988_v17 = vsel %vm1860_vm13, %v1796_v28, %v1924_v29  ;;  %v1223_v6 = vadd.f32 -0.28449672, %v1159_v8 }
 0x1ea   :  { %3092 = vpow2.f32 %v1640_v25  ;;  %v779_v15 = vadd.f32 1.0, %v715_v44  ;;  %vm1861_vm15 = vcmp.ge.f32.partialorder %v5717_v27, 0.0  ;;  %v1288_v9 = vmul.f32 %v4532_v36, %v1224_v60 }
 0x1eb   :  { %v1545_v7 = vmul.f32 %v1481_v21, %v4528_v24  ;;  %v906_v40 = vmul.f32 1.0614054, %v4653_v59  ;;  %v4662_v4 = vmul.f32 0.70710677, %v4646_v10  ;;  %v4665_v20 = vmul.f32 %v2049_v46, %v4426_v47  ;;  %v4674_v46 = vpop.f32.mrb[30].mxu0 }
 0x1ec   :  { %v1797_v62 = vsub.f32 1.0, %v1733_v41  ;;  %vm1862_vm0 = vcmp.ge.f32.partialorder %v5719_v5, 0.0  ;;  %3094 = vrcp.f32 %v779_v15  ;;  %v717_v28 = vmul.f32 0.3275911, %v4651_v35  ;;  %v4669_v33 = vpop.eup %3088  ;;  %5720 = vst [vmem:[#allocation19_spill] sm:$0xff] %v4674_v46 }
 0x1ed   :  { %5718 = vst [vmem:[#allocation37_spill] sm:$0xff] %v4665_v20  ;;  %v2052_v29 = vadd.f32 1.0, %v1988_v17  ;;  %v1923_v8 = vsub.f32 0.0, %v1795_v63  ;;  %v1798_v25 = vsub.f32 1.0, %v1734_v55  ;;  %v1161_v24 = vmul.f32 %v4607_v3, %v1097_v14 }
 0x1ee   :  { %v1287_v60 = vmul.f32 %v4547_v34, %v1223_v6  ;;  %v970_v21 = vadd.f32 -1.4531521, %v906_v40  ;;  %v908_v44 = vmul.f32 1.0614054, %v4669_v33  ;;  %v781_v47 = vadd.f32 1.0, %v717_v28 }
 0x1ef   :  { %v4677_v41 = vmul.f32 %v2050_v38, %v4448_v37  ;;  %v1352_v15 = vadd.f32 0.2548296, %v1288_v9  ;;  %v1644_v20 = vmul.f32 1.442695, %v1545_v7  ;;  %v4680_v2 = vand.u32 2147483647, %v4662_v4 }
 0x1f0   :  { %v1925_v17 = vsub.f32 0.0, %v1797_v62  ;;  %v4683_v55 = vmul.f32 0.5, %v4545_v13  ;;  %v972_v14 = vadd.f32 -1.4531521, %v908_v44  ;;  %3096 = vrcp.f32 %v781_v47 }
 0x1f1   :  { %5721 = vst [vmem:[#allocation8_spill] sm:$0xff] %v4677_v41  ;;  %v1987_v6 = vsel %vm1859_vm14, %v1795_v63, %v1923_v8  ;;  %v1926_v40 = vsub.f32 0.0, %v1798_v25  ;;  %v1225_v28 = vadd.f32 -0.28449672, %v1161_v24  ;;  %v718_v46 = vmul.f32 0.3275911, %v4680_v2 }
 0x1f2   :  { %v3091_v37 = vpop.eup %3090  ;;  %v1351_v38 = vadd.f32 0.2548296, %v1287_v60  ;;  %v1034_v9 = vmul.f32 %v4653_v59, %v970_v21  ;;  %v1482_v7 = vsub.f32 0.0, %v4580_v57  ;;  %v5722_v41 = vld [vmem:[#allocation38_spill] sm:$0xff]  ;;  %v1416_v13 = vmul.f32 %v4532_v36, %v1352_v15 }
 0x1f3   :  { %v4692_v43 = vadd.f32 %v5722_v41, %v3466_v12  ;;  %3098 = vpow2.f32 %v1644_v20  ;;  %v782_v44 = vadd.f32 1.0, %v718_v46  ;;  %v4697_v63 = vadd.f32 %v5723_v61, %v3474_v19  ;;  %v4708_v41 = vpop.f32.mrb[30].mxu1 }
 0x1f4   :  { %v3093_v8 = vpop.eup %3092  ;;  %v1989_v24 = vsel %vm1861_vm15, %v1797_v62, %v1925_v17  ;;  %v4702_v60 = vmul.f32 0.5, %v4561_v22  ;;  %v1036_v21 = vmul.f32 %v4669_v33, %v972_v14  ;;  %5724 = vst [vmem:[#allocation38_spill] sm:$0xff] %v4708_v41  ;;  %v2051_v36 = vadd.f32 1.0, %v1987_v6 }
 0x1f5   :  { %v4706_v47 = vmul.f32 0.70710677, %v4692_v43  ;;  %v1990_v20 = vsel %vm1862_vm0, %v1798_v25, %v1926_v40  ;;  %v1289_v46 = vmul.f32 %v4607_v3, %v1225_v28  ;;  %3100 = vrcp.f32 %v782_v44 }
 0x1f6   :  { %v4713_v15 = vpop.eup %3094  ;;  %v1415_v27 = vmul.f32 %v4547_v34, %v1351_v38  ;;  %v1098_v22 = vadd.f32 1.4214138, %v1034_v9  ;;  %v1546_v62 = vmul.f32 %v1482_v7, %v4580_v57  ;;  %v2053_v14 = vadd.f32 1.0, %v1989_v24 }
 0x1f7   :  { %v4718_v17 = vand.u32 2147483647, %v4706_v47  ;;  %v1736_v61 = vmul.f32 %v3091_v37, %v1416_v13  ;;  %v907_v6 = vmul.f32 1.0614054, %v4713_v15  ;;  %v4722_v5 = vmul.f32 0.70710677, %v4697_v63 }
 0x1f8   :  { %v2054_v25 = vadd.f32 1.0, %v1990_v20  ;;  %v1100_v40 = vadd.f32 1.4214138, %v1036_v21  ;;  %v1484_v28 = vsub.f32 0.0, %v4594_v45  ;;  %v4727_v34 = vmul.f32 %v2052_v29, %v4505_v51  ;;  %v4736_v20 = vpop.f32.mrb[31].mxu0 }
 0x1f9   :  { %v720_v44 = vmul.f32 0.3275911, %v4718_v17  ;;  %v1353_v57 = vadd.f32 0.2548296, %v1289_v46  ;;  %v971_v38 = vadd.f32 -1.4531521, %v907_v6  ;;  %v1735_v7 = vmul.f32 %v3093_v8, %v1415_v27 }
 0x1fa   :  { %5725 = vst [vmem:[#allocation39_spill] sm:$0xff] %v4727_v34  ;;  %v4730_v9 = vand.u32 2147483647, %v4722_v5  ;;  %v4732_v37 = vpop.eup %3096  ;;  %vm1864_vm1 = vcmp.ge.f32.partialorder %v4435_v58, 0.0  ;;  %v1162_v13 = vmul.f32 %v4653_v59, %v1098_v22  ;;  %v1646_v24 = vmul.f32 1.442695, %v1546_v62 }
 0x1fb   :  { %v784_v21 = vadd.f32 1.0, %v720_v44  ;;  %5726 = vst [vmem:[#allocation54_spill] sm:$0xff] %v4736_v20  ;;  %v1800_v41 = vsub.f32 1.0, %v1736_v61  ;;  %v1035_v51 = vmul.f32 %v4713_v15, %v971_v38  ;;  %v909_v29 = vmul.f32 1.0614054, %v4732_v37 }
 0x1fc   :  { %v719_v46 = vmul.f32 0.3275911, %v4730_v9  ;;  %v1164_v6 = vmul.f32 %v4669_v33, %v1100_v40  ;;  %v1548_v34 = vmul.f32 %v1484_v28, %v4594_v45  ;;  %v1483_v42 = vsub.f32 0.0, %v4636_v53 }
 0x1fd   :  { %3102 = vrcp.f32 %v784_v21  ;;  %v3099_v8 = vpop.eup %3098  ;;  %vm1863_vm2 = vcmp.ge.f32.partialorder %v4462_v0, 0.0  ;;  %v1417_v27 = vmul.f32 %v4607_v3, %v1353_v57  ;;  %v1099_v22 = vadd.f32 1.4214138, %v1035_v51 }
 0x1fe   :  { %v973_v62 = vadd.f32 -1.4531521, %v909_v29  ;;  %v783_v61 = vadd.f32 1.0, %v719_v46  ;;  %v4747_v44 = vmul.f32 %v2051_v36, %v4508_v31  ;;  %v4750_v38 = vmul.f32 %v2053_v14, %v4524_v32 }
 0x1ff   :  { %v1799_v40 = vsub.f32 1.0, %v1735_v7  ;;  %v1226_v20 = vadd.f32 -0.28449672, %v1162_v13  ;;  %v4752_v45 = vpop.eup %3100  ;;  %v1928_v28 = vsub.f32 0.0, %v1800_v41  ;;  %v4757_v3 = vadd.f32 %v5728_v48, %v3482_v26 }
 0x200   :  { %5727 = vst [vmem:[#allocation55_spill] sm:$0xff] %v4750_v38  ;;  %v1037_v21 = vmul.f32 %v4732_v37, %v973_v62  ;;  %3104 = vrcp.f32 %v783_v61  ;;  %v1228_v57 = vadd.f32 -0.28449672, %v1164_v6  ;;  %v1650_v51 = vmul.f32 1.442695, %v1548_v34  ;;  %v4769_v6 = vpop.f32.mrb[31].mxu1 }
 0x201   :  { %v1547_v31 = vmul.f32 %v1483_v42, %v4636_v53  ;;  %v910_v36 = vmul.f32 1.0614054, %v4752_v45  ;;  %v4762_v32 = vmul.f32 %v2054_v25, %v4568_v30  ;;  %v1737_v14 = vmul.f32 %v3099_v8, %v1417_v27 }
 0x202   :  { %3106 = vpow2.f32 %v1646_v24  ;;  %v1163_v7 = vmul.f32 %v4713_v15, %v1099_v22  ;;  %v1927_v13 = vsub.f32 0.0, %v1799_v40  ;;  %v1290_v29 = vmul.f32 %v4653_v59, %v1226_v20 }
 0x203   :  { %5729 = vst [vmem:[#allocation10_spill] sm:$0xff] %v4762_v32  ;;  %v4767_v46 = vmul.f32 0.5, %v4617_v54  ;;  %v974_v48 = vadd.f32 -1.4531521, %v910_v36  ;;  %v1992_v42 = vsel %vm1864_vm1, %v1800_v41, %v1928_v28  ;;  %v1101_v53 = vadd.f32 1.4214138, %v1037_v21 }
 0x204   :  { %v1485_v30 = vsub.f32 0.0, %v4651_v35  ;;  %v4775_v25 = vmul.f32 0.70710677, %v4757_v3  ;;  %vm1865_vm3 = vcmp.ge.f32.partialorder %v4513_v50, 0.0  ;;  %v1292_v34 = vmul.f32 %v4669_v33, %v1228_v57 }
 0x205   :  { %3108 = vpow2.f32 %v1650_v51  ;;  %v1648_v24 = vmul.f32 1.442695, %v1547_v31  ;;  %v1038_v54 = vmul.f32 %v4752_v45, %v974_v48  ;;  %v1801_v20 = vsub.f32 1.0, %v1737_v14  ;;  %v5730_v51 = vld [vmem:[#allocation28_spill] sm:$0xff] }
 0x206   :  { %v1227_v8 = vadd.f32 -0.28449672, %v1163_v7  ;;  %v4781_v27 = vmul.f32 0.5, %v4626_v1  ;;  %v4784_v58 = vand.u32 2147483647, %v4775_v25  ;;  %v2056_v22 = vadd.f32 1.0, %v1992_v42 }
 0x207   :  { %v4786_v41 = vpop.eup %3102  ;;  %v1991_v62 = vsel %vm1863_vm2, %v1799_v40, %v1927_v13  ;;  %v1354_v61 = vadd.f32 0.2548296, %v1290_v29  ;;  %v4791_v28 = vmul.f32 0.5, %v4646_v10  ;;  %v1165_v21 = vmul.f32 %v4732_v37, %v1101_v53 }
 0x208   :  { %v1549_v57 = vmul.f32 %v1485_v30, %v4651_v35  ;;  %v912_v1 = vmul.f32 1.0614054, %v4786_v41  ;;  %v4798_v31 = vadd.f32 %v5730_v51, %v3464_v11  ;;  %v1356_v36 = vadd.f32 0.2548296, %v1292_v34 }
 0x209   :  { %3110 = vpow2.f32 %v1648_v24  ;;  %v1102_v14 = vadd.f32 1.4214138, %v1038_v54  ;;  %v721_v0 = vmul.f32 0.3275911, %v4784_v58  ;;  %v1929_v7 = vsub.f32 0.0, %v1801_v20 }
 0x20a   :  { %v4801_v40 = vpop.eup %3104  ;;  %v1291_v10 = vmul.f32 %v4713_v15, %v1227_v8  ;;  %v1486_v13 = vsub.f32 0.0, %v4680_v2  ;;  %v1488_v35 = vsub.f32 0.0, %v4718_v17  ;;  %v1418_v29 = vmul.f32 %v4653_v59, %v1354_v61 }
 0x20b   :  { %v976_v48 = vadd.f32 -1.4531521, %v912_v1  ;;  %v911_v42 = vmul.f32 1.0614054, %v4801_v40  ;;  %v785_v53 = vadd.f32 1.0, %v721_v0  ;;  %v4809_v34 = vmul.f32 %v2056_v22, %v4576_v16 }
 0x20c   :  { %v3107_v30 = vpop.eup %3106  ;;  %v2055_v24 = vadd.f32 1.0, %v1991_v62  ;;  %v1229_v54 = vadd.f32 -0.28449672, %v1165_v21  ;;  %v4812_v51 = vmul.f32 0.70710677, %v4798_v31  ;;  %v1420_v8 = vmul.f32 %v4669_v33, %v1356_v36 }
 0x20d   :  { %5731 = vst [vmem:[#allocation28_spill] sm:$0xff] %v4809_v34  ;;  %v1652_v32 = vmul.f32 1.442695, %v1549_v57  ;;  %v1166_v38 = vmul.f32 %v4752_v45, %v1102_v14  ;;  %3112 = vrcp.f32 %v785_v53  ;;  %v1993_v59 = vsel %vm1865_vm3, %v1801_v20, %v1929_v7  ;;  %v5733_v20 = vld [vmem:[#allocation41_spill] sm:$0xff] }
 0x20e   :  { %v1355_v61 = vadd.f32 0.2548296, %v1291_v10  ;;  %v1550_v1 = vmul.f32 %v1486_v13, %v4680_v2  ;;  %v4820_v16 = vand.u32 2147483647, %v4812_v51  ;;  %v1738_v62 = vmul.f32 %v3107_v30, %v1418_v29 }
 0x20f   :  { %v3109_v22 = vpop.eup %3108  ;;  %v1040_v21 = vmul.f32 %v4786_v41, %v976_v48  ;;  %v1552_v0 = vmul.f32 %v1488_v35, %v4718_v17  ;;  %v975_v33 = vadd.f32 -1.4531521, %v911_v42  ;;  %v4825_v57 = vmul.f32 %v2055_v24, %v4602_v56 }
 0x210   :  { %v1293_v36 = vmul.f32 %v4732_v37, %v1229_v54  ;;  %v722_v50 = vmul.f32 0.3275911, %v4820_v16  ;;  %v4831_v2 = vadd.f32 %v5733_v20, %v3466_v12  ;;  %v1740_v14 = vmul.f32 %v3109_v22, %v1420_v8  ;;  %v5734_v8 = vld [vmem:[#allocation43_spill] sm:$0xff] }
 0x211   :  { %5732 = vst [vmem:[#allocation56_spill] sm:$0xff] %v4825_v57  ;;  %3114 = vpow2.f32 %v1652_v32  ;;  %v1230_v7 = vadd.f32 -0.28449672, %v1166_v38  ;;  %v4834_v10 = vmul.f32 0.5, %v4692_v43  ;;  %v2057_v13 = vadd.f32 1.0, %v1993_v59 }
 0x212   :  { %vm1866_vm4 = vcmp.ge.f32.partialorder %v4565_v23, 0.0  ;;  %v1419_v56 = vmul.f32 %v4713_v15, %v1355_v61  ;;  %v1654_v17 = vmul.f32 1.442695, %v1550_v1  ;;  %v786_v35 = vadd.f32 1.0, %v722_v50 }
 0x213   :  { %v3111_v29 = vpop.eup %3110  ;;  %v1802_v48 = vsub.f32 1.0, %v1738_v62  ;;  %v1104_v42 = vadd.f32 1.4214138, %v1040_v21  ;;  %v1658_v53 = vmul.f32 1.442695, %v1552_v0  ;;  %v1039_v30 = vmul.f32 %v4801_v40, %v975_v33 }
 0x214   :  { %v1357_v24 = vadd.f32 0.2548296, %v1293_v36  ;;  %v1487_v32 = vsub.f32 0.0, %v4730_v9  ;;  %3116 = vrcp.f32 %v786_v35  ;;  %v4841_v43 = vmul.f32 0.70710677, %v4831_v2 }
 0x215   :  { %v1804_v38 = vsub.f32 1.0, %v1740_v14  ;;  %vm1868_vm5 = vcmp.ge.f32.partialorder %v4583_v52, 0.0  ;;  %v1294_v15 = vmul.f32 %v4752_v45, %v1230_v7  ;;  %v4846_v54 = vmul.f32 0.5, %v4697_v63 }
 0x216   :  { %v4850_v59 = vadd.f32 %v5734_v8, %v3474_v19  ;;  %v4853_v61 = vmul.f32 %v2057_v13, %v4605_v39  ;;  %v1739_v1 = vmul.f32 %v3111_v29, %v1419_v56  ;;  %3118 = vpow2.f32 %v1654_v17 }
 0x217   :  { %v4856_v22 = vand.u32 2147483647, %v4841_v43  ;;  %v4858_v62 = vpop.eup %3112  ;;  %v1930_v21 = vsub.f32 0.0, %v1802_v48  ;;  %v1168_v0 = vmul.f32 %v4786_v41, %v1104_v42  ;;  %3120 = vpow2.f32 %v1658_v53 }
 0x218   :  { %5735 = vst [vmem:[#allocation41_spill] sm:$0xff] %v4853_v61  ;;  %v1103_v63 = vadd.f32 1.4214138, %v1039_v30  ;;  %v1421_v33 = vmul.f32 %v4732_v37, %v1357_v24  ;;  %v1551_v36 = vmul.f32 %v1487_v32, %v4730_v9  ;;  %v913_v50 = vmul.f32 1.0614054, %v4858_v62  ;;  %v5736_v37 = vld [vmem:[#allocation16_spill] sm:$0xff] }
 0x219   :  { %v724_v39 = vmul.f32 0.3275911, %v4856_v22  ;;  %v1932_v20 = vsub.f32 0.0, %v1804_v38  ;;  %vm1867_vm6 = vcmp.ge.f32.partialorder %v4622_v49, 0.0  ;;  %v1358_v14 = vadd.f32 0.2548296, %v1294_v15 }
 0x21a   :  { %v1489_v7 = vsub.f32 0.0, %v4784_v58  ;;  %v4868_v13 = vmul.f32 0.70710677, %v4850_v59  ;;  %v1803_v56 = vsub.f32 1.0, %v1739_v1  ;;  %v977_v17 = vadd.f32 -1.4531521, %v913_v50 }
 0x21b   :  { %v788_v35 = vadd.f32 1.0, %v724_v39  ;;  %v4872_v29 = vadd.f32 %v5736_v37, %v3482_v26  ;;  %v3115_v9 = vpop.eup %3114  ;;  %v1994_v42 = vsel %vm1866_vm4, %v1802_v48, %v1930_v21  ;;  %v1232_v53 = vadd.f32 -0.28449672, %v1168_v0 }
 0x21c   :  { %v1167_v30 = vmul.f32 %v4801_v40, %v1103_v63  ;;  %v4878_v24 = vand.u32 2147483647, %v4868_v13  ;;  %v1741_v32 = vmul.f32 %v3115_v9, %v1421_v33  ;;  %v1656_v15 = vmul.f32 1.442695, %v1551_v36 }
 0x21d   :  { %v1041_v8 = vmul.f32 %v4858_v62, %v977_v17  ;;  %3122 = vrcp.f32 %v788_v35  ;;  %v1422_v1 = vmul.f32 %v4752_v45, %v1358_v14  ;;  %v4883_v50 = vmul.f32 0.5, %v4757_v3 }
 0x21e   :  { %v1553_v39 = vmul.f32 %v1489_v7, %v4784_v58  ;;  %v723_v23 = vmul.f32 0.3275911, %v4878_v24  ;;  %v4887_v48 = vpop.eup %3116  ;;  %v2058_v21 = vadd.f32 1.0, %v1994_v42  ;;  %v1996_v0 = vsel %vm1868_vm5, %v1804_v38, %v1932_v20 }
 0x21f   :  { %v1931_v63 = vsub.f32 0.0, %v1803_v56  ;;  %v4892_v33 = vmul.f32 0.70710677, %v4872_v29  ;;  %vm1869_vm7 = vcmp.ge.f32.partialorder %v4642_v18, 0.0  ;;  %v1296_v45 = vmul.f32 %v4786_v41, %v1232_v53 }
 0x220   :  { %v1231_v3 = vadd.f32 -0.28449672, %v1167_v30  ;;  %v914_v36 = vmul.f32 1.0614054, %v4887_v48  ;;  %v787_v58 = vadd.f32 1.0, %v723_v23  ;;  %v3119_v14 = vpop.eup %3118  ;;  %v1805_v7 = vsub.f32 1.0, %v1741_v32 }
 0x221   :  { %3124 = vpow2.f32 %v1656_v15  ;;  %v1105_v17 = vadd.f32 1.4214138, %v1041_v8  ;;  %v4898_v35 = vand.u32 2147483647, %v4892_v33  ;;  %v3121_v52 = vpop.eup %3120  ;;  %v1742_v38 = vmul.f32 %v3119_v14, %v1422_v1  ;;  %v5737_v30 = vld [vmem:[#allocation17_spill] sm:$0xff] }
 0x222   :  { %v1660_v20 = vmul.f32 1.442695, %v1553_v39  ;;  %v978_v37 = vadd.f32 -1.4531521, %v914_v36  ;;  %3126 = vrcp.f32 %v787_v58  ;;  %v2060_v9 = vadd.f32 1.0, %v1996_v0 }
 0x223   :  { %v1995_v42 = vsel %vm1867_vm6, %v1803_v56, %v1931_v63  ;;  %v725_v53 = vmul.f32 0.3275911, %v4898_v35  ;;  %v4905_v23 = vadd.f32 %v5737_v30, %v3464_v11  ;;  %v4908_v32 = vmul.f32 %v2058_v21, %v4683_v55 }
 0x224   :  { %v1360_v15 = vadd.f32 0.2548296, %v1296_v45  ;;  %v1295_v8 = vmul.f32 %v4801_v40, %v1231_v3  ;;  %v1042_v1 = vmul.f32 %v4887_v48, %v978_v37  ;;  %v1933_v39 = vsub.f32 0.0, %v1805_v7 }
 0x225   :  { %5738 = vst [vmem:[#allocation43_spill] sm:$0xff] %v4908_v32  ;;  %vm1870_vm8 = vcmp.ge.f32.partialorder %v4662_v4, 0.0  ;;  %v1169_v49 = vmul.f32 %v4858_v62, %v1105_v17  ;;  %v1490_v56 = vsub.f32 0.0, %v4820_v16  ;;  %v789_v0 = vadd.f32 1.0, %v725_v53 }
 0x226   :  { %v2059_v63 = vadd.f32 1.0, %v1995_v42  ;;  %v1806_v36 = vsub.f32 1.0, %v1742_v38  ;;  %3128 = vpow2.f32 %v1660_v20  ;;  %v4916_v58 = vmul.f32 0.5, %v4798_v31  ;;  %v5740_v38 = vld [vmem:[#allocation18_spill] sm:$0xff] }
 0x227   :  { %v4918_v55 = vpop.eup %3122  ;;  %v4921_v21 = vmul.f32 %v2060_v9, %v4702_v60  ;;  %v1106_v45 = vadd.f32 1.4214138, %v1042_v1  ;;  %3130 = vrcp.f32 %v789_v0  ;;  %v4924_v3 = vmul.f32 0.70710677, %v4905_v23 }
 0x228   :  { %v1424_v14 = vmul.f32 %v4786_v41, %v1360_v15  ;;  %v1359_v17 = vadd.f32 0.2548296, %v1295_v8  ;;  %v916_v37 = vmul.f32 1.0614054, %v4918_v55  ;;  %v4930_v20 = vadd.f32 %v5740_v38, %v3466_v12 }
 0x229   :  { %5739 = vst [vmem:[#allocation16_spill] sm:$0xff] %v4921_v21  ;;  %v1997_v31 = vsel %vm1869_vm7, %v1805_v7, %v1933_v39  ;;  %v1233_v42 = vadd.f32 -0.28449672, %v1169_v49  ;;  %v1554_v60 = vmul.f32 %v1490_v56, %v4820_v16  ;;  %v4936_v9 = vand.u32 2147483647, %v4924_v3  ;;  %v5742_v16 = vld [vmem:[#allocation6_spill] sm:$0xff] }
 0x22a   :  { %v4939_v53 = vmul.f32 %v2059_v63, %v4767_v46  ;;  %v1934_v41 = vsub.f32 0.0, %v1806_v36  ;;  %v4942_v30 = vmul.f32 0.5, %v4831_v2  ;;  %v980_v15 = vadd.f32 -1.4531521, %v916_v37 }
 0x22b   :  { %v3125_v8 = vpop.eup %3124  ;;  %v1170_v1 = vmul.f32 %v4887_v48, %v1106_v45  ;;  %v726_v18 = vmul.f32 0.3275911, %v4936_v9  ;;  %v4947_v7 = vmul.f32 0.70710677, %v4930_v20  ;;  %v4951_v39 = vadd.f32 %v5742_v16, %v3474_v19 }
 0x22c   :  { %5741 = vst [vmem:[#allocation17_spill] sm:$0xff] %v4939_v53  ;;  %v4953_v49 = vpop.eup %3126  ;;  %v2061_v46 = vadd.f32 1.0, %v1997_v31  ;;  %v1744_v56 = vmul.f32 %v3121_v52, %v1424_v14  ;;  %v1423_v2 = vmul.f32 %v4801_v40, %v1359_v17  ;;  %v1044_v0 = vmul.f32 %v4918_v55, %v980_v15 }
 0x22d   :  { %v1297_v63 = vmul.f32 %v4858_v62, %v1233_v42  ;;  %v1662_v45 = vmul.f32 1.442695, %v1554_v60  ;;  %v915_v37 = vmul.f32 1.0614054, %v4953_v49  ;;  %v790_v38 = vadd.f32 1.0, %v726_v18 }
 0x22e   :  { %v1998_v21 = vsel %vm1870_vm8, %v1806_v36, %v1934_v41  ;;  %v1108_v34 = vadd.f32 1.4214138, %v1044_v0  ;;  %v1492_v16 = vsub.f32 0.0, %v4856_v22  ;;  %v4963_v32 = vand.u32 2147483647, %v4947_v7 }
 0x22f   :  { %vm1872_vm9 = vcmp.ge.f32.partialorder %v4706_v47, 0.0  ;;  %v1234_v40 = vadd.f32 -0.28449672, %v1170_v1  ;;  %v979_v52 = vadd.f32 -1.4531521, %v915_v37  ;;  %3132 = vrcp.f32 %v790_v38 }
 0x230   :  { %v4967_v14 = vmul.f32 0.70710677, %v4951_v39  ;;  %v3129_v17 = vpop.eup %3128  ;;  %v1808_v31 = vsub.f32 1.0, %v1744_v56  ;;  %v1743_v42 = vmul.f32 %v3125_v8, %v1423_v2  ;;  %v1491_v4 = vsub.f32 0.0, %v4878_v24 }
 0x231   :  { %v728_v36 = vmul.f32 0.3275911, %v4963_v32  ;;  %v4971_v60 = vpop.eup %3130  ;;  %v1361_v41 = vadd.f32 0.2548296, %v1297_v63  ;;  %3134 = vpow2.f32 %v1662_v45  ;;  %v4974_v15 = vmul.f32 0.5, %v4850_v59 }
 0x232   :  { %v1043_v1 = vmul.f32 %v4953_v49, %v979_v52  ;;  %v2062_v18 = vadd.f32 1.0, %v1998_v21  ;;  %v1172_v0 = vmul.f32 %v4918_v55, %v1108_v34  ;;  %v1556_v37 = vmul.f32 %v1492_v16, %v4856_v22 }
 0x233   :  { %v917_v8 = vmul.f32 1.0614054, %v4971_v60  ;;  %vm1871_vm10 = vcmp.ge.f32.partialorder %v4722_v5, 0.0  ;;  %v1298_v56 = vmul.f32 %v4887_v48, %v1234_v40  ;;  %v792_v38 = vadd.f32 1.0, %v728_v36 }
 0x234   :  { %v1107_v2 = vadd.f32 1.4214138, %v1043_v1  ;;  %v4983_v63 = vand.u32 2147483647, %v4967_v14  ;;  %v1936_v59 = vsub.f32 0.0, %v1808_v31  ;;  %v1807_v45 = vsub.f32 1.0, %v1743_v42 }
 0x235   :  { %v1555_v52 = vmul.f32 %v1491_v4, %v4878_v24  ;;  %v981_v21 = vadd.f32 -1.4531521, %v917_v8  ;;  %v1425_v34 = vmul.f32 %v4858_v62, %v1361_v41  ;;  %3136 = vrcp.f32 %v792_v38  ;;  %v5743_v24 = vld [vmem:[#allocation22_spill] sm:$0xff] }
 0x236   :  { %v1171_v22 = vmul.f32 %v4953_v49, %v1107_v2  ;;  %v727_v16 = vmul.f32 0.3275911, %v4983_v63  ;;  %v1236_v61 = vadd.f32 -0.28449672, %v1172_v0  ;;  %v1666_v53 = vmul.f32 1.442695, %v1556_v37 }
 0x237   :  { %v1045_v40 = vmul.f32 %v4971_v60, %v981_v21  ;;  %v1493_v36 = vsub.f32 0.0, %v4898_v35  ;;  %v4992_v1 = vmul.f32 %v2061_v46, %v4781_v27  ;;  %v1362_v42 = vadd.f32 0.2548296, %v1298_v56 }
 0x238   :  { %v791_v57 = vadd.f32 1.0, %v727_v16  ;;  %v4996_v4 = vadd.f32 %v5743_v24, %v3482_v26  ;;  %v2000_v62 = vsel %vm1872_vm9, %v1808_v31, %v1936_v59  ;;  %v1935_v41 = vsub.f32 0.0, %v1807_v45 }
 0x239   :  { %v1235_v8 = vadd.f32 -0.28449672, %v1171_v22  ;;  %v1109_v0 = vadd.f32 1.4214138, %v1045_v40  ;;  %v5000_v37 = vpop.eup %3132  ;;  %v5003_v2 = vmul.f32 %v2062_v18, %v4791_v28  ;;  %v1745_v38 = vmul.f32 %v3129_v17, %v1425_v34  ;;  %v5745_v28 = vld [vmem:[#allocation47_spill] sm:$0xff] }
 0x23a   :  { %v1664_v27 = vmul.f32 1.442695, %v1555_v52  ;;  %3138 = vrcp.f32 %v791_v57  ;;  %v1300_v46 = vmul.f32 %v4918_v55, %v1236_v61  ;;  %v1557_v56 = vmul.f32 %v1493_v36, %v4898_v35 }
 0x23b   :  { %5744 = vst [vmem:[#allocation18_spill] sm:$0xff] %v5003_v2  ;;  %3140 = vpow2.f32 %v1666_v53  ;;  %v918_v21 = vmul.f32 1.0614054, %v5000_v37  ;;  %v3135_v47 = vpop.eup %3134  ;;  %v2064_v31 = vadd.f32 1.0, %v2000_v62  ;;  %v1426_v59 = vmul.f32 %v4887_v48, %v1362_v42 }
 0x23c   :  { %v5010_v22 = vmul.f32 0.70710677, %v4996_v4  ;;  %v5014_v18 = vadd.f32 %v5745_v28, %v3464_v11  ;;  %v1999_v57 = vsel %vm1871_vm10, %v1807_v45, %v1935_v41  ;;  %vm1873_vm11 = vcmp.ge.f32.partialorder %v4775_v25, 0.0 }
 0x23d   :  { %v1299_v61 = vmul.f32 %v4953_v49, %v1235_v8  ;;  %v1173_v35 = vmul.f32 %v4971_v60, %v1109_v0  ;;  %v982_v53 = vadd.f32 -1.4531521, %v918_v21  ;;  %v1809_v17 = vsub.f32 1.0, %v1745_v38 }
 0x23e   :  { %3142 = vpow2.f32 %v1664_v27  ;;  %v5022_v48 = vmul.f32 0.5, %v4872_v29  ;;  %v5025_v52 = vand.u32 2147483647, %v5010_v22  ;;  %v1364_v34 = vadd.f32 0.2548296, %v1300_v46 }
 0x23f   :  { %v1668_v16 = vmul.f32 1.442695, %v1557_v56  ;;  %v1046_v5 = vmul.f32 %v5000_v37, %v982_v53  ;;  %v5029_v45 = vmul.f32 0.70710677, %v5014_v18  ;;  %v5031_v40 = vpop.eup %3136  ;;  %v2063_v36 = vadd.f32 1.0, %v1999_v57 }
 0x240   :  { %v1746_v42 = vmul.f32 %v3135_v47, %v1426_v59  ;;  %v1494_v24 = vsub.f32 0.0, %v4936_v9  ;;  %v729_v62 = vmul.f32 0.3275911, %v5025_v52  ;;  %v5036_v29 = vmul.f32 %v2064_v31, %v4834_v10 }
 0x241   :  { %v1363_v41 = vadd.f32 0.2548296, %v1299_v61  ;;  %v1237_v8 = vadd.f32 -0.28449672, %v1173_v35  ;;  %v920_v0 = vmul.f32 1.0614054, %v5031_v40  ;;  %v1428_v21 = vmul.f32 %v4918_v55, %v1364_v34 }
 0x242   :  { %5746 = vst [vmem:[#allocation6_spill] sm:$0xff] %v5036_v29  ;;  %v1937_v38 = vsub.f32 0.0, %v1809_v17  ;;  %v1110_v27 = vadd.f32 1.4214138, %v1046_v5  ;;  %v1496_v46 = vsub.f32 0.0, %v4963_v32  ;;  %v793_v56 = vadd.f32 1.0, %v729_v62 }
 0x243   :  { %vm1874_vm12 = vcmp.ge.f32.partialorder %v4812_v51, 0.0  ;;  %3144 = vpow2.f32 %v1668_v16  ;;  %v984_v47 = vadd.f32 -1.4531521, %v920_v0  ;;  %v5043_v59 = vand.u32 2147483647, %v5029_v45  ;;  %v5747_v62 = vld [vmem:[#allocation27_spill] sm:$0xff] }
 0x244   :  { %v5045_v10 = vpop.eup %3138  ;;  %v1810_v31 = vsub.f32 1.0, %v1746_v42  ;;  %v5048_v28 = vmul.f32 0.5, %v4905_v23  ;;  %v1558_v57 = vmul.f32 %v1494_v24, %v4936_v9  ;;  %3146 = vrcp.f32 %v793_v56 }
 0x245   :  { %v3141_v61 = vpop.eup %3140  ;;  %v1427_v35 = vmul.f32 %v4953_v49, %v1363_v41  ;;  %v1301_v53 = vmul.f32 %v4971_v60, %v1237_v8  ;;  %v1048_v55 = vmul.f32 %v5031_v40, %v984_v47  ;;  %v919_v34 = vmul.f32 1.0614054, %v5045_v10 }
 0x246   :  { %v2001_v16 = vsel %vm1873_vm11, %v1809_v17, %v1937_v38  ;;  %v1174_v5 = vmul.f32 %v5000_v37, %v1110_v27  ;;  %v1560_v23 = vmul.f32 %v1496_v46, %v4963_v32  ;;  %v730_v42 = vmul.f32 0.3275911, %v5043_v59 }
 0x247   :  { %v5061_v9 = vmul.f32 %v2063_v36, %v4846_v54  ;;  %v1748_v24 = vmul.f32 %v3141_v61, %v1428_v21  ;;  %v1112_v49 = vadd.f32 1.4214138, %v1048_v55  ;;  %v5065_v41 = vadd.f32 %v5747_v62, %v3466_v12 }
 0x248   :  { %v3143_v8 = vpop.eup %3142  ;;  %v1938_v0 = vsub.f32 0.0, %v1810_v31  ;;  %v1670_v56 = vmul.f32 1.442695, %v1558_v57  ;;  %v983_v25 = vadd.f32 -1.4531521, %v919_v34  ;;  %v794_v17 = vadd.f32 1.0, %v730_v42 }
 0x249   :  { %v2065_v38 = vadd.f32 1.0, %v2001_v16  ;;  %v1747_v27 = vmul.f32 %v3143_v8, %v1427_v35  ;;  %v1365_v47 = vadd.f32 0.2548296, %v1301_v53  ;;  %v5068_v32 = vmul.f32 0.5, %v4930_v20  ;;  %v5748_v53 = vld [vmem:[#allocation13_spill] sm:$0xff] }
 0x24a   :  { %vm1876_vm13 = vcmp.ge.f32.partialorder %v4841_v43, 0.0  ;;  %v1238_v54 = vadd.f32 -0.28449672, %v1174_v5  ;;  %v1674_v36 = vmul.f32 1.442695, %v1560_v23  ;;  %v1047_v46 = vmul.f32 %v5045_v10, %v983_v25 }
 0x24b   :  { %3148 = vrcp.f32 %v794_v17  ;;  %v1812_v21 = vsub.f32 1.0, %v1748_v24  ;;  %v1176_v61 = vmul.f32 %v5031_v40, %v1112_v49  ;;  %v5074_v57 = vmul.f32 0.5, %v4951_v39 }
 0x24c   :  { %v5077_v55 = vmul.f32 0.70710677, %v5065_v41  ;;  %v2002_v20 = vsel %vm1874_vm12, %v1810_v31, %v1938_v0  ;;  %vm1875_vm14 = vcmp.ge.f32.partialorder %v4868_v13, 0.0  ;;  %3150 = vpow2.f32 %v1670_v56 }
 0x24d   :  { %v1495_v35 = vsub.f32 0.0, %v4983_v63  ;;  %v5085_v34 = vadd.f32 %v5748_v53, %v3474_v19  ;;  %v3145_v16 = vpop.eup %3144  ;;  %v1811_v5 = vsub.f32 1.0, %v1747_v27  ;;  %v1429_v39 = vmul.f32 %v4971_v60, %v1365_v47 }
 0x24e   :  { %v1111_v23 = vadd.f32 1.4214138, %v1047_v46  ;;  %v5089_v42 = vand.u32 2147483647, %v5077_v55  ;;  %v5091_v24 = vpop.eup %3146  ;;  %v5094_v51 = vmul.f32 %v2065_v38, %v4883_v50  ;;  %v1302_v31 = vmul.f32 %v5000_v37, %v1238_v54 }
 0x24f   :  { %3152 = vpow2.f32 %v1674_v36  ;;  %v5098_v49 = vmul.f32 0.70710677, %v5085_v34  ;;  %v1940_v62 = vsub.f32 0.0, %v1812_v21  ;;  %v1240_v8 = vadd.f32 -0.28449672, %v1176_v61 }
 0x250   :  { %5749 = vst [vmem:[#allocation22_spill] sm:$0xff] %v5094_v51  ;;  %v921_v0 = vmul.f32 1.0614054, %v5091_v24  ;;  %v1497_v60 = vsub.f32 0.0, %v5025_v52  ;;  %v2066_v56 = vadd.f32 1.0, %v2002_v20  ;;  %v1559_v25 = vmul.f32 %v1495_v35, %v4983_v63 }
 0x251   :  { %v732_v17 = vmul.f32 0.3275911, %v5089_v42  ;;  %v5105_v50 = vand.u32 2147483647, %v5098_v49  ;;  %v1939_v38 = vsub.f32 0.0, %v1811_v5  ;;  %v1749_v27 = vmul.f32 %v3145_v16, %v1429_v39 }
 0x252   :  { %v1175_v47 = vmul.f32 %v5045_v10, %v1111_v23  ;;  %v985_v54 = vadd.f32 -1.4531521, %v921_v0  ;;  %v1366_v36 = vadd.f32 0.2548296, %v1302_v31  ;;  %v5109_v46 = vmul.f32 0.5, %v4996_v4  ;;  %v5750_v23 = vld [vmem:[#allocation51_spill] sm:$0xff] }
 0x253   :  { %v796_v61 = vadd.f32 1.0, %v732_v17  ;;  %v731_v53 = vmul.f32 0.3275911, %v5105_v50  ;;  %v2004_v63 = vsel %vm1876_vm13, %v1812_v21, %v1940_v62  ;;  %v1304_v20 = vmul.f32 %v5031_v40, %v1240_v8 }
 0x254   :  { %v1049_v35 = vmul.f32 %v5091_v24, %v985_v54  ;;  %v1561_v29 = vmul.f32 %v1497_v60, %v5025_v52  ;;  %vm1877_vm15 = vcmp.ge.f32.partialorder %v4892_v33, 0.0  ;;  %v1498_v39 = vsub.f32 0.0, %v5043_v59 }
 0x255   :  { %v5117_v16 = vpop.eup %3148  ;;  %3154 = vrcp.f32 %v796_v61  ;;  %v795_v4 = vadd.f32 1.0, %v731_v53  ;;  %v5123_v31 = vadd.f32 %v5750_v23, %v3482_v26  ;;  %v2003_v43 = vsel %vm1875_vm14, %v1811_v5, %v1939_v38 }
 0x256   :  { %v1813_v21 = vsub.f32 1.0, %v1749_v27  ;;  %v1239_v62 = vadd.f32 -0.28449672, %v1175_v47  ;;  %v922_v8 = vmul.f32 1.0614054, %v5117_v16  ;;  %v3151_v52 = vpop.eup %3150  ;;  %v2068_v0 = vadd.f32 1.0, %v2004_v63 }
 0x257   :  { %v1430_v60 = vmul.f32 %v5000_v37, %v1366_v36  ;;  %v1672_v17 = vmul.f32 1.442695, %v1559_v25  ;;  %3156 = vrcp.f32 %v795_v4  ;;  %v5130_v54 = vmul.f32 %v2066_v56, %v4916_v58  ;;  %v5751_v25 = vld [vmem:[#allocation33_spill] sm:$0xff] }
 0x258   :  { %v1368_v61 = vadd.f32 0.2548296, %v1304_v20  ;;  %v1113_v53 = vadd.f32 1.4214138, %v1049_v35  ;;  %v986_v23 = vadd.f32 -1.4531521, %v922_v8  ;;  %v1562_v5 = vmul.f32 %v1498_v39, %v5043_v59 }
 0x259   :  { %v3153_v2 = vpop.eup %3152  ;;  %v2067_v51 = vadd.f32 1.0, %v2003_v43  ;;  %v1676_v13 = vmul.f32 1.442695, %v1561_v29  ;;  %v5134_v38 = vmul.f32 0.70710677, %v5123_v31  ;;  %v1941_v27 = vsub.f32 0.0, %v1813_v21 }
 0x25a   :  { %v1303_v47 = vmul.f32 %v5045_v10, %v1239_v62  ;;  %v1050_v37 = vmul.f32 %v5117_v16, %v986_v23  ;;  %v5140_v58 = vadd.f32 %v5751_v25, %v3464_v11  ;;  %v1750_v56 = vmul.f32 %v3151_v52, %v1430_v60  ;;  %v5754_v60 = vld [vmem:[#allocation32_spill] sm:$0xff]  ;;  %v5756_v25 = vld [vmem:[#allocation21_spill] sm:$0xff] }
 0x25b   :  { %3158 = vpow2.f32 %v1672_v17  ;;  %v5143_v36 = vmul.f32 0.5, %v5014_v18  ;;  %v5146_v29 = vand.u32 2147483647, %v5134_v38  ;;  %v5149_v59 = vmul.f32 %v2068_v0, %v4942_v30  ;;  %v5753_v0 = vld [vmem:[#allocation31_spill] sm:$0xff] }
 0x25c   :  { %v1432_v63 = vmul.f32 %v5031_v40, %v1368_v61  ;;  %v1177_v20 = vmul.f32 %v5091_v24, %v1113_v53  ;;  %v1114_v35 = vadd.f32 1.4214138, %v1050_v37  ;;  %v5154_v39 = vmul.f32 %v2067_v51, %v4974_v15 }
 0x25d   :  { %5752 = vst [vmem:[#allocation47_spill] sm:$0xff] %v5149_v59  ;;  %3160 = vpow2.f32 %v1676_v13  ;;  %v1678_v4 = vmul.f32 1.442695, %v1562_v5  ;;  %v733_v43 = vmul.f32 0.3275911, %v5146_v29  ;;  %v2005_v18 = vsel %vm1877_vm15, %v1813_v21, %v1941_v27 }
 0x25e   :  { %vm1878_vm0 = vcmp.ge.f32.partialorder %v4924_v3, 0.0  ;;  %v1367_v62 = vadd.f32 0.2548296, %v1303_v47  ;;  %v1500_v30 = vsub.f32 0.0, %v5089_v42  ;;  %v5162_v40 = vmul.f32 0.70710677, %v5140_v58 }
 0x25f   :  { %v5164_v8 = vpop.eup %3154  ;;  %v1814_v52 = vsub.f32 1.0, %v1750_v56  ;;  %v5167_v15 = vmul.f32 0.5, %v5065_v41  ;;  %v797_v51 = vadd.f32 1.0, %v733_v43  ;;  %v2151_v17 = vpack.c.bf16 %v5754_v60, %v5753_v0  ;;  %v5755_v41 = vld [vmem:[#allocation52_spill] sm:$0xff] }
 0x260   :  { %v1752_v33 = vmul.f32 %v3153_v2, %v1432_v63  ;;  %v1241_v21 = vadd.f32 -0.28449672, %v1177_v20  ;;  %v1178_v61 = vmul.f32 %v5117_v16, %v1114_v35  ;;  %v924_v53 = vmul.f32 1.0614054, %v5164_v8  ;;  %v5757_v56 = vld [vmem:[#allocation20_spill] sm:$0xff] }
 0x261   :  { %v5173_v23 = vpop.eup %3156  ;;  %v2069_v13 = vadd.f32 1.0, %v2005_v18  ;;  %3162 = vrcp.f32 %v797_v51  ;;  %v5176_v5 = vand.u32 2147483647, %v5162_v40  ;;  %v5180_v27 = vadd.f32 %v5755_v41, %v3466_v12  ;;  %2477 = vmatprep.mubr.bf16.mxu0 %v2151_v17 }
 0x262   :  { %v1431_v47 = vmul.f32 %v5045_v10, %v1367_v62  ;;  %3164 = vpow2.f32 %v1678_v4  ;;  %v988_v2 = vadd.f32 -1.4531521, %v924_v53  ;;  %v1564_v37 = vmul.f32 %v1500_v30, %v5089_v42 }
 0x263   :  { %v5758_v63 = vpack.c.bf16 %v5756_v25, %v5757_v56  ;;  %v1942_v20 = vsub.f32 0.0, %v1814_v52  ;;  %vm1880_vm1 = vcmp.ge.f32.partialorder %v4947_v7, 0.0  ;;  %v923_v35 = vmul.f32 1.0614054, %v5173_v23  ;;  %v5759_v56 = vld [vmem:[#allocation15_spill] sm:$0xff] }
 0x264   :  { %v1499_v43 = vsub.f32 0.0, %v5105_v50  ;;  %v734_v18 = vmul.f32 0.3275911, %v5176_v5  ;;  %v1816_v51 = vsub.f32 1.0, %v1752_v33  ;;  %v1305_v10 = vmul.f32 %v5091_v24, %v1241_v21 }
 0x265   :  { %2478 = vmatmul.mubr.bf16.vlgmr.msra.gmra.mrb[32].mxu0 %v5758_v63  ;;  %v1242_v4 = vadd.f32 -0.28449672, %v1178_v61  ;;  %v1052_v62 = vmul.f32 %v5164_v8, %v988_v2  ;;  %v3159_v42 = vpop.eup %3158  ;;  %v5194_v30 = vmul.f32 %v2069_v13, %v5022_v48  ;;  %v987_v0 = vadd.f32 -1.4531521, %v923_v35  ;;  %v5760_v63 = vld [vmem:[#allocation34_spill] sm:$0xff] }
 0x266   :  { %v798_v60 = vadd.f32 1.0, %v734_v18  ;;  %v5197_v17 = vmul.f32 0.70710677, %v5180_v27  ;;  %v1751_v53 = vmul.f32 %v3159_v42, %v1431_v47  ;;  %v1682_v25 = vmul.f32 1.442695, %v1564_v37  ;;  %v5761_v18 = vld [vmem:[#allocation24_spill] sm:$0xff] }
 0x267   :  { %v1116_v41 = vadd.f32 1.4214138, %v1052_v62  ;;  %v2153_v33 = vpack.c.bf16 %v5760_v63, %v5759_v56  ;;  %v3161_v59 = vpop.eup %3160  ;;  %v2006_v21 = vsel %vm1878_vm0, %v1814_v52, %v1942_v20  ;;  %v1051_v61 = vmul.f32 %v5173_v23, %v987_v0  ;;  %v5762_v62 = vld [vmem:[#allocation23_spill] sm:$0xff] }
 0x268   :  { %3166 = vrcp.f32 %v798_v60  ;;  %v5205_v48 = vand.u32 2147483647, %v5197_v17  ;;  %v1944_v13 = vsub.f32 0.0, %v1816_v51  ;;  %v1369_v2 = vadd.f32 0.2548296, %v1305_v10 }
 0x269   :  { %v1180_v35 = vmul.f32 %v5164_v8, %v1116_v41  ;;  %v1563_v47 = vmul.f32 %v1499_v43, %v5105_v50  ;;  %2574 = vmatprep.mubr.bf16.mxu1 %v2153_v33  ;;  %vm1879_vm2 = vcmp.ge.f32.partialorder %v4967_v14, 0.0  ;;  %v1306_v37 = vmul.f32 %v5117_v16, %v1242_v4  ;;  %v5764_v50 = vld [vmem:[#allocation5_spill] sm:$0xff] }
 0x26a   :  { %v5212_v3 = vmul.f32 0.5, %v5085_v34  ;;  %v1115_v52 = vadd.f32 1.4214138, %v1051_v61  ;;  %v736_v20 = vmul.f32 0.3275911, %v5205_v48  ;;  %v5763_v42 = vpack.c.bf16 %v5761_v18, %v5762_v62 }
 0x26b   :  { %v2070_v10 = vadd.f32 1.0, %v2006_v21  ;;  %v1815_v0 = vsub.f32 1.0, %v1751_v53  ;;  %3168 = vpow2.f32 %v1682_v25  ;;  %v5220_v43 = vadd.f32 %v5764_v50, %v3474_v19  ;;  %v5222_v60 = vpop.eup %3162 }
 0x26c   :  { %2575 = vmatmul.mubr.bf16.vlgmr.msra.gmra.mrb[32].mxu1 %v5763_v42  ;;  %v1244_v4 = vadd.f32 -0.28449672, %v1180_v35  ;;  %v1179_v34 = vmul.f32 %v5173_v23, %v1115_v52  ;;  %v1501_v41 = vsub.f32 0.0, %v5146_v29  ;;  %v800_v56 = vadd.f32 1.0, %v736_v20  ;;  %v3165_v63 = vpop.eup %3164  ;;  %v5765_v42 = vld [vmem:[#allocation36_spill] sm:$0xff] }
 0x26d   :  { %v2008_v33 = vsel %vm1880_vm1, %v1816_v51, %v1944_v13  ;;  %v1433_v21 = vmul.f32 %v5091_v24, %v1369_v2  ;;  %v1680_v53 = vmul.f32 1.442695, %v1563_v47  ;;  %v925_v25 = vmul.f32 1.0614054, %v5222_v60 }
 0x26e   :  { %v1370_v61 = vadd.f32 0.2548296, %v1306_v37  ;;  %v1243_v18 = vadd.f32 -0.28449672, %v1179_v34  ;;  %3170 = vrcp.f32 %v800_v56  ;;  %v5231_v62 = vmul.f32 0.70710677, %v5220_v43 }
 0x26f   :  { %v5234_v35 = vmul.f32 %v2070_v10, %v5048_v28  ;;  %v1943_v52 = vsub.f32 0.0, %v1815_v0  ;;  %v989_v20 = vadd.f32 -1.4531521, %v925_v25  ;;  %v5238_v7 = vadd.f32 %v5765_v42, %v3482_v26 }
 0x270   :  { %v1308_v24 = vmul.f32 %v5164_v8, %v1244_v4  ;;  %v1565_v51 = vmul.f32 %v1501_v41, %v5146_v29  ;;  %v1502_v13 = vsub.f32 0.0, %v5176_v5  ;;  %v5244_v2 = vand.u32 2147483647, %v5231_v62 }
 0x271   :  { %5766 = vst [vmem:[#allocation27_spill] sm:$0xff] %v5238_v7  ;;  %v2072_v47 = vadd.f32 1.0, %v2008_v33  ;;  %v1307_v37 = vmul.f32 %v5173_v23, %v1243_v18  ;;  %v5248_v28 = vmul.f32 0.5, %v5123_v31  ;;  %v1053_v10 = vmul.f32 %v5222_v60, %v989_v20 }
 0x272   :  { %v5251_v50 = vpop.eup %3166  ;;  %v1753_v34 = vmul.f32 %v3161_v59, %v1433_v21  ;;  %v1434_v4 = vmul.f32 %v5117_v16, %v1370_v61  ;;  %3172 = vpow2.f32 %v1680_v53  ;;  %v735_v29 = vmul.f32 0.3275911, %v5244_v2 }
 0x273   :  { %v2007_v41 = vsel %vm1879_vm2, %v1815_v0, %v1943_v52  ;;  %v1117_v56 = vadd.f32 1.4214138, %v1053_v10  ;;  %v926_v33 = vmul.f32 1.0614054, %v5251_v50  ;;  %v5259_v25 = vmul.f32 0.70710677, %v5238_v7 }
 0x274   :  { %v1372_v31 = vadd.f32 0.2548296, %v1308_v24  ;;  %v1684_v18 = vmul.f32 1.442695, %v1565_v51  ;;  %v1566_v20 = vmul.f32 %v1502_v13, %v5176_v5  ;;  %v799_v42 = vadd.f32 1.0, %v735_v29  ;;  %v5768_v13 = vld [vmem:[#allocation19_spill] sm:$0xff] }
 0x275   :  { %5767 = vst [vmem:[#allocation13_spill] sm:$0xff] %v5259_v25  ;;  %v3169_v59 = vpop.eup %3168  ;;  %vm1881_vm3 = vcmp.ge.f32.partialorder %v5010_v22, 0.0  ;;  %v1371_v16 = vadd.f32 0.2548296, %v1307_v37  ;;  %v1181_v21 = vmul.f32 %v5222_v60, %v1117_v56  ;;  %v990_v53 = vadd.f32 -1.4531521, %v926_v33 }
 0x276   :  { %v5265_v14 = vand.u32 2147483647, %v5259_v25  ;;  %v1817_v0 = vsub.f32 1.0, %v1753_v34  ;;  %v1754_v61 = vmul.f32 %v3165_v63, %v1434_v4  ;;  %v5268_v52 = vmul.f32 0.5, %v5140_v58 }
 0x277   :  { %3174 = vrcp.f32 %v799_v42  ;;  %v1245_v24 = vadd.f32 -0.28449672, %v1181_v21  ;;  %v1054_v5 = vmul.f32 %v5251_v50, %v990_v53  ;;  %v5274_v37 = vadd.f32 %v5768_v13, %v3464_v11 }
 0x278   :  { %v737_v51 = vmul.f32 0.3275911, %v5265_v14  ;;  %v5276_v10 = vpop.eup %3170  ;;  %v2071_v29 = vadd.f32 1.0, %v2007_v41  ;;  %v1436_v56 = vmul.f32 %v5164_v8, %v1372_v31  ;;  %3176 = vpow2.f32 %v1684_v18 }
 0x279   :  { %v1686_v63 = vmul.f32 1.442695, %v1566_v20  ;;  %v1435_v58 = vmul.f32 %v5173_v23, %v1371_v16  ;;  %v1309_v34 = vmul.f32 %v5222_v60, %v1245_v24  ;;  %v1118_v4 = vadd.f32 1.4214138, %v1054_v5 }
 0x27a   :  { %v928_v33 = vmul.f32 1.0614054, %v5276_v10  ;;  %v1945_v42 = vsub.f32 0.0, %v1817_v0  ;;  %v1818_v21 = vsub.f32 1.0, %v1754_v61  ;;  %vm1882_vm4 = vcmp.ge.f32.partialorder %v5029_v45, 0.0 }
 0x27b   :  { %v1504_v11 = vsub.f32 0.0, %v5205_v48  ;;  %v801_v53 = vadd.f32 1.0, %v737_v51  ;;  %v1373_v13 = vadd.f32 0.2548296, %v1309_v34  ;;  %v1182_v41 = vmul.f32 %v5251_v50, %v1118_v4 }
 0x27c   :  { %v992_v8 = vadd.f32 -1.4531521, %v928_v33  ;;  %v5286_v31 = vmul.f32 0.70710677, %v5274_v37  ;;  %v3173_v23 = vpop.eup %3172  ;;  %v5289_v18 = vmul.f32 %v2072_v47, %v5068_v32  ;;  %v5292_v20 = vmul.f32 %v2071_v29, %v5074_v57  ;;  %v5769_v32 = vld [vmem:[#allocation38_spill] sm:$0xff] }
 0x27d   :  { %v1756_v16 = vmul.f32 %v3169_v59, %v1436_v56  ;;  %3178 = vrcp.f32 %v801_v53  ;;  %v1755_v61 = vmul.f32 %v3173_v23, %v1435_v58  ;;  %v1246_v24 = vadd.f32 -0.28449672, %v1182_v41 }
 0x27e   :  { %3180 = vpow2.f32 %v1686_v63  ;;  %v1056_v5 = vmul.f32 %v5276_v10, %v992_v8  ;;  %v2009_v51 = vsel %vm1881_vm3, %v1817_v0, %v1945_v42  ;;  %v1568_v34 = vmul.f32 %v1504_v11, %v5205_v48 }
 0x27f   :  { %v674_v4 = vand.u32 2147483647, %v5286_v31  ;;  %v5301_v47 = vadd.f32 %v5769_v32, %v3466_v12  ;;  %v1946_v57 = vsub.f32 0.0, %v1818_v21  ;;  %v1437_v59 = vmul.f32 %v5222_v60, %v1373_v13 }
 0x280   :  { %v1310_v29 = vmul.f32 %v5251_v50, %v1246_v24  ;;  %v1120_v56 = vadd.f32 1.4214138, %v1056_v5  ;;  %v1820_v58 = vsub.f32 1.0, %v1756_v16  ;;  %vm1884_vm5 = vcmp.ge.f32.partialorder %v5077_v55, 0.0 }
 0x281   :  { %v5305_v63 = vpop.eup %3174  ;;  %vm1883_vm6 = vcmp.ge.f32.partialorder %v5098_v49, 0.0  ;;  %v1503_v22 = vsub.f32 0.0, %v5244_v2  ;;  %v738_v48 = vmul.f32 0.3275911, %v674_v4  ;;  %v5311_v0 = vmul.f32 0.70710677, %v5301_v47 }
 0x282   :  { %v1819_v12 = vsub.f32 1.0, %v1755_v61  ;;  %v1374_v33 = vadd.f32 0.2548296, %v1310_v29  ;;  %v1184_v60 = vmul.f32 %v5276_v10, %v1120_v56  ;;  %v927_v42 = vmul.f32 1.0614054, %v5305_v63  ;;  %v3177_v11 = vpop.eup %3176  ;;  %v5774_v49 = vld [vmem:[#allocation42_spill] sm:$0xff] }
 0x283   :  { %v2073_v53 = vadd.f32 1.0, %v2009_v51  ;;  %v1690_v13 = vmul.f32 1.442695, %v1568_v34  ;;  %v802_v41 = vadd.f32 1.0, %v738_v48  ;;  %v676_v8 = vand.u32 2147483647, %v5311_v0 }
 0x284   :  { %v2010_v23 = vsel %vm1882_vm4, %v1818_v21, %v1946_v57  ;;  %v1757_v16 = vmul.f32 %v3177_v11, %v1437_v59  ;;  %v1248_v24 = vadd.f32 -0.28449672, %v1184_v60  ;;  %v991_v5 = vadd.f32 -1.4531521, %v927_v42 }
 0x285   :  { %v1438_v32 = vmul.f32 %v5251_v50, %v1374_v33  ;;  %v1567_v61 = vmul.f32 %v1503_v22, %v5244_v2  ;;  %3182 = vrcp.f32 %v802_v41  ;;  %v740_v29 = vmul.f32 0.3275911, %v676_v8  ;;  %v5770_v33 = vld [vmem:[#allocation54_spill] sm:$0xff] }
 0x286   :  { %v1948_v56 = vsub.f32 0.0, %v1820_v58  ;;  %v1947_v7 = vsub.f32 0.0, %v1819_v12  ;;  %v1312_v51 = vmul.f32 %v5276_v10, %v1248_v24  ;;  %v1505_v34 = vsub.f32 0.0, %v5265_v14 }
 0x287   :  { %v5322_v48 = vpop.eup %3178  ;;  %v5325_v45 = vmul.f32 %v2073_v53, %v5109_v46  ;;  %vm1885_vm7 = vcmp.ge.f32.partialorder %v5134_v38, 0.0  ;;  %3184 = vpow2.f32 %v1690_v13  ;;  %v1055_v50 = vmul.f32 %v5305_v63, %v991_v5 }
 0x288   :  { %v804_v21 = vadd.f32 1.0, %v740_v29  ;;  %v3181_v2 = vpop.eup %3180  ;;  %v2074_v57 = vadd.f32 1.0, %v2010_v23  ;;  %v1821_v59 = vsub.f32 1.0, %v1757_v16  ;;  %v1506_v22 = vsub.f32 0.0, %v674_v4 }
 0x289   :  { %v5331_v60 = vadd.f32 %v5770_v33, %v3474_v19  ;;  %v1758_v42 = vmul.f32 %v3181_v2, %v1438_v32  ;;  %v1688_v11 = vmul.f32 1.442695, %v1567_v61  ;;  %v929_v41 = vmul.f32 1.0614054, %v5322_v48  ;;  %v5773_v61 = vld [vmem:[#allocation12_spill] sm:$0xff] }
 0x28a   :  { %3186 = vrcp.f32 %v804_v21  ;;  %v2012_v46 = vsel %vm1884_vm5, %v1820_v58, %v1948_v56  ;;  %v2011_v53 = vsel %vm1883_vm6, %v1819_v12, %v1947_v7  ;;  %v1376_v13 = vadd.f32 0.2548296, %v1312_v51 }
 0x28b   :  { %5771 = vst [vmem:[#allocation51_spill] sm:$0xff] %v5331_v60  ;;  %v1569_v23 = vmul.f32 %v1505_v34, %v5265_v14  ;;  %v1119_v16 = vadd.f32 1.4214138, %v1055_v50  ;;  %v993_v24 = vadd.f32 -1.4531521, %v929_v41  ;;  %v5344_v19 = vadd.f32 %v4769_v6, %v3482_v26 }
 0x28c   :  { %v5340_v5 = vmul.f32 0.70710677, %v5331_v60  ;;  %v1949_v32 = vsub.f32 0.0, %v1821_v59  ;;  %vm1886_vm8 = vcmp.ge.f32.partialorder %v5162_v40, 0.0  ;;  %v1570_v55 = vmul.f32 %v1506_v22, %v674_v4 }
 0x28d   :  { %5772 = vst [vmem:[#allocation33_spill] sm:$0xff] %v5344_v19  ;;  %v1508_v58 = vsub.f32 0.0, %v676_v8  ;;  %v2155_v7 = vpack.c.bf16 %v5774_v49, %v5773_v61  ;;  %v5350_v12 = vmul.f32 %v2074_v57, %v5143_v36  ;;  %v1822_v14 = vsub.f32 1.0, %v1758_v42 }
 0x28e   :  { %v1057_v29 = vmul.f32 %v5322_v48, %v993_v24  ;;  %v5354_v56 = vand.u32 2147483647, %v5340_v5  ;;  %v1440_v26 = vmul.f32 %v5276_v10, %v1376_v13  ;;  %3188 = vpow2.f32 %v1688_v11 }
 0x28f   :  { %v1692_v6 = vmul.f32 1.442695, %v1569_v23  ;;  %v5358_v51 = vmul.f32 0.70710677, %v5344_v19  ;;  %2485 = vmatprep.mubr.bf16.mxu0 %v2155_v7  ;;  %v5360_v4 = vpop.eup %3182  ;;  %v2076_v34 = vadd.f32 1.0, %v2012_v46  ;;  %v2075_v50 = vadd.f32 1.0, %v2011_v53 }
 0x290   :  { %v1183_v36 = vmul.f32 %v5305_v63, %v1119_v16  ;;  %v739_v21 = vmul.f32 0.3275911, %v5354_v56  ;;  %v2013_v2 = vsel %vm1885_vm7, %v1821_v59, %v1949_v32  ;;  %v930_v57 = vmul.f32 1.0614054, %v5360_v4  ;;  %v5776_v23 = vld [vmem:[#allocation40_spill] sm:$0xff]  ;;  %v5800_v19 = vld [vmem:[#allocation10_spill] sm:$0xff] }
 0x291   :  { %5775 = vst [vmem:[#allocation31_spill] sm:$0xff] %v5358_v51  ;;  %v1694_v10 = vmul.f32 1.442695, %v1570_v55  ;;  %v1572_v22 = vmul.f32 %v1508_v58, %v676_v8  ;;  %v3185_v33 = vpop.eup %3184  ;;  %v1950_v42 = vsub.f32 0.0, %v1822_v14  ;;  %v1121_v11 = vadd.f32 1.4214138, %v1057_v29 }
 0x292   :  { %v803_v41 = vadd.f32 1.0, %v739_v21  ;;  %v5368_v13 = vand.u32 2147483647, %v5358_v51  ;;  %v5370_v46 = vmul.f32 %v3185_v33, %v1440_v26  ;;  %3190 = vpow2.f32 %v1692_v6  ;;  %v5777_v16 = vld [vmem:[#allocation44_spill] sm:$0xff]  ;;  %v5778_v21 = vld [vmem:[#allocation35_spill] sm:$0xff]  ;;  %v5780_v33 = vld [vmem:[#allocation9_spill] sm:$0xff] }
 0x293   :  { %v994_v53 = vadd.f32 -1.4531521, %v930_v57  ;;  %v2157_v24 = vpack.c.bf16 %v5777_v16, %v5776_v23  ;;  %v5377_v59 = vmul.f32 %v2076_v34, %v5167_v15  ;;  %v5380_v8 = vmul.f32 %v2075_v50, %v5212_v3  ;;  %v5783_v23 = vld [vmem:[#allocation49_spill] sm:$0xff]  ;;  %v5802_v51 = vld [vmem:[#allocation28_spill] sm:$0xff] }
 0x294   :  { %v5374_v38 = vpop.eup %3186  ;;  %v1247_v32 = vadd.f32 -0.28449672, %v1183_v36  ;;  %3192 = vrcp.f32 %v803_v41  ;;  %v2077_v55 = vadd.f32 1.0, %v2013_v2  ;;  %v741_v49 = vmul.f32 0.3275911, %v5368_v13  ;;  %v5779_v2 = vld [vmem:[#allocation29_spill] sm:$0xff] }
 0x295   :  { %v1058_v58 = vmul.f32 %v5360_v4, %v994_v53  ;;  %v932_v61 = vmul.f32 1.0614054, %v5374_v38  ;;  %2582 = vmatprep.mubr.bf16.mxu1 %v2157_v24  ;;  %v2014_v7 = vsel %vm1886_vm8, %v1822_v14, %v1950_v42  ;;  %v1185_v29 = vmul.f32 %v5322_v48, %v1121_v11  ;;  %v5781_v41 = vld [vmem:[#allocation14_spill] sm:$0xff]  ;;  %v5782_v53 = vld [vmem:[#allocation7_spill] sm:$0xff]  ;;  %v5784_v24 = vld [vmem:[#allocation25_spill] sm:$0xff] }
 0x296   :  { %3194 = vpow2.f32 %v1694_v10  ;;  %v1698_v15 = vmul.f32 1.442695, %v1572_v22  ;;  %v5602_v3 = vsub.f32 1.0, %v5370_v46  ;;  %v805_v34 = vadd.f32 1.0, %v741_v49 }
 0x297   :  { %v1122_v26 = vadd.f32 1.4214138, %v1058_v58  ;;  %v996_v6 = vadd.f32 -1.4531521, %v932_v61  ;;  %v1311_v50 = vmul.f32 %v5305_v63, %v1247_v32  ;;  %v1507_v36 = vsub.f32 0.0, %v5354_v56  ;;  %v5785_v32 = vld [vmem:[#allocation50_spill] sm:$0xff] }
 0x298   :  { %v2154_v57 = vpack.c.bf16 %v5779_v2, %v5778_v21  ;;  %v2156_v40 = vpack.c.bf16 %v5781_v41, %v5780_v33  ;;  %v5395_v14 = vpop.eup %3188  ;;  %v5398_v10 = vmul.f32 %v2077_v55, %v5248_v28  ;;  %3196 = vrcp.f32 %v805_v34  ;;  %v5786_v55 = vld [vmem:[#allocation45_spill] sm:$0xff]  ;;  %v5787_v21 = vld [vmem:[#allocation26_spill] sm:$0xff]  ;;  %v5789_v2 = vld [vmem:[#allocation48_spill] sm:$0xff] }
 0x299   :  { %v1186_v22 = vmul.f32 %v5360_v4, %v1122_v26  ;;  %v1060_v42 = vmul.f32 %v5374_v38, %v996_v6  ;;  %v1249_v11 = vadd.f32 -0.28449672, %v1185_v29  ;;  %3198 = vpow2.f32 %v1698_v15  ;;  %v5788_v34 = vld [vmem:[#allocation46_spill] sm:$0xff] }
 0x29a   :  { %2486 = vmatmul.mubr.bf16.gmra.mrb[36].mxu0 %v2154_v57  ;;  %2583 = vmatmul.mubr.bf16.gmra.mrb[36].mxu1 %v2156_v40  ;;  %v2159_v16 = vpack.c.bf16 %v5783_v23, %v5782_v53  ;;  %v2161_v58 = vpack.c.bf16 %v5785_v32, %v5784_v24  ;;  %v5406_v61 = vadd.f32 1.0, %v2014_v7  ;;  %v2158_v26 = vpack.c.bf16 %v5787_v21, %v5786_v55  ;;  %v5790_v40 = vld [vmem:[#allocation53_spill] sm:$0xff]  ;;  %v5792_v53 = vld [vmem:[#allocation55_spill] sm:$0xff]  ;;  %v5794_v24 = vld [vmem:[#allocation8_spill] sm:$0xff] }
 0x29b   :  { %v1250_v49 = vadd.f32 -0.28449672, %v1186_v22  ;;  %v1124_v28 = vadd.f32 1.4214138, %v1060_v42  ;;  %v5412_v6 = vsub.f32 0.0, %v5602_v3  ;;  %v1571_v15 = vmul.f32 %v1507_v36, %v5354_v56  ;;  %v5791_v42 = vld [vmem:[#allocation37_spill] sm:$0xff] }
 0x29c   :  { %v1375_v29 = vadd.f32 0.2548296, %v1311_v50  ;;  %2493 = vmatprep.mubr.bf16.mxu0 %v2159_v16  ;;  %2590 = vmatprep.mubr.bf16.mxu1 %v2161_v58  ;;  %v2160_v57 = vpack.c.bf16 %v5789_v2, %v5788_v34  ;;  %v5417_v33 = vpop.eup %3190  ;;  %v2163_v22 = vpack.c.bf16 %v4747_v44, %v5790_v40  ;;  %v2165_v23 = vpack.c.bf16 %v5792_v53, %v5791_v42  ;;  %v5793_v16 = vld [vmem:[#allocation30_spill] sm:$0xff]  ;;  %v5795_v58 = vld [vmem:[#allocation11_spill] sm:$0xff]  ;;  %v5797_v44 = vld [vmem:[#allocation56_spill] sm:$0xff] }
 0x29d   :  { %v1314_v7 = vmul.f32 %v5360_v4, %v1250_v49  ;;  %v1188_v41 = vmul.f32 %v5374_v38, %v1124_v28  ;;  %v1313_v56 = vmul.f32 %v5322_v48, %v1249_v11  ;;  %v1509_v36 = vsub.f32 0.0, %v5368_v13  ;;  %v5796_v55 = vld [vmem:[#allocation39_spill] sm:$0xff]  ;;  %v5798_v2 = vld [vmem:[#allocation17_spill] sm:$0xff] }
 0x29e   :  { %v5425_v50 = vpop.eup %3192  ;;  %v2162_v32 = vpack.c.bf16 %v5794_v24, %v5793_v16  ;;  %v2164_v49 = vpack.c.bf16 %v5796_v55, %v5795_v58  ;;  %v2167_v40 = vpack.c.bf16 %v5798_v2, %v5797_v44  ;;  %vm1888_vm9 = vcmp.ge.f32.partialorder %v5197_v17, 0.0  ;;  %v5799_v53 = vld [vmem:[#allocation41_spill] sm:$0xff]  ;;  %v5801_v16 = vld [vmem:[#allocation43_spill] sm:$0xff]  ;;  %v5803_v58 = vld [vmem:[#allocation16_spill] sm:$0xff] }
 0x29f   :  { %v1378_v21 = vadd.f32 0.2548296, %v1314_v7  ;;  %v1252_v28 = vadd.f32 -0.28449672, %v1188_v41  ;;  %v931_v34 = vmul.f32 1.0614054, %v5425_v50  ;;  %v1439_v11 = vmul.f32 %v5305_v63, %v1375_v29 }
 0x2a0   :  { %v3195_v42 = vpop.eup %3194  ;;  %v2169_v3 = vpack.c.bf16 %v4992_v1, %v5799_v53  ;;  %v1377_v2 = vadd.f32 0.2548296, %v1313_v56  ;;  %v1696_v25 = vmul.f32 1.442695, %v1571_v15  ;;  %v5804_v63 = vld [vmem:[#allocation22_spill] sm:$0xff]  ;;  %vm1890_vm10 = vcmp.ge.f32.partialorder %v5286_v31, 0.0 }
 0x2a1   :  { %v1442_v41 = vmul.f32 %v5360_v4, %v1378_v21  ;;  %v1316_v55 = vmul.f32 %v5374_v38, %v1252_v28  ;;  %v995_v60 = vadd.f32 -1.4531521, %v931_v34  ;;  %v5805_v29 = vld [vmem:[#allocation18_spill] sm:$0xff]  ;;  %v1573_v28 = vmul.f32 %v1509_v36, %v5368_v13 }
 0x2a2   :  { %2494 = vmatmul.mubr.bf16.gmra.mrb[40].mxu0 %v2158_v26  ;;  %2591 = vmatmul.mubr.bf16.gmra.mrb[40].mxu1 %v2160_v57  ;;  %v5452_v24 = vpop.eup %3196  ;;  %v5806_v15 = vld [vmem:[#allocation6_spill] sm:$0xff]  ;;  %v5807_v57 = vld [vmem:[#allocation47_spill] sm:$0xff]  ;;  %3200 = vpow2.f32 %v1696_v25  ;;  %v2176_v36 = vpack.c.bf16 %v5377_v59, %v5289_v18  ;;  %v1441_v53 = vmul.f32 %v5322_v48, %v1377_v2  ;;  %vm1892_vm11 = vcmp.ge.f32.partialorder %v5311_v0, 0.0 }
 0x2a3   :  { %v1762_v7 = vmul.f32 %v3195_v42, %v1442_v41  ;;  %v1380_v4 = vadd.f32 0.2548296, %v1316_v55  ;;  %v1059_v21 = vmul.f32 %v5425_v50, %v995_v60  ;;  %2501 = vmatprep.mubr.bf16.mxu0 %v2163_v22  ;;  %2598 = vmatprep.mubr.bf16.mxu1 %v2165_v23  ;;  %v3199_v56 = vpop.eup %3198  ;;  %v933_v26 = vmul.f32 1.0614054, %v5452_v24 }
 0x2a4   :  { %v1759_v42 = vmul.f32 %v5395_v14, %v1439_v11  ;;  %v2174_v23 = vpack.c.bf16 %v5350_v12, %v5234_v35  ;;  %v1700_v44 = vmul.f32 1.442695, %v1573_v28  ;;  %v546_v14 = vmul.f32 0.5, %v5274_v37 }
 0x2a5   :  { %v1826_v41 = vsub.f32 1.0, %v1762_v7  ;;  %v1444_v60 = vmul.f32 %v5374_v38, %v1380_v4  ;;  %v1123_v13 = vadd.f32 1.4214138, %v1059_v21  ;;  %v997_v22 = vadd.f32 -1.4531521, %v933_v26 }
 0x2a6   :  { %v5808_v38 = vsub.f32 1.0, %v5370_v46  ;;  %v5481_v28 = vmul.f32 %v5406_v61, %v5268_v52  ;;  %v1823_v31 = vsub.f32 1.0, %v1759_v42  ;;  %3202 = vpow2.f32 %v1700_v44 }
 0x2a7   :  { %v1954_v55 = vsub.f32 0.0, %v1826_v41  ;;  %v1764_v34 = vmul.f32 %v3199_v56, %v1444_v60  ;;  %v1187_v1 = vmul.f32 %v5425_v50, %v1123_v13  ;;  %v1061_v25 = vmul.f32 %v5452_v24, %v997_v22 }
 0x2a8   :  { %v2016_v11 = vsel %vm1888_vm9, %v5808_v38, %v5412_v6  ;;  %v1761_v6 = vmul.f32 %v5417_v33, %v1441_v53  ;;  %v544_v61 = vmul.f32 0.5, %v5180_v27  ;;  %v1951_v42 = vsub.f32 0.0, %v1823_v31 }
 0x2a9   :  { %v2018_v7 = vsel %vm1890_vm10, %v1826_v41, %v1954_v55  ;;  %v1828_v4 = vsub.f32 1.0, %v1764_v34  ;;  %v1251_v21 = vadd.f32 -0.28449672, %v1187_v1  ;;  %v1125_v37 = vadd.f32 1.4214138, %v1061_v25 }
 0x2aa   :  { %v2082_v48 = vadd.f32 1.0, %v2018_v7  ;;  %2502 = vmatmul.mubr.bf16.gmra.mrb[44].mxu0 %v2162_v32  ;;  %2599 = vmatmul.mubr.bf16.gmra.mrb[44].mxu1 %v2164_v49  ;;  %v2080_v17 = vadd.f32 1.0, %v2016_v11  ;;  %v548_v32 = vmul.f32 0.5, %v5301_v47  ;;  %v1825_v41 = vsub.f32 1.0, %v1761_v6  ;;  %v5813_v7 = vld [vmem:[#allocation13_spill] sm:$0xff] }
 0x2ab   :  { %v1956_v2 = vsub.f32 0.0, %v1828_v4  ;;  %v1315_v46 = vmul.f32 %v5425_v50, %v1251_v21  ;;  %2509 = vmatprep.mubr.bf16.mxu0 %v2167_v40  ;;  %2606 = vmatprep.mubr.bf16.mxu1 %v2169_v3  ;;  %v1189_v52 = vmul.f32 %v5452_v24, %v1125_v37  ;;  %vm1887_vm12 = vcmp.ge.f32.partialorder %v5231_v62, 0.0 }
 0x2ac   :  { %v2146_v1 = vmul.f32 %v2082_v48, %v546_v14  ;;  %v3201_v3 = vpop.eup %3200  ;;  %v2144_v44 = vmul.f32 %v2080_v17, %v544_v61  ;;  %v5809_v47 = vpack.c.bf16 %v5801_v16, %v5800_v19  ;;  %v5810_v13 = vpack.c.bf16 %v5803_v58, %v5802_v51 }
 0x2ad   :  { %v2020_v56 = vsel %vm1892_vm11, %v1828_v4, %v1956_v2  ;;  %v1379_v0 = vadd.f32 0.2548296, %v1315_v46  ;;  %v1253_v26 = vadd.f32 -0.28449672, %v1189_v52  ;;  %v5811_v14 = vpack.c.bf16 %v5154_v39, %v5061_v9  ;;  %v5814_v39 = vld [vmem:[#allocation51_spill] sm:$0xff] }
 0x2ae   :  { %v2084_v49 = vadd.f32 1.0, %v2020_v56  ;;  %v2178_v34 = vpack.c.bf16 %v2146_v1, %v5481_v28  ;;  %v5812_v25 = vpack.c.bf16 %v5194_v30, %v5804_v63  ;;  %v1953_v62 = vsub.f32 0.0, %v1825_v41  ;;  %v5820_v1 = vld [vmem:[#allocation27_spill] sm:$0xff] }
 0x2af   :  { %v1443_v40 = vmul.f32 %v5425_v50, %v1379_v0  ;;  %v1317_v53 = vmul.f32 %v5452_v24, %v1253_v26  ;;  %v2015_v50 = vsel %vm1887_vm12, %v1823_v31, %v1951_v42  ;;  %vm1891_vm13 = vcmp.ge.f32.partialorder %v5340_v5, 0.0  ;;  %v5817_v31 = vld [vmem:[#allocation31_spill] sm:$0xff] }
 0x2b0   :  { %v2148_v33 = vmul.f32 %v2084_v49, %v548_v32  ;;  %v3203_v19 = vpop.eup %3202  ;;  %v2079_v11 = vadd.f32 1.0, %v2015_v50  ;;  %v543_v58 = vmul.f32 0.5, %v5220_v43  ;;  %vm1889_vm14 = vcmp.ge.f32.partialorder %v5813_v7, 0.0  ;;  %v5534_v32 = vld [vmem:[%s5568_s4] ss:$0 sm:$0xff]  ;;  %s3229_s4 = smov [#allocation2]  }
 0x2b1   :  { %v1763_v60 = vmul.f32 %v3201_v3, %v1443_v40  ;;  %v1381_v27 = vadd.f32 0.2548296, %v1317_v53  ;;  %v2017_v9 = vsel %vm1889_vm14, %v1825_v41, %v1953_v62  ;;  %v547_v21 = vmul.f32 0.5, %v5814_v39  ;;  %s2660_s23 = sshll.u32 %s3229_s4, 4  ;;  %s2661_s23 = int_to_ptr.vmem [resolvable:$true] %s2660_s23 }
 0x2b2   :  { %2510 = vmatmul.mubr.bf16.gmra.mrb[48].mxu0 %v5809_v47  ;;  %2607 = vmatmul.mubr.bf16.gmra.mrb[48].mxu1 %v5810_v13  ;;  %v2180_v22 = vpack.c.bf16 %v2148_v33, %v2144_v44  ;;  %v2143_v63 = vmul.f32 %v2079_v11, %v543_v58  ;;  %v5816_v5 = vpack.c.bf16 %v5807_v57, %v5806_v15  ;;  %v2081_v43 = vadd.f32 1.0, %v2017_v9  ;;  %s3204_s24 = scalar_lea.vmem %s2661_s23, 2048  ;;  %p3209_p1 = scmp.lt.s32.totalorder %s2661_s23, %s2661_s23 }
 0x2b3   :  { %v1827_v55 = vsub.f32 1.0, %v1763_v60  ;;  %2517 = vmatprep.mubr.bf16.mxu0 %v5811_v14  ;;  %2614 = vmatprep.mubr.bf16.mxu1 %v5812_v25  ;;  %v1445_v38 = vmul.f32 %v5452_v24, %v1381_v27  ;;  %v5815_v24 = vpack.c.bf16 %v5130_v54, %v5805_v29  ;;  %vm1893_vm15 = vcmp.ge.f32.partialorder %v5817_v31, 0.0  ;;  %v5821_v29 = vld [vmem:[#allocation33_spill] sm:$0xff]  ;;  %p3205_p0 = scmp.ne.s32.totalorder %s2661_s23, %s3204_s24  ;;  %p3210_p2 = scmp.lt.s32.totalorder %s3204_s24, %s3204_s24 }
 0x2b4   :  { %v5818_v2 = vpack.c.bf16 %v5380_v8, %v5292_v20  ;;  %v5819_v46 = vpack.c.bf16 %v5398_v10, %v5325_v45  ;;  %v545_v54 = vmul.f32 0.5, %v5820_v1  ;;  %v549_v52 = vmul.f32 0.5, %v5821_v29 }
 0x2b5   :  { %v1955_v16 = vsub.f32 0.0, %v1827_v55  ;;  %v1765_v51 = vmul.f32 %v3203_v19, %v1445_v38  ;;  %p3211_p3 = por %p3210_p2, %p3209_p1 }
 0x2b6   :  { %v2145_v15 = vmul.f32 %v2081_v43, %v545_v54 }
 0x2b7   :  { %v2019_v4 = vsel %vm1891_vm13, %v1827_v55, %v1955_v16  ;;  %v1829_v30 = vsub.f32 1.0, %v1765_v51  ;;  %p3212_p4 = pnand %p3211_p3, %p3205_p0 }
 0x2b8   :  { %v2083_v28 = vadd.f32 1.0, %v2019_v4 }
 0x2b9   :  { %v1957_v37 = vsub.f32 0.0, %v1829_v30 }
 0x2ba   :  { %v2147_v48 = vmul.f32 %v2083_v28, %v547_v21  ;;  %2518 = vmatmul.mubr.bf16.gmra.mrb[52].mxu0 %v5815_v24  ;;  %2615 = vmatmul.mubr.bf16.gmra.mrb[52].mxu1 %v5816_v5 }
 0x2bb   :  { %2525 = vmatprep.mubr.bf16.mxu0 %v5818_v2  ;;  %2622 = vmatprep.mubr.bf16.mxu1 %v5819_v46  ;;  %v2021_v17 = vsel %vm1893_vm15, %v1829_v30, %v1957_v37 }
 0x2bc   :  { %v2179_v6 = vpack.c.bf16 %v2147_v48, %v2143_v63  ;;  %v2085_v61 = vadd.f32 1.0, %v2021_v17 }
 0x2be   :  { %v2149_v57 = vmul.f32 %v2085_v61, %v549_v52 }
 0x2c0   :  { %v2181_v56 = vpack.c.bf16 %v2149_v57, %v2145_v15 }
 0x2c2   :  { %2526 = vmatmul.mubr.bf16.gmra.mrb[56].mxu0 %v2174_v23  ;;  %2623 = vmatmul.mubr.bf16.gmra.mrb[56].mxu1 %v2176_v36 }
 0x2c3   :  { %2533 = vmatprep.mubr.bf16.mxu0 %v2179_v6  ;;  %2630 = vmatprep.mubr.bf16.mxu1 %v2181_v56 }
 0x2ca   :  { %2534 = vmatmul.mubr.bf16.gmra.mrb[60].mxu0 %v2178_v34  ;;  %2631 = vmatmul.mubr.bf16.gmra.mrb[60].mxu1 %v2180_v22 }
 0x338   :  { %v2752_v20 = vpop.f32.mrb[32].mxu0 }
 0x339   :  { %v2753_v45 = vpop.f32.mrb[33].mxu0 }
 0x33a   :  { %v2754_v8 = vadd.f32 %v2753_v45, %v2752_v20  ;;  %v2755_v10 = vpop.f32.mrb[34].mxu0 }
 0x33b   :  { %v2756_v0 = vpop.f32.mrb[35].mxu0 }
 0x33c   :  { %v2757_v35 = vadd.f32 %v2756_v0, %v2755_v10  ;;  %v2480_v23 = vadd.f32 %v2754_v8, %v5534_v32 }
 0x33e   :  { %v2483_v49 = vadd.f32 %v2757_v35, %v5534_v32 }
 0x33f   :  { %v2816_v12 = vpop.f32.mrb[32].mxu1 }
 0x340   :  { %v2817_v18 = vpop.f32.mrb[33].mxu1 }
 0x341   :  { %v2818_v59 = vadd.f32 %v2817_v18, %v2816_v12  ;;  %v2819_v36 = vpop.f32.mrb[34].mxu1 }
 0x342   :  { %v2820_v26 = vpop.f32.mrb[35].mxu1 }
 0x343   :  { %v2577_v34 = vadd.f32 %v2818_v59, %v2480_v23  ;;  %v2821_v42 = vadd.f32 %v2820_v26, %v2819_v36 }
 0x345   :  { %2639 = vst [vmem:[#allocation2] sm:$0xff] %v2577_v34  ;;  %v2580_v40 = vadd.f32 %v2821_v42, %v2483_v49 }
 0x347   :  { %2640 = vst [vmem:[#allocation2 + $0x8] sm:$0xff] %v2580_v40 }
 0x36d   :  { %v2758_v3 = vpop.f32.mrb[36].mxu0  ;;  %v2822_v44 = vpop.f32.mrb[36].mxu1 }
 0x36e   :  { %v2759_v41 = vpop.f32.mrb[37].mxu0  ;;  %v2823_v33 = vpop.f32.mrb[37].mxu1 }
 0x36f   :  { %v2760_v53 = vadd.f32 %v2759_v41, %v2758_v3  ;;  %v2824_v60 = vadd.f32 %v2823_v33, %v2822_v44  ;;  %v2761_v27 = vpop.f32.mrb[38].mxu0  ;;  %v2825_v47 = vpop.f32.mrb[38].mxu1 }
 0x370   :  { %v2762_v13 = vpop.f32.mrb[39].mxu0  ;;  %v2826_v22 = vpop.f32.mrb[39].mxu1 }
 0x371   :  { %v2488_v50 = vadd.f32 %v2760_v53, %v5534_v32  ;;  %v2763_v55 = vadd.f32 %v2762_v13, %v2761_v27  ;;  %v2827_v14 = vadd.f32 %v2826_v22, %v2825_v47 }
 0x373   :  { %v2585_v25 = vadd.f32 %v2824_v60, %v2488_v50  ;;  %v2491_v62 = vadd.f32 %v2763_v55, %v5534_v32 }
 0x375   :  { %2641 = vst [vmem:[#allocation2 + $0x10] sm:$0xff] %v2585_v25  ;;  %v2588_v38 = vadd.f32 %v2827_v14, %v2491_v62  ;;  %v2764_v19 = vpop.f32.mrb[40].mxu0  ;;  %v2828_v16 = vpop.f32.mrb[40].mxu1 }
 0x376   :  { %v2765_v11 = vpop.f32.mrb[41].mxu0  ;;  %v2829_v51 = vpop.f32.mrb[41].mxu1 }
 0x377   :  { %2642 = vst [vmem:[#allocation2 + $0x18] sm:$0xff] %v2588_v38  ;;  %v2766_v58 = vadd.f32 %v2765_v11, %v2764_v19  ;;  %v2830_v7 = vadd.f32 %v2829_v51, %v2828_v16  ;;  %v2767_v4 = vpop.f32.mrb[42].mxu0  ;;  %v2831_v9 = vpop.f32.mrb[42].mxu1 }
 0x378   :  { %v2768_v39 = vpop.f32.mrb[43].mxu0  ;;  %v2832_v21 = vpop.f32.mrb[43].mxu1 }
 0x379   :  { %v2496_v28 = vadd.f32 %v2766_v58, %v5534_v32  ;;  %v2769_v30 = vadd.f32 %v2768_v39, %v2767_v4  ;;  %v2833_v63 = vadd.f32 %v2832_v21, %v2831_v9 }
 0x37b   :  { %v2593_v48 = vadd.f32 %v2830_v7, %v2496_v28  ;;  %v2499_v37 = vadd.f32 %v2769_v30, %v5534_v32 }
 0x37d   :  { %2643 = vst [vmem:[#allocation2 + $0x20] sm:$0xff] %v2593_v48  ;;  %v2596_v24 = vadd.f32 %v2833_v63, %v2499_v37  ;;  %v2770_v5 = vpop.f32.mrb[44].mxu0  ;;  %v2834_v43 = vpop.f32.mrb[44].mxu1 }
 0x37e   :  { %v2771_v31 = vpop.f32.mrb[45].mxu0  ;;  %v2835_v2 = vpop.f32.mrb[45].mxu1 }
 0x37f   :  { %2644 = vst [vmem:[#allocation2 + $0x28] sm:$0xff] %v2596_v24  ;;  %v2772_v46 = vadd.f32 %v2771_v31, %v2770_v5  ;;  %v2836_v17 = vadd.f32 %v2835_v2, %v2834_v43  ;;  %v2773_v6 = vpop.f32.mrb[46].mxu0  ;;  %v2837_v1 = vpop.f32.mrb[46].mxu1 }
 0x380   :  { %v2774_v54 = vpop.f32.mrb[47].mxu0  ;;  %v2838_v29 = vpop.f32.mrb[47].mxu1 }
 0x381   :  { %v2504_v52 = vadd.f32 %v2772_v46, %v5534_v32  ;;  %v2775_v61 = vadd.f32 %v2774_v54, %v2773_v6  ;;  %v2839_v15 = vadd.f32 %v2838_v29, %v2837_v1 }
 0x383   :  { %v2601_v57 = vadd.f32 %v2836_v17, %v2504_v52  ;;  %v2507_v56 = vadd.f32 %v2775_v61, %v5534_v32 }
 0x385   :  { %2645 = vst [vmem:[#allocation2 + $0x30] sm:$0xff] %v2601_v57  ;;  %v2604_v20 = vadd.f32 %v2839_v15, %v2507_v56  ;;  %v2776_v45 = vpop.f32.mrb[48].mxu0  ;;  %v2840_v8 = vpop.f32.mrb[48].mxu1 }
 0x386   :  { %v2777_v10 = vpop.f32.mrb[49].mxu0  ;;  %v2841_v0 = vpop.f32.mrb[49].mxu1 }
 0x387   :  { %2646 = vst [vmem:[#allocation2 + $0x38] sm:$0xff] %v2604_v20  ;;  %v2778_v35 = vadd.f32 %v2777_v10, %v2776_v45  ;;  %v2842_v12 = vadd.f32 %v2841_v0, %v2840_v8  ;;  %v2779_v23 = vpop.f32.mrb[50].mxu0  ;;  %v2843_v18 = vpop.f32.mrb[50].mxu1 }
 0x388   :  { %v2780_v59 = vpop.f32.mrb[51].mxu0  ;;  %v2844_v36 = vpop.f32.mrb[51].mxu1 }
 0x389   :  { %v2512_v49 = vadd.f32 %v2778_v35, %v5534_v32  ;;  %v2781_v26 = vadd.f32 %v2780_v59, %v2779_v23  ;;  %v2845_v34 = vadd.f32 %v2844_v36, %v2843_v18 }
 0x38b   :  { %v2609_v42 = vadd.f32 %v2842_v12, %v2512_v49  ;;  %v2515_v40 = vadd.f32 %v2781_v26, %v5534_v32 }
 0x38d   :  { %2647 = vst [vmem:[#allocation2 + $0x40] sm:$0xff] %v2609_v42  ;;  %v2612_v3 = vadd.f32 %v2845_v34, %v2515_v40  ;;  %v2782_v44 = vpop.f32.mrb[52].mxu0  ;;  %v2846_v41 = vpop.f32.mrb[52].mxu1 }
 0x38e   :  { %v2783_v33 = vpop.f32.mrb[53].mxu0  ;;  %v2847_v53 = vpop.f32.mrb[53].mxu1 }
 0x38f   :  { %2648 = vst [vmem:[#allocation2 + $0x48] sm:$0xff] %v2612_v3  ;;  %v2784_v60 = vadd.f32 %v2783_v33, %v2782_v44  ;;  %v2848_v27 = vadd.f32 %v2847_v53, %v2846_v41  ;;  %v2785_v47 = vpop.f32.mrb[54].mxu0  ;;  %v2849_v13 = vpop.f32.mrb[54].mxu1 }
 0x390   :  { %v2786_v22 = vpop.f32.mrb[55].mxu0  ;;  %v2850_v50 = vpop.f32.mrb[55].mxu1 }
 0x391   :  { %v2520_v55 = vadd.f32 %v2784_v60, %v5534_v32  ;;  %v2787_v14 = vadd.f32 %v2786_v22, %v2785_v47  ;;  %v2851_v25 = vadd.f32 %v2850_v50, %v2849_v13 }
 0x393   :  { %v2617_v62 = vadd.f32 %v2848_v27, %v2520_v55  ;;  %v2523_v38 = vadd.f32 %v2787_v14, %v5534_v32 }
 0x395   :  { %2649 = vst [vmem:[#allocation2 + $0x50] sm:$0xff] %v2617_v62  ;;  %v2620_v19 = vadd.f32 %v2851_v25, %v2523_v38  ;;  %v2788_v16 = vpop.f32.mrb[56].mxu0  ;;  %v2852_v11 = vpop.f32.mrb[56].mxu1 }
 0x396   :  { %v2789_v51 = vpop.f32.mrb[57].mxu0  ;;  %v2853_v58 = vpop.f32.mrb[57].mxu1 }
 0x397   :  { %2650 = vst [vmem:[#allocation2 + $0x58] sm:$0xff] %v2620_v19  ;;  %v2790_v7 = vadd.f32 %v2789_v51, %v2788_v16  ;;  %v2854_v4 = vadd.f32 %v2853_v58, %v2852_v11  ;;  %v2791_v9 = vpop.f32.mrb[58].mxu0  ;;  %v2855_v39 = vpop.f32.mrb[58].mxu1 }
 0x398   :  { %v2792_v21 = vpop.f32.mrb[59].mxu0  ;;  %v2856_v28 = vpop.f32.mrb[59].mxu1 }
 0x399   :  { %v2528_v30 = vadd.f32 %v2790_v7, %v5534_v32  ;;  %v2793_v63 = vadd.f32 %v2792_v21, %v2791_v9  ;;  %v2857_v48 = vadd.f32 %v2856_v28, %v2855_v39 }
 0x39b   :  { %v2625_v37 = vadd.f32 %v2854_v4, %v2528_v30  ;;  %v2531_v24 = vadd.f32 %v2793_v63, %v5534_v32 }
 0x39d   :  { %2651 = vst [vmem:[#allocation2 + $0x60] sm:$0xff] %v2625_v37  ;;  %v2628_v5 = vadd.f32 %v2857_v48, %v2531_v24  ;;  %v2794_v43 = vpop.f32.mrb[60].mxu0  ;;  %v2858_v31 = vpop.f32.mrb[60].mxu1 }
 0x39e   :  { %v2795_v2 = vpop.f32.mrb[61].mxu0  ;;  %v2859_v46 = vpop.f32.mrb[61].mxu1 }
 0x39f   :  { %2652 = vst [vmem:[#allocation2 + $0x68] sm:$0xff] %v2628_v5  ;;  %v2796_v17 = vadd.f32 %v2795_v2, %v2794_v43  ;;  %v2860_v6 = vadd.f32 %v2859_v46, %v2858_v31  ;;  %v2797_v1 = vpop.f32.mrb[62].mxu0  ;;  %v2861_v54 = vpop.f32.mrb[62].mxu1 }
 0x3a0   :  { %v2798_v29 = vpop.f32.mrb[63].mxu0  ;;  %v2862_v52 = vpop.f32.mrb[63].mxu1 }
 0x3a1   :  { %v2536_v61 = vadd.f32 %v2796_v17, %v5534_v32  ;;  %v2799_v15 = vadd.f32 %v2798_v29, %v2797_v1  ;;  %v2863_v57 = vadd.f32 %v2862_v52, %v2861_v54 }
 0x3a3   :  { %v2633_v56 = vadd.f32 %v2860_v6, %v2536_v61  ;;  %v2539_v20 = vadd.f32 %v2799_v15, %v5534_v32 }
 0x3a5   :  { %2653 = vst [vmem:[#allocation2 + $0x70] sm:$0xff] %v2633_v56  ;;  %v2636_v45 = vadd.f32 %v2863_v57, %v2539_v20 }
 0x3a7   :  { %2654 = vst [vmem:[#allocation2 + $0x78] sm:$0xff] %v2636_v45 }
 0x3a8   :  { %3215 = shalt.err (!%p3212_p4)
}
 0x3a9   :  { %s3216_s0 = scalar_lea.hbm %s5569_s5, 2048 }
 0x3aa   :  { %p3217_p5 = scmp.ne.s32.totalorder %s5569_s5, %s3216_s0  ;;  %p3220_p6 = scmp.lt.u32.totalorder %s3216_s0, %s5569_s5 }
 0x3ac   :  { %p3222_p7 = pnand %p3220_p6, %p3217_p5 }
 0x3ae   :  { %3225 = shalt.err (!%p3222_p7)
}
 0x3af   :  { %s3230_s6 = smov 128   ;;  %s3231_s7 = smov 8  }
 0x3b0   :  { %2666 = dma.vmem_to_hbm [thread:$0]  %s2661_s23, 2048, %s5569_s5, [#allocation3], %s3230_s6, %s3230_s6, %s3231_s7  }
 0x3b1   :  { %3226 = dma.done.wait [#allocation3], 2048  }
 0x3b2   :  { %3227 = vsyncadd [#allocation3], 4294965248 }
 0x3b3   :  { %2670 = vsyncpa [#allocation3], 1 }

</bundles_post_ra>
